<compile_context>
chip_gen: v6e
topology: v6e:2x2x1
jax: 0.10.0
libtpu: 0.0.40
codegen_flags: <defaults>
</compile_context>

<pallas_src>
import functools

import numpy as np
import jax
import jax.numpy as jnp
from jax.experimental import pallas as pl
from jax.experimental.pallas import tpu as pltpu


def _round_up(x, m):
    return ((x + m - 1) // m) * m


def _cdiv(a, b):
    return -(-a // b)


# ---------------------------------------------------------------------------
# Deterministic parameter construction (replaces librosa_mel_fn / hann buffer)
# ---------------------------------------------------------------------------
def _hz_to_mel_slaney(f):
    f = np.asarray(f, dtype=np.float64)
    f_sp = 200.0 / 3.0
    mels = f / f_sp
    min_log_hz = 1000.0
    min_log_mel = min_log_hz / f_sp
    logstep = np.log(6.4) / 27.0
    return np.where(f >= min_log_hz,
                    min_log_mel + np.log(np.maximum(f, 1e-10) / min_log_hz) / logstep,
                    mels)


def _mel_to_hz_slaney(m):
    m = np.asarray(m, dtype=np.float64)
    f_sp = 200.0 / 3.0
    freqs = m * f_sp
    min_log_hz = 1000.0
    min_log_mel = min_log_hz / f_sp
    logstep = np.log(6.4) / 27.0
    return np.where(m >= min_log_mel, min_log_hz * np.exp(logstep * (m - min_log_mel)), freqs)


def librosa_mel_fn(sr, n_fft, n_mels, fmin, fmax):
    """Slaney-style mel filterbank (same as librosa.filters.mel defaults)."""
    n_freq = n_fft // 2 + 1
    fftfreqs = np.linspace(0.0, sr / 2.0, n_freq)
    mel_pts = np.linspace(_hz_to_mel_slaney(fmin), _hz_to_mel_slaney(fmax), n_mels + 2)
    mel_f = _mel_to_hz_slaney(mel_pts)
    fdiff = np.diff(mel_f)
    ramps = mel_f[:, None] - fftfreqs[None, :]
    weights = np.zeros((n_mels, n_freq), dtype=np.float64)
    for i in range(n_mels):
        lower = -ramps[i] / fdiff[i]
        upper = ramps[i + 2] / fdiff[i + 1]
        weights[i] = np.maximum(0.0, np.minimum(lower, upper))
    enorm = 2.0 / (mel_f[2: n_mels + 2] - mel_f[:n_mels])
    weights *= enorm[:, None]
    return weights.astype(np.float32)


def hann_window_periodic(n):
    # torch.hann_window(N) default periodic=True: 0.5 - 0.5*cos(2*pi*k/N)
    k = np.arange(n, dtype=np.float64)
    return 0.5 - 0.5 * np.cos(2.0 * np.pi * k / n)


# ---------------------------------------------------------------------------
# Pallas kernel
#   chunks tile + next-tile peek -> in-kernel framing -> fused windowed DFT matmul
#   -> |.| -> bf16 mel matmul -> log compression / clamp
# ---------------------------------------------------------------------------
def audio2mel_kernel(a_ref, nxt_ref, dft_ref, melT_ref, out_ref, *, n_freq, hop, cpf):
    # a_ref:    (1, TILE_R, hop)   bf16  hop-chunks of the current frame tile
    # nxt_ref:  (1, EXTRA, hop)    bf16  first chunks of the next tile (frame overlap)
    # dft_ref:  (n_fft, 2*n_freq)  bf16  [cos*win | -sin*win], window folded in
    # melT_ref: (n_freq, n_mel_p)  bf16  mel basis^T, zero-padded to 128 lanes
    # out_ref:  (1, TILE_R, n_mel_p) f32
    a = a_ref[0]                                    # (TILE_R, hop)
    nxt = nxt_ref[0]                                # (EXTRA, hop)

    # frames_tile @ dft, decomposed over the cpf = n_fft // hop chunks of each frame.
    cs = jnp.dot(a, dft_ref[0:hop, :], preferred_element_type=jnp.float32)
    for j in range(1, cpf):
        shifted = jnp.concatenate([a[j:, :], nxt[:j, :]], axis=0)    # chunk[r + j]
        cs = cs + jnp.dot(shifted, dft_ref[j * hop:(j + 1) * hop, :],
                          preferred_element_type=jnp.float32)        # (TILE_R, 2*n_freq)

    real = cs[:, :n_freq]                           # lane-aligned (n_freq % 128 == 0)
    imag = cs[:, n_freq:]
    mag = jnp.sqrt(real * real + imag * imag)       # (TILE_R, n_freq)

    mel = jnp.dot(mag.astype(jnp.bfloat16), melT_ref[...],
                  preferred_element_type=jnp.float32)                # (TILE_R, n_mel_p)
    temp = 20.0 * jnp.log10(jnp.maximum(mel, 1e-5)) - 16.0
    out_ref[0] = jnp.clip((temp + 100.0) / 100.0, 0.0, 1.0)


class Audio2MelV:
    def __init__(self, n_fft=1024, hop_length=256, win_length=1024,
                 sampling_rate=16000, n_mel_channels=80, mel_fmin=90, mel_fmax=7600,
                 tile_rows=1024):
        self.n_fft = n_fft
        self.hop_length = hop_length
        self.win_length = win_length
        self.n_mel_channels = n_mel_channels
        self.tile_rows = int(_round_up(max(tile_rows, 16), 16))

        # In-kernel framing requires whole hop-chunks per frame and a lane-aligned hop.
        # TODO(synk): general (n_fft % hop != 0 or hop % 128 != 0) would need the
        # gather-based framing fallback from the previous revision.
        assert n_fft % hop_length == 0, "n_fft must be a multiple of hop_length"
        assert hop_length % 128 == 0, "hop_length must be a multiple of 128"
        self.chunks_per_frame = n_fft // hop_length

        n_freq = n_fft // 2 + 1

        # Window (torch.stft center-pads the window to n_fft when win_length < n_fft).
        window = hann_window_periodic(win_length)
        if win_length < n_fft:
            lp = (n_fft - win_length) // 2
            window = np.pad(window, (lp, n_fft - win_length - lp))
        window = window.astype(np.float64)

        mel_basis = librosa_mel_fn(sampling_rate, n_fft, n_mel_channels, mel_fmin, mel_fmax)

        # Real / imag DFT matrices (onesided), matching torch.stft:
        #   X[f] = sum_n w[n] x[n] e^{-2*pi*i*f*n/N}
        n = np.arange(n_fft, dtype=np.float64)[:, None]
        f = np.arange(n_freq, dtype=np.float64)[None, :]
        ang = 2.0 * np.pi * n * f / n_fft
        cos_w = np.cos(ang) * window[:, None]                 # window folded in
        sin_w = -np.sin(ang) * window[:, None]

        # Full-precision copies for the reference check in __main__.
        self._ref_cos = cos_w.astype(np.float32)
        self._ref_sin = sin_w.astype(np.float32)
        self._ref_mel = mel_basis.astype(np.float32)

        # Frequency axis: trim the Nyquist bin when its mel weight is exactly zero
        # (true for the default fmin/fmax), else zero-pad to a multiple of 128.
        if np.all(mel_basis[:, -1] == 0.0) and (n_freq - 1) % 128 == 0:
            n_freq_p = n_freq - 1
            cos_w, sin_w = cos_w[:, :n_freq_p], sin_w[:, :n_freq_p]
            mel_used = mel_basis[:, :n_freq_p]
        else:
            n_freq_p = _round_up(n_freq, 128)
            pad = n_freq_p - n_freq
            cos_w = np.pad(cos_w, ((0, 0), (0, pad)))
            sin_w = np.pad(sin_w, ((0, 0), (0, pad)))
            mel_used = np.pad(mel_basis, ((0, 0), (0, pad)))
        self.n_freq_p = n_freq_p
        self.n_mel_p = _round_up(n_mel_channels, 128)          # lane-dense output width

        # Fused windowed-DFT matrix (bf16 MXU operand, f32 accumulation in-kernel).
        dft = np.concatenate([cos_w, sin_w], axis=1)           # (n_fft, 2*n_freq_p)
        self.dft = jnp.asarray(dft, dtype=jnp.bfloat16)

        # Mel basis transposed + zero-padded to 128 mel lanes, bf16 (MXU-native).
        melT = np.zeros((n_freq_p, self.n_mel_p), dtype=np.float32)
        melT[:, :n_mel_channels] = mel_used.T
        self.melT = jnp.asarray(melT, dtype=jnp.bfloat16)

    def __call__(self, audio):
        # audio: (B, 1, T) float32  — matches the PyTorch module input convention.
        B = audio.shape[0]
        hop = self.hop_length
        cpf = self.chunks_per_frame
        p = (self.n_fft - hop) // 2
        x = jnp.pad(audio, ((0, 0), (0, 0), (p, p)), mode="reflect")[:, 0, :]   # (B, T + 2p)
        L = x.shape[-1]
        n_frames = 1 + (L - self.n_fft) // hop
        n_chunks_real = n_frames + cpf - 1            # chunks actually needed

        # Row tile: as large as possible, but keep >= 2 grid steps when B == 1 so both
        # v7x TensorCores stay busy (grid axes are "parallel").
        extra = max(16, _round_up(cpf - 1, 16))       # next-tile peek block (sublane-aligned)
        tile_r = self.tile_rows
        if B == 1 and n_frames > 16:
            tile_r = min(tile_r, _round_up(_cdiv(n_frames, 2), 16))
        tile_r = min(tile_r, _round_up(n_frames, 16))
        tile_r = max(_round_up(tile_r, extra), extra)
        n_tiles = _cdiv(n_frames, tile_r)
        n_chunks_pad = (n_tiles + 1) * tile_r         # guarantees the "next tile" block exists
        blk_ratio = tile_r // extra

        # Non-overlapping hop-sized chunks (1x audio traffic; frames rebuilt in-kernel).
        chunks = x[:, : n_chunks_real * hop].reshape(B, n_chunks_real, hop)
        chunks = jnp.pad(chunks, ((0, 0), (0, n_chunks_pad - n_chunks_real), (0, 0)))
        chunks = chunks.astype(jnp.bfloat16)          # (B, n_chunks_pad, hop)

        n_fft, Fp, n_mel_p = self.n_fft, self.n_freq_p, self.n_mel_p
        kernel = functools.partial(audio2mel_kernel, n_freq=Fp, hop=hop, cpf=cpf)

        R = B * n_tiles * tile_r                      # padded frame rows actually computed
        cost = pl.CostEstimate(
            flops=int(2 * R * n_fft * (2 * Fp) + 2 * R * Fp * n_mel_p),
            transcendentals=int(R * (Fp + n_mel_p)),
            bytes_accessed=int(B * n_chunks_pad * hop * 2          # chunk tiles
                               + B * n_tiles * extra * hop * 2     # next-tile peeks
                               + n_fft * 2 * Fp * 2                # fused DFT
                               + Fp * n_mel_p * 2                  # melT
                               + R * n_mel_p * 4),                 # output
        )

        out = pl.pallas_call(
            kernel,
            out_shape=jax.ShapeDtypeStruct((B, n_tiles * tile_r, n_mel_p), jnp.float32),
            grid=(B, n_tiles),
            in_specs=[
                pl.BlockSpec((1, tile_r, hop), lambda b, i: (b, i, 0)),                 # chunk tile
                pl.BlockSpec((1, extra, hop), lambda b, i: (b, (i + 1) * blk_ratio, 0)),  # peek
                pl.BlockSpec((n_fft, 2 * Fp), lambda b, i: (0, 0)),                     # fused DFT
                pl.BlockSpec((Fp, n_mel_p), lambda b, i: (0, 0)),                       # melT
            ],
            out_specs=pl.BlockSpec((1, tile_r, n_mel_p), lambda b, i: (b, i, 0)),
            compiler_params=pltpu.CompilerParams(
                dimension_semantics=("parallel", "parallel"),      # megacore-shardable
                vmem_limit_bytes=48 << 20,                         # <= 48 MiB (v7x-safe)
            ),
            cost_estimate=cost,
        )(chunks, chunks, self.dft, self.melT)

        # (B, n_tiles*tile_r, n_mel_p) -> (B, n_mel, n_frames)  (PyTorch output layout)
        out = out[:, :n_frames, : self.n_mel_channels]
        return out.transpose(0, 2, 1)


# ---------------------------------------------------------------------------
# Pure-JAX f32 reference (mirrors the PyTorch forward), for validating the bf16 path.
# ---------------------------------------------------------------------------
def reference_audio2mel(model, audio):
    p = (model.n_fft - model.hop_length) // 2
    x = jnp.pad(audio, ((0, 0), (0, 0), (p, p)), mode="reflect")[:, 0, :]
    n_frames = 1 + (x.shape[-1] - model.n_fft) // model.hop_length
    idx = (np.arange(n_frames)[:, None] * model.hop_length + np.arange(model.n_fft)[None, :])
    fr = x[:, idx].astype(jnp.float32)                                   # (B, F, n_fft)
    real = fr @ jnp.asarray(model._ref_cos)
    imag = fr @ jnp.asarray(model._ref_sin)
    mag = jnp.sqrt(real * real + imag * imag)
    mel = mag @ jnp.asarray(model._ref_mel).T                            # (B, F, n_mel)
    temp = 20.0 * jnp.log10(jnp.maximum(mel, 1e-5)) - 16.0
    return jnp.clip((temp + 100.0) / 100.0, 0.0, 1.0).transpose(0, 2, 1)


if __name__ == "__main__":
    key = jax.random.PRNGKey(0)
    B, T = 2, 2048                                   # small audio clip
    audio = jax.random.normal(key, (B, 1, T), dtype=jnp.float32)

    model = Audio2MelV()
    log_mel = model(audio)
    jax.block_until_ready(log_mel)

    expected_frames = 1 + (T + 2 * ((model.n_fft - model.hop_length) // 2) - model.n_fft) // model.hop_length
    assert log_mel.shape == (B, model.n_mel_channels, expected_frames), log_mel.shape
    assert bool(jnp.all(jnp.isfinite(log_mel)))
    assert bool(jnp.all((log_mel >= 0.0) & (log_mel <= 1.0)))

    # Validate the bf16 matmul path against the f32 reference (error after log/clamp ~1e-3).
    ref = reference_audio2mel(model, audio)
    max_err = float(jnp.max(jnp.abs(log_mel - ref)))
    assert max_err < 2e-2, f"max abs error vs f32 reference too large: {max_err}"

    print("KERNEL_OK")
</pallas_src>

<mosaic_0001>
module attributes {stable_mosaic.version = 11 : i64} {
  func.func @audio2mel_kernel(%arg0: i32, %arg1: i32, %arg2: memref<1x16x256xbf16, #tpu.memory_space<vmem>>, %arg3: memref<1x16x256xbf16, #tpu.memory_space<vmem>>, %arg4: memref<1024x1024xbf16, #tpu.memory_space<vmem>>, %arg5: memref<512x128xbf16, #tpu.memory_space<vmem>>, %arg6: memref<1x16x128xf32, #tpu.memory_space<vmem>>) attributes {dimension_semantics = [#tpu.dimension_semantics<parallel>, #tpu.dimension_semantics<parallel>], iteration_bounds = array<i64: 2, 1>, scalar_prefetch = 0 : i64, scratch_operands = 0 : i64, tpu.core_type = #tpu.core_type<tc>, window_params = [{transform_indices = @transform_0, window_bounds = array<i64: 1, 16, 256>}, {transform_indices = @transform_1, window_bounds = array<i64: 1, 16, 256>}, {pipeline_mode = #tpu.pipeline_mode<synchronous>, transform_indices = @transform_2, window_bounds = array<i64: 1024, 1024>}, {pipeline_mode = #tpu.pipeline_mode<synchronous>, transform_indices = @transform_3, window_bounds = array<i64: 512, 128>}, {transform_indices = @transform_4, window_bounds = array<i64: 1, 16, 128>}]} {
    %c0 = arith.constant 0 : index
    %c0_0 = arith.constant 0 : index
    %c0_1 = arith.constant 0 : index
    %0 = vector.load %arg2[%c0, %c0_0, %c0_1] : memref<1x16x256xbf16, #tpu.memory_space<vmem>>, vector<1x16x256xbf16>
    %1 = vector.shape_cast %0 : vector<1x16x256xbf16> to vector<16x256xbf16>
    %c0_2 = arith.constant 0 : index
    %c0_3 = arith.constant 0 : index
    %c0_4 = arith.constant 0 : index
    %2 = vector.load %arg3[%c0_2, %c0_3, %c0_4] : memref<1x16x256xbf16, #tpu.memory_space<vmem>>, vector<1x16x256xbf16>
    %3 = vector.shape_cast %2 : vector<1x16x256xbf16> to vector<16x256xbf16>
    %c0_5 = arith.constant 0 : index
    %c0_6 = arith.constant 0 : index
    %4 = vector.load %arg4[%c0_5, %c0_6] : memref<1024x1024xbf16, #tpu.memory_space<vmem>>, vector<256x1024xbf16>
    %cst = arith.constant dense<0.000000e+00> : vector<16x1024xf32>
    %5 = tpu.matmul %1, %4, %cst {dimension_numbers = #tpu.dot_dimension_numbers<[1], [0], [0], [1], [0, 0, 1, 1], [], []>} : vector<16x256xbf16>, vector<256x1024xbf16>, vector<16x1024xf32> -> vector<16x1024xf32>
    %6 = vector.extract_strided_slice %1 {offsets = [1, 0], sizes = [15, 256], strides = [1, 1]} : vector<16x256xbf16> to vector<15x256xbf16>
    %7 = vector.extract_strided_slice %3 {offsets = [0, 0], sizes = [1, 256], strides = [1, 1]} : vector<16x256xbf16> to vector<1x256xbf16>
    %8 = tpu.concatenate %6, %7 in 0 : vector<15x256xbf16>, vector<1x256xbf16> -> vector<16x256xbf16>
    %c256 = arith.constant 256 : index
    %c0_7 = arith.constant 0 : index
    %9 = vector.load %arg4[%c256, %c0_7] : memref<1024x1024xbf16, #tpu.memory_space<vmem>>, vector<256x1024xbf16>
    %cst_8 = arith.constant dense<0.000000e+00> : vector<16x1024xf32>
    %10 = tpu.matmul %8, %9, %cst_8 {dimension_numbers = #tpu.dot_dimension_numbers<[1], [0], [0], [1], [0, 0, 1, 1], [], []>} : vector<16x256xbf16>, vector<256x1024xbf16>, vector<16x1024xf32> -> vector<16x1024xf32>
    %11 = arith.addf %5, %10 : vector<16x1024xf32>
    %12 = vector.extract_strided_slice %1 {offsets = [2, 0], sizes = [14, 256], strides = [1, 1]} : vector<16x256xbf16> to vector<14x256xbf16>
    %13 = vector.extract_strided_slice %3 {offsets = [0, 0], sizes = [2, 256], strides = [1, 1]} : vector<16x256xbf16> to vector<2x256xbf16>
    %14 = tpu.concatenate %12, %13 in 0 : vector<14x256xbf16>, vector<2x256xbf16> -> vector<16x256xbf16>
    %c512 = arith.constant 512 : index
    %c0_9 = arith.constant 0 : index
    %15 = vector.load %arg4[%c512, %c0_9] : memref<1024x1024xbf16, #tpu.memory_space<vmem>>, vector<256x1024xbf16>
    %cst_10 = arith.constant dense<0.000000e+00> : vector<16x1024xf32>
    %16 = tpu.matmul %14, %15, %cst_10 {dimension_numbers = #tpu.dot_dimension_numbers<[1], [0], [0], [1], [0, 0, 1, 1], [], []>} : vector<16x256xbf16>, vector<256x1024xbf16>, vector<16x1024xf32> -> vector<16x1024xf32>
    %17 = arith.addf %11, %16 : vector<16x1024xf32>
    %18 = vector.extract_strided_slice %1 {offsets = [3, 0], sizes = [13, 256], strides = [1, 1]} : vector<16x256xbf16> to vector<13x256xbf16>
    %19 = vector.extract_strided_slice %3 {offsets = [0, 0], sizes = [3, 256], strides = [1, 1]} : vector<16x256xbf16> to vector<3x256xbf16>
    %20 = tpu.concatenate %18, %19 in 0 : vector<13x256xbf16>, vector<3x256xbf16> -> vector<16x256xbf16>
    %c768 = arith.constant 768 : index
    %c0_11 = arith.constant 0 : index
    %21 = vector.load %arg4[%c768, %c0_11] : memref<1024x1024xbf16, #tpu.memory_space<vmem>>, vector<256x1024xbf16>
    %cst_12 = arith.constant dense<0.000000e+00> : vector<16x1024xf32>
    %22 = tpu.matmul %20, %21, %cst_12 {dimension_numbers = #tpu.dot_dimension_numbers<[1], [0], [0], [1], [0, 0, 1, 1], [], []>} : vector<16x256xbf16>, vector<256x1024xbf16>, vector<16x1024xf32> -> vector<16x1024xf32>
    %23 = arith.addf %17, %22 : vector<16x1024xf32>
    %24 = vector.extract_strided_slice %23 {offsets = [0, 0], sizes = [16, 512], strides = [1, 1]} : vector<16x1024xf32> to vector<16x512xf32>
    %25 = vector.extract_strided_slice %23 {offsets = [0, 512], sizes = [16, 512], strides = [1, 1]} : vector<16x1024xf32> to vector<16x512xf32>
    %26 = arith.mulf %24, %24 : vector<16x512xf32>
    %27 = arith.mulf %25, %25 : vector<16x512xf32>
    %28 = arith.addf %26, %27 : vector<16x512xf32>
    %29 = math.sqrt %28 : vector<16x512xf32>
    %30 = arith.truncf %29 : vector<16x512xf32> to vector<16x512xbf16>
    %c0_13 = arith.constant 0 : index
    %c0_14 = arith.constant 0 : index
    %31 = vector.load %arg5[%c0_13, %c0_14] : memref<512x128xbf16, #tpu.memory_space<vmem>>, vector<512x128xbf16>
    %cst_15 = arith.constant dense<0.000000e+00> : vector<16x128xf32>
    %32 = tpu.matmul %30, %31, %cst_15 {dimension_numbers = #tpu.dot_dimension_numbers<[1], [0], [0], [1], [0, 0, 1, 1], [], []>} : vector<16x512xbf16>, vector<512x128xbf16>, vector<16x128xf32> -> vector<16x128xf32>
    %cst_16 = arith.constant 9.99999974E-6 : f32
    %33 = vector.broadcast %cst_16 : f32 to vector<16x128xf32>
    %34 = arith.maximumf %32, %33 : vector<16x128xf32>
    %35 = math.log %34 : vector<16x128xf32>
    %cst_17 = arith.constant 0.434294492 : f32
    %36 = vector.broadcast %cst_17 : f32 to vector<16x128xf32>
    %37 = arith.mulf %35, %36 : vector<16x128xf32>
    %cst_18 = arith.constant 2.000000e+01 : f32
    %38 = vector.broadcast %cst_18 : f32 to vector<16x128xf32>
    %39 = arith.mulf %38, %37 : vector<16x128xf32>
    %cst_19 = arith.constant 1.600000e+01 : f32
    %40 = vector.broadcast %cst_19 : f32 to vector<16x128xf32>
    %41 = arith.subf %39, %40 : vector<16x128xf32>
    %cst_20 = arith.constant 1.000000e+02 : f32
    %42 = vector.broadcast %cst_20 : f32 to vector<16x128xf32>
    %43 = arith.addf %41, %42 : vector<16x128xf32>
    %cst_21 = arith.constant 1.000000e+02 : f32
    %44 = vector.broadcast %cst_21 : f32 to vector<16x128xf32>
    %45 = arith.divf %43, %44 : vector<16x128xf32>
    %cst_22 = arith.constant 0.000000e+00 : f32
    %cst_23 = arith.constant 1.000000e+00 : f32
    %46 = vector.broadcast %cst_22 : f32 to vector<16x128xf32>
    %47 = arith.maximumf %46, %45 : vector<16x128xf32>
    %48 = vector.broadcast %cst_23 : f32 to vector<16x128xf32>
    %49 = arith.minimumf %48, %47 : vector<16x128xf32>
    %c0_24 = arith.constant 0 : index
    %c0_25 = arith.constant 0 : index
    %c0_26 = arith.constant 0 : index
    %50 = vector.load %arg6[%c0_24, %c0_25, %c0_26] : memref<1x16x128xf32, #tpu.memory_space<vmem>>, vector<1x16x128xf32>
    %51 = vector.shape_cast %50 : vector<1x16x128xf32> to vector<16x128xf32>
    %52 = vector.shape_cast %49 : vector<16x128xf32> to vector<1x16x128xf32>
    tpu.vector_store %arg6[%c0_24, %c0_25, %c0_26], %52 {strides = array<i32>} : memref<1x16x128xf32, #tpu.memory_space<vmem>>, vector<1x16x128xf32>,
    return
  }
  func.func @transform_0(%arg0: i32, %arg1: i32) -> (i32, i32, i32) {
    %c0_i32 = arith.constant 0 : i32
    %c0_i32_0 = arith.constant 0 : i32
    return %arg0, %arg1, %c0_i32 : i32, i32, i32
  }
  func.func @transform_1(%arg0: i32, %arg1: i32) -> (i32, i32, i32) {
    %c1_i32 = arith.constant 1 : i32
    %0 = arith.addi %arg1, %c1_i32 : i32
    %c1_i32_0 = arith.constant 1 : i32
    %1 = arith.muli %0, %c1_i32_0 : i32
    %c0_i32 = arith.constant 0 : i32
    %c0_i32_1 = arith.constant 0 : i32
    return %arg0, %1, %c0_i32 : i32, i32, i32
  }
  func.func @transform_2(%arg0: i32, %arg1: i32) -> (i32, i32) {
    %c0_i32 = arith.constant 0 : i32
    %c0_i32_0 = arith.constant 0 : i32
    %c0_i32_1 = arith.constant 0 : i32
    return %c0_i32, %c0_i32_0 : i32, i32
  }
  func.func @transform_3(%arg0: i32, %arg1: i32) -> (i32, i32) {
    %c0_i32 = arith.constant 0 : i32
    %c0_i32_0 = arith.constant 0 : i32
    %c0_i32_1 = arith.constant 0 : i32
    return %c0_i32, %c0_i32_0 : i32, i32
  }
  func.func @transform_4(%arg0: i32, %arg1: i32) -> (i32, i32, i32) {
    %c0_i32 = arith.constant 0 : i32
    %c0_i32_0 = arith.constant 0 : i32
    return %arg0, %arg1, %c0_i32 : i32, i32, i32
  }
}

</mosaic_0001>

<bundles_post_ra>
// kernel: tpu_custom_call.1
= control target key start
LH: loop header
LB: loop body
LE: loop exit
PB: predicated region body
PF: predicated region fallthrough
CT: control target
= control target key end

     0   :  { %s6203_s0 = inlined_call_operand.hbm [shape: bf16[2,32,256], index: 0, kind: input, shape index: {}]   ;;  %s6204_s1 = inlined_call_operand.hbm [shape: bf16[2,32,256], index: 1, kind: input, shape index: {}]   ;;  %s6205_s2 = inlined_call_operand.hbm [shape: bf16[1024,1024], index: 2, kind: input, shape index: {}]   ;;  %s6206_s3 = inlined_call_operand.hbm [shape: bf16[512,128], index: 3, kind: input, shape index: {}]   ;;  %s6207_s4 = inlined_call_operand.hbm [shape: f32[2,16,128], index: 4, kind: output, shape index: {}]  }
   0x1   :  { %6211 = sst [smem:[#allocation19_spill]] %s6203_s0 }
   0x2   :  { %6212 = sst [smem:[#allocation20_spill]] %s6205_s2 }
   0x3   :  { %6213 = sst [smem:[#allocation21_spill]] %s6206_s3 }
   0x4   :  { %9 = vsyncpa [#allocation3], 0 }
   0x5   :  { %11 = vsyncpa [#allocation3 + $0x1], 0 }
   0x6   :  { %12 = vsyncpa [#allocation6], 0 }
   0x7   :  { %14 = vsyncpa [#allocation6 + $0x1], 0 }
   0x8   :  { %15 = vsyncpa [#allocation9], 0 }
   0x9   :  { %16 = vsyncpa [#allocation4], 0 }
   0xa   :  { %18 = vsyncpa [#allocation4 + $0x1], 0  ;;  %s5806_s15 = smov 0   ;;  %s5808_s16 = smov 0  }
   0xb   :  { %s5810_s17 = smov 0   ;;  %s5812_s18 = smov 0  }
   0xc   :  { %s5814_s19 = smov 0   ;;  %s5816_s20 = smov 0  }
   0xd LB: > { %6214 = sst [smem:[#allocation16_spill]] %s5754_s17  ;;  %s5837_s21 = sadd.s32 4294967295, %s5766_s20   ;;  %s5766_s20 = sphi %s5816_s20, %s24_s20   ;;  %s5762_s19 = sphi %s5814_s19, %s6243_s19   ;;  %s5758_s18 = sphi %s5812_s18, %s6242_s18   ;;  %s5754_s17 = sphi %s5810_s17, %s6238_s17   ;;  %s5750_s16 = sphi %s5808_s16, %s6241_s16   ;;  %s5746_s15 = sphi %s5806_s15, %s6240_s15  }
   0xe   : > { %s4791_s22 = sadd.s32 4294967294, %s5766_s20   ;;  %p58_p0 = scmp.ne.s32.totalorder %s5750_s16, %s5746_s15 }
   0xf   : > { %p6208_p1 = scmp.eq.s32.totalorder %s5837_s21, 0  ;;  %p162_p3 = scmp.eq.s32.totalorder %s4791_s22, 1 }
  0x10   : > { %p4792_p5 = scmp.ge.s32.totalorder %s5766_s20, 1  ;;  %p169_p7 = scmp.lt.s32.totalorder %s5766_s20, 3 }
  0x11   : > { %p5846_p4 = por %p6208_p1, %p58_p0  ;;  %p5851_p6 = por %p162_p3, %p58_p0 }
  0x12   : > { %p5856_p8 = pnand %p4792_p5, %p169_p7  ;;  %s5768_s26 = smov [#allocation7]  }
  0x13   : > { %s6216_s24 = scalar_select %p5851_p6, 1, 0 }
  0x14   : > { %s181_s27 = sshll.u32 %s5768_s26, 4  ;;  %p5424_p9 = pneg %p5856_p8  ;;  %s182_s27 = int_to_ptr.vmem [resolvable:$true] %s181_s27 }
  0x15   : > { %s5769_s29 = smov [#allocation8]   ;;  %s5576_s5 = scalar_lea.vmem %s182_s27, 65536 }
  0x16   : > { %p5865_p11 = pnand %p5424_p9, %p6208_p1  ;;  %s194_s30 = sshll.u32 %s5769_s29, 4  ;;  %s195_s30 = int_to_ptr.vmem [resolvable:$true] %s194_s30 }
  0x17   : > { %p5577_p13 = scmp.ne.s32.totalorder %s182_s27, %s5576_s5  ;;  %p5584_p5 = scmp.lt.s32.totalorder %s182_s27, %s182_s27 }
  0x18   : > { %p5567_p12 = pneg %p5865_p11  ;;  %p5585_p7 = scmp.lt.s32.totalorder %s5576_s5, %s5576_s5 }
  0x1a   : > { %p5579_p0 = pnand %p5577_p13, %p5567_p12  ;;  %p5586_p10 = por %p5585_p7, %p5584_p5 }
  0x1c   : > { %p5580_p3 = pneg %p5579_p0 }
  0x1e   : > { %p5587_p9 = pnand %p5586_p10, %p5580_p3 }
  0x20   : > { %5590 = shalt.err (!%p5587_p9)
}
  0x21   : > { %s5770_s6 = smov 512   ;;  %s5771_s7 = smov 32  }
  0x22   : > { %s6219_s2 = sld [smem:[#allocation20_spill]]  ;;  %s5602_s10 = scalar_lea.vmem %s195_s30, 4096 }
  0x23   : > { %p5603_p1 = scmp.ne.s32.totalorder %s195_s30, %s5602_s10  ;;  %p5610_p2 = scmp.lt.s32.totalorder %s195_s30, %s195_s30 }
  0x24   : > { %p5611_p6 = scmp.lt.s32.totalorder %s5602_s10, %s5602_s10 }
  0x25   : > { %p5605_p13 = pnand %p5603_p1, %p5567_p12 }
  0x26   : > { %p5612_p5 = por %p5611_p6, %p5610_p2 }
  0x27   : > { %p5606_p0 = pneg %p5605_p13 }
  0x28   : > { %5427 = dma.hbm_to_vmem [thread:$0]  (!%p5865_p11), %s6219_s2, 65536, %s182_s27, [#allocation6], %s5770_s6, %s5770_s6, %s5771_s7  }
  0x29   : > { %p5613_p10 = pnand %p5612_p5, %p5606_p0 }
  0x2b   : > { %5616 = shalt.err (!%p5613_p10)
}
  0x2c   : > { %s5772_s11 = smov 64   ;;  %s5773_s12 = smov 4  }
  0x2d   : > { %s6220_s3 = sld [smem:[#allocation21_spill]]  ;;  %s36_s22 = sadd.s32 1, %s5762_s19 }
  0x2e   : > { %s45_s26 = sadd.s32 1, %s5754_s17  ;;  %p38_p1 = scmp.ge.s32.totalorder %s36_s22, 2 }
  0x2f   : > { %p52_p2 = scmp.ne.s32.totalorder %s5754_s17, %s5750_s16  ;;  %p53_p6 = scmp.eq.s32.totalorder %s5766_s20, 0 }
  0x30   : > { %p5444_p12 = scmp.lt.s32.totalorder %s5766_s20, 2  ;;  %s6245_s22 = smov (%p38_p1, %s36_s22), 0 }
  0x31   : > { %6221 = sst [smem:[#allocation17_spill]] %s6245_s22  ;;  %p54_p3 = por %p53_p6, %p52_p2 }
  0x32   : > { %p6222_p7 = scmp.eq.s32.totalorder %s5837_s21, 1  ;;  %s40_s28 = ssub.s32 %s5762_s19, %s6245_s22 }
  0x33   : > { %5430 = dma.hbm_to_vmem [thread:$0]  (!%p5865_p11), %s6220_s3, 4096, %s195_s30, [#allocation9], %s5772_s11, %s5772_s11, %s5773_s12  }
  0x34   : > { %p5897_p9 = por %p6222_p7, %p52_p2  ;;  %s208_s29 = sand.u32 1, %s5754_s17  }
  0x35   : > { %p43_p11 = scmp.eq.s32.totalorder %s40_s28, 0  ;;  %s5904_s30 = sshll.u32 %s208_s29, 4 }
  0x36   : > { %s5363_s5 = sshll.u32 %s5762_s19, 9  ;;  %s6225_s0 = sld [smem:[#allocation19_spill]] }
  0x37   : > { %s5908_s6 = scalar_select %p43_p11, %s5754_s17, %s45_s26  }
  0x38   : > { %s212_s10 = scalar_lea.vmem [#allocation2], %s5904_s30  ;;  %p5918_p13 = pnand %p5444_p12, %p54_p3 }
  0x39   : > { %6224 = sst [smem:[#allocation18_spill]] %s5908_s6  ;;  %s222_s11 = sshll.u32 %s212_s10, 4  ;;  %s223_s11 = int_to_ptr.vmem [resolvable:$true] %s222_s11 }
  0x3a   : > { %s209_s13 = scalar_lea.sflag [#allocation3], %s208_s29  ;;  %p5619_p0 = pneg %p5918_p13 }
  0x3b   : > { %s5630_s14 = scalar_lea.vmem %s223_s11, 256  ;;  %s5774_s26 = smov [#allocation2]  }
  0x3c   : > { %s221_s9 = scalar_lea.hbm %s6225_s0, %s5363_s5  ;;  %p5631_p5 = scmp.ne.s32.totalorder %s223_s11, %s5630_s14 }
  0x3d   : > { %s5635_s28 = sshll.u32 %s5774_s26, 4  ;;  %s5636_s28 = int_to_ptr.vmem [resolvable:$false] %s5635_s28 }
  0x3e   : > { %p5633_p10 = pnand %p5631_p5, %p5619_p0  ;;  %s5637_s7 = scalar_lea.vmem %s5636_s28, 512 }
  0x3f   : > { %p5638_p2 = scmp.lt.s32.totalorder %s223_s11, %s5636_s28  ;;  %p5639_p6 = scmp.lt.s32.totalorder %s5637_s7, %s5630_s14 }
  0x40   : > { %p5634_p1 = pneg %p5633_p10 }
  0x41   : > { %p5640_p12 = por %p5639_p6, %p5638_p2 }
  0x43   : > { %p5641_p3 = pnand %p5640_p12, %p5634_p1 }
  0x45   : > { %5644 = shalt.err (!%p5641_p3)
}
  0x46   : > { %s5775_s8 = smov 128   ;;  %s5776_s29 = smov 8  }
  0x47   : > { %5434 = dma.hbm_to_vmem [thread:$0]  (!%p5918_p13), %s221_s9, 256, %s223_s11, %s209_s13, %s5775_s8, %s5775_s8, %s5776_s29  }
  0x48   : > { %s4703_s26 = scalar_lea.hbm %s6204_s1, %s5363_s5  ;;  %s236_s28 = scalar_lea.vmem [#allocation5], %s5904_s30 }
  0x49   : > { %s4704_s2 = scalar_lea.hbm %s4703_s26, 256  ;;  %s247_s14 = sshll.u32 %s236_s28, 4  ;;  %s248_s14 = int_to_ptr.vmem [resolvable:$true] %s247_s14 }
  0x4a   : > { %s232_s7 = sand.u32 1, %s5766_s20   ;;  %s5658_s22 = scalar_lea.vmem %s248_s14, 256 }
  0x4b   : > { %s233_s3 = scalar_lea.sflag [#allocation6], %s232_s7  ;;  %p5659_p7 = scmp.ne.s32.totalorder %s248_s14, %s5658_s22 }
  0x4c   : > { %s5777_s6 = smov [#allocation5]  }
  0x4d   : > { %p5661_p11 = pnand %p5659_p7, %p5619_p0  ;;  %s5663_s17 = sshll.u32 %s5777_s6, 4  ;;  %s5664_s17 = int_to_ptr.vmem [resolvable:$false] %s5663_s17 }
  0x4e   : > { %s5665_s9 = scalar_lea.vmem %s5664_s17, 512  ;;  %p5666_p10 = scmp.lt.s32.totalorder %s248_s14, %s5664_s17 }
  0x4f   : > { %p5662_p5 = pneg %p5661_p11  ;;  %p5667_p1 = scmp.lt.s32.totalorder %s5665_s9, %s5658_s22 }
  0x51   : > { %p5668_p2 = por %p5667_p1, %p5666_p10 }
  0x53   : > { %p5669_p6 = pnand %p5668_p2, %p5662_p5 }
  0x55   : > { %5672 = shalt.err (!%p5669_p6)
}
  0x56   : > { %5437 = dma.hbm_to_vmem [thread:$0]  (!%p5918_p13), %s4704_s2, 256, %s248_s14, %s233_s3, %s5775_s8, %s5775_s8, %s5776_s29  }
  0x57   : > { %259 = sbr.rel (%p5856_p8) target bundleno = 1094 (0x446), region = 36  ;;  %s5944_s0 = sand.u32 (!%p5856_p8), 1, %s5750_s16  }
  0x58   : > { %s5947_s30 = sshll.u32 (!%p5856_p8), %s5944_s0, 4  ;;  %s262_s17 = scalar_lea.sflag (!%p5856_p8), [#allocation3], %s5944_s0 }
  0x59   : > { %s5951_s22 = scalar_lea.vmem (!%p5856_p8), [#allocation2], %s5947_s30 }
  0x5c   : > { %5725 = dma.done.wait (%p5846_p4), %s262_s17, 256  }
  0x5d   : > { %5727 = vsyncadd (%p5846_p4), %s262_s17, 4294967040  ;;  %s270_s2 = sand.u32 1, %s5837_s21   ;;  %s274_s25 = scalar_lea.vmem [#allocation5], %s5947_s30 }
  0x5e   : > { %s271_s3 = scalar_lea.sflag [#allocation6], %s270_s2 }
  0x5f   : > { %5729 = dma.done.wait (%p5846_p4), %s271_s3, 256  }
  0x60   : > { %5731 = vsyncadd (%p5846_p4), %s271_s3, 4294967040  ;;  %p6227_p8 = scmp.eq.s32.totalorder %s5837_s21, 0 }
  0x62   : > { %5733 = dma.done.wait (%p6227_p8), [#allocation6], 65536   ;;  %p6228_p13 = pmov %p6227_p8 }
  0x63   : > { %p6229_p0 = pmov %p6227_p8 }
  0x64   : > { %5735 = vsyncadd (%p6228_p13), [#allocation6], 4294901760 }
  0x65   : > { %5737 = dma.done.wait (%p6229_p0), [#allocation9], 4096   ;;  %p6230_p12 = pmov %p6229_p0 }
  0x66   : > { %v548_v0 = vld [vmem:[#allocation7 + $0x5c0] sm:$0xff]  ;;  %v549_v2 = vld [vmem:[#allocation7 + $0x5c8] sm:$0xff]  ;;  %vm487_vm0 = vcmask 1047552   ;;  %vm488_vm1 = vsmask.f32 7424  ;;  %vm2250_vm3 = vcmask 1046528  }
  0x67   : > { %5739 = vsyncadd (%p6230_p12), [#allocation9], 4294963200  ;;  %v552_v1 = vld [vmem:[#allocation7 + $0x5e0] sm:$0xff]  ;;  %v553_v4 = vld [vmem:[#allocation7 + $0x5e8] sm:$0xff]  ;;  %vm3236_vm4 = vsmask.f32 6400 }
  0x68   : > { %v4869_v3 = vcombine.high %v548_v0, %v552_v1  ;;  %v4868_v5 = vcombine.low %v548_v0, %v552_v1  ;;  %v540_v6 = vld [vmem:[#allocation7 + $0x580] sm:$0xff]  ;;  %v4871_v8 = vcombine.high %v549_v2, %v553_v4  ;;  %v4870_v9 = vcombine.low %v549_v2, %v553_v4  ;;  %v541_v11 = vld [vmem:[#allocation7 + $0x588] sm:$0xff]  ;;  %vm5990_vm2 = vmand %vm487_vm0, %vm488_vm1  ;;  %s5365_s21 = sshll.u32 %s5758_s18, 8  ;;  %s311_s23 = scalar_lea.vmem [#allocation10], %s5947_s30 }
  0x69   : > { %v544_v7 = vld [vmem:[#allocation7 + $0x5a0] sm:$0xff]  ;;  %v545_v12 = vld [vmem:[#allocation7 + $0x5a8] sm:$0xff]  ;;  %vm6066_vm5 = vmand %vm2250_vm3, %vm3236_vm4  ;;  %s4657_s5 = sshll.u32 %s311_s23, 4  ;;  %s6153_s12 = scalar_lea.hbm %s6207_s4, %s5365_s21  ;;  %s6155_s5 = int_to_ptr.vmem [resolvable:$true] %s4657_s5 }
  0x6a   : > { %v4861_v10 = vcombine.high %v540_v6, %v544_v7  ;;  %v532_v13 = vld [vmem:[#allocation7 + $0x540] sm:$0xff]  ;;  %1260 = vmatprep.subr.bf16.mxu0 %v4869_v3  ;;  %v4863_v14 = vcombine.high %v541_v11, %v545_v12  ;;  %v533_v16 = vld [vmem:[#allocation7 + $0x548] sm:$0xff]  ;;  %1303 = vmatprep.subr.bf16.mxu1 %v4871_v8  ;;  %v4860_v18 = vcombine.low %v540_v6, %v544_v7  ;;  %s4642_s13 = scalar_lea.sflag [#allocation4], %s5944_s0  ;;  %s5674_s8 = scalar_lea.vmem %s6155_s5, 256 }
  0x6b   : > { %v536_v15 = vld [vmem:[#allocation7 + $0x560] sm:$0xff]  ;;  %v537_v17 = vld [vmem:[#allocation7 + $0x568] sm:$0xff]  ;;  %1261 = vmatpush1.bf16.msra.mxu0 %v4868_v5  ;;  %1304 = vmatpush1.bf16.msra.mxu1 %v4870_v9  ;;  %v4862_v19 = vcombine.low %v541_v11, %v545_v12  ;;  %p5675_p4 = scmp.ne.s32.totalorder %s6155_s5, %s5674_s8  ;;  %s5778_s18 = smov [#allocation10]  }
  0x6c   : > { %1262 = vmatprep.subr.bf16.mxu0 %v4861_v10  ;;  %v4853_v20 = vcombine.high %v532_v13, %v536_v15  ;;  %1305 = vmatprep.subr.bf16.mxu1 %v4863_v14  ;;  %v4855_v21 = vcombine.high %v533_v16, %v537_v17  ;;  %v524_v22 = vld [vmem:[#allocation7 + $0x500] sm:$0xff]  ;;  %v525_v24 = vld [vmem:[#allocation7 + $0x508] sm:$0xff]  ;;  %v4852_v26 = vcombine.low %v532_v13, %v536_v15  ;;  %s5678_s29 = sshll.u32 %s5778_s18, 4  ;;  %s5679_s29 = int_to_ptr.vmem [resolvable:$false] %s5678_s29 }
  0x6d   : > { %v528_v23 = vld [vmem:[#allocation7 + $0x520] sm:$0xff]  ;;  %v529_v25 = vld [vmem:[#allocation7 + $0x528] sm:$0xff]  ;;  %v4854_v27 = vcombine.low %v533_v16, %v537_v17  ;;  %p5676_p3 = pnand %p5675_p4, %p5897_p9  ;;  %s5680_s10 = scalar_lea.vmem %s5679_s29, 512 }
  0x6e   : > { %v4845_v28 = vcombine.high %v524_v22, %v528_v23  ;;  %v4847_v29 = vcombine.high %v525_v24, %v529_v25  ;;  %v516_v30 = vld [vmem:[#allocation7 + $0x4c0] sm:$0xff]  ;;  %v517_v32 = vld [vmem:[#allocation7 + $0x4c8] sm:$0xff]  ;;  %v4844_v34 = vcombine.low %v524_v22, %v528_v23  ;;  %v4846_v35 = vcombine.low %v525_v24, %v529_v25  ;;  %p5681_p11 = scmp.lt.s32.totalorder %s6155_s5, %s5679_s29  ;;  %p5682_p5 = scmp.lt.s32.totalorder %s5680_s10, %s5674_s8 }
  0x6f   : > { %1263 = vmatpush1.bf16.msra.mxu0 %v4860_v18  ;;  %1306 = vmatpush1.bf16.msra.mxu1 %v4862_v19  ;;  %v520_v31 = vld [vmem:[#allocation7 + $0x4e0] sm:$0xff]  ;;  %v521_v33 = vld [vmem:[#allocation7 + $0x4e8] sm:$0xff]  ;;  %p5677_p7 = pneg %p5676_p3 }
  0x70   : > { %1264 = vmatprep.subr.bf16.mxu0 %v4853_v20  ;;  %1307 = vmatprep.subr.bf16.mxu1 %v4855_v21  ;;  %v4837_v36 = vcombine.high %v516_v30, %v520_v31  ;;  %v4839_v37 = vcombine.high %v517_v32, %v521_v33  ;;  %v508_v38 = vld [vmem:[#allocation7 + $0x480] sm:$0xff]  ;;  %v509_v40 = vld [vmem:[#allocation7 + $0x488] sm:$0xff]  ;;  %v4836_v42 = vcombine.low %v516_v30, %v520_v31  ;;  %p5683_p10 = por %p5682_p5, %p5681_p11 }
  0x71   : > { %v512_v39 = vld [vmem:[#allocation7 + $0x4a0] sm:$0xff]  ;;  %v513_v41 = vld [vmem:[#allocation7 + $0x4a8] sm:$0xff]  ;;  %v4838_v43 = vcombine.low %v517_v32, %v521_v33 }
  0x72   : > { %v4829_v44 = vcombine.high %v508_v38, %v512_v39  ;;  %v4831_v45 = vcombine.high %v509_v40, %v513_v41  ;;  %v500_v46 = vld [vmem:[#allocation7 + $0x440] sm:$0xff]  ;;  %v501_v48 = vld [vmem:[#allocation7 + $0x448] sm:$0xff]  ;;  %v4828_v50 = vcombine.low %v508_v38, %v512_v39  ;;  %v4830_v51 = vcombine.low %v509_v40, %v513_v41  ;;  %p5684_p1 = pnand %p5683_p10, %p5677_p7 }
  0x73   : > { %1265 = vmatpush1.bf16.msra.mxu0 %v4852_v26  ;;  %1308 = vmatpush1.bf16.msra.mxu1 %v4854_v27  ;;  %v504_v47 = vld [vmem:[#allocation7 + $0x460] sm:$0xff]  ;;  %v505_v49 = vld [vmem:[#allocation7 + $0x468] sm:$0xff] }
  0x74   : > { %1266 = vmatprep.subr.bf16.mxu0 %v4845_v28  ;;  %1309 = vmatprep.subr.bf16.mxu1 %v4847_v29  ;;  %v4821_v52 = vcombine.high %v500_v46, %v504_v47  ;;  %v492_v53 = vld [vmem:[#allocation7 + $0x400] sm:$0xff]  ;;  %v4823_v54 = vcombine.high %v501_v48, %v505_v49  ;;  %v493_v58 = vld [vmem:[#allocation7 + $0x408] sm:$0xff]  ;;  %v4820_v61 = vcombine.low %v500_v46, %v504_v47 }
  0x75   : > { %v496_v55 = vld [vmem:[#allocation7 + $0x420] sm:$0xff]  ;;  %v497_v59 = vld [vmem:[#allocation7 + $0x428] sm:$0xff]  ;;  %v4822_v0 = vcombine.low %v501_v48, %v505_v49 }
  0x76   : > { %v5973_v56 = vld [vmem:[%s274_s25] sm:$0xff]  ;;  %v4813_v1 = vcombine.high %v492_v53, %v496_v55  ;;  %v4815_v3 = vcombine.high %v493_v58, %v497_v59  ;;  %v613_v7 = vld [vmem:[#allocation7 + $0x7c8] sm:$0xff]  ;;  %v4812_v11 = vcombine.low %v492_v53, %v496_v55  ;;  %v4814_v13 = vcombine.low %v493_v58, %v497_v59 }
  0x77   : > { %1267 = vmatpush1.bf16.msra.mxu0 %v4844_v34  ;;  %1310 = vmatpush1.bf16.msra.mxu1 %v4846_v35  ;;  %v5976_v57 = vld [vmem:[%s5951_s22 + $0x4] ss:$8 sps:$4 sm:$0xff]   ;;  %v5980_v60 = vcombine.high %v5973_v56, %v5973_v56 }
  0x78   : > { %1268 = vmatprep.subr.bf16.mxu0 %v4837_v36  ;;  %1311 = vmatprep.subr.bf16.mxu1 %v4839_v37  ;;  %v464_v62 = vshrl.u32 %v5976_v57, 16  ;;  %v466_v63 = vshll.u32 %v5976_v57, 16  ;;  %v612_v4 = vld [vmem:[#allocation7 + $0x7c0] sm:$0xff]  ;;  %v617_v8 = vld [vmem:[#allocation7 + $0x7e8] sm:$0xff] }
  0x79   : > { %v482_v2 = vshll.u32 %v5980_v60, 16  ;;  %v616_v5 = vld [vmem:[#allocation7 + $0x7e0] sm:$0xff]  ;;  %v4935_v15 = vcombine.high %v613_v7, %v617_v8  ;;  %v605_v19 = vld [vmem:[#allocation7 + $0x788] sm:$0xff]  ;;  %v4934_v22 = vcombine.low %v613_v7, %v617_v8 }
  0x7a   : > { %v468_v6 = vrot.slane %v466_v63, 1  ;;  %v4933_v14 = vcombine.high %v612_v4, %v616_v5  ;;  %v604_v16 = vld [vmem:[#allocation7 + $0x780] sm:$0xff]  ;;  %v609_v20 = vld [vmem:[#allocation7 + $0x7a8] sm:$0xff]  ;;  %v4932_v21 = vcombine.low %v612_v4, %v616_v5 }
  0x7b   : > { %1269 = vmatpush1.bf16.msra.mxu0 %v4836_v42  ;;  %1312 = vmatpush1.bf16.msra.mxu1 %v4838_v43  ;;  %v484_v9 = vrot.slane %v482_v2, 1  ;;  %v608_v17 = vld [vmem:[#allocation7 + $0x7a0] sm:$0xff]  ;;  %v4927_v24 = vcombine.high %v605_v19, %v609_v20  ;;  %v597_v27 = vld [vmem:[#allocation7 + $0x748] sm:$0xff]  ;;  %v4926_v30 = vcombine.low %v605_v19, %v609_v20 }
  0x7c   : > { %1270 = vmatprep.subr.bf16.mxu0 %v4829_v44  ;;  %1313 = vmatprep.subr.bf16.mxu1 %v4831_v45  ;;  %v469_v12 = vor.u32 %v468_v6, %v464_v62  ;;  %v4925_v23 = vcombine.high %v604_v16, %v608_v17  ;;  %v596_v25 = vld [vmem:[#allocation7 + $0x740] sm:$0xff]  ;;  %v601_v28 = vld [vmem:[#allocation7 + $0x768] sm:$0xff]  ;;  %v4924_v29 = vcombine.low %v604_v16, %v608_v17 }
  0x7d   : > { %v600_v26 = vld [vmem:[#allocation7 + $0x760] sm:$0xff]  ;;  %v4919_v32 = vcombine.high %v597_v27, %v601_v28  ;;  %v589_v35 = vld [vmem:[#allocation7 + $0x708] sm:$0xff]  ;;  %v4918_v38 = vcombine.low %v597_v27, %v601_v28  ;;  %v6008_v6 = vcombine.low %v5973_v56, %v5973_v56 }
  0x7e   : > { %v5998_v18 = vsel %vm5990_vm2, %v469_v12, %v484_v9  ;;  %v4917_v31 = vcombine.high %v596_v25, %v600_v26  ;;  %v588_v33 = vld [vmem:[#allocation7 + $0x700] sm:$0xff]  ;;  %v593_v36 = vld [vmem:[#allocation7 + $0x728] sm:$0xff]  ;;  %v4916_v37 = vcombine.low %v596_v25, %v600_v26  ;;  %v555_v25 = vld [vmem:[#allocation7 + $0x5f8] sm:$0xff] }
  0x7f   : > { %1271 = vmatpush1.bf16.msra.mxu0 %v4828_v50  ;;  %1314 = vmatpush1.bf16.msra.mxu1 %v4830_v51  ;;  %v592_v34 = vld [vmem:[#allocation7 + $0x720] sm:$0xff]  ;;  %v4911_v40 = vcombine.high %v589_v35, %v593_v36  ;;  %v581_v43 = vld [vmem:[#allocation7 + $0x6c8] sm:$0xff]  ;;  %v4910_v46 = vcombine.low %v589_v35, %v593_v36  ;;  %v478_v56 = vshll.u32 %v6008_v6, 16  ;;  %v547_v35 = vld [vmem:[#allocation7 + $0x5b8] sm:$0xff] }
  0x80   : > { %1272 = vmatprep.subr.bf16.mxu0 %v4821_v52  ;;  %1315 = vmatprep.subr.bf16.mxu1 %v4823_v54  ;;  %v4909_v39 = vcombine.high %v588_v33, %v592_v34  ;;  %v580_v41 = vld [vmem:[#allocation7 + $0x6c0] sm:$0xff]  ;;  %v585_v44 = vld [vmem:[#allocation7 + $0x6e8] sm:$0xff]  ;;  %v4908_v45 = vcombine.low %v588_v33, %v592_v34  ;;  %v546_v33 = vld [vmem:[#allocation7 + $0x5b0] sm:$0xff] }
  0x81   : > { %1292 = vmatprep.mubr.bf16.mxu0 %v5998_v18  ;;  %1335 = vmatprep.mubr.bf16.mxu1 %v5998_v18  ;;  %v584_v42 = vld [vmem:[#allocation7 + $0x6e0] sm:$0xff]  ;;  %v4903_v48 = vcombine.high %v581_v43, %v585_v44  ;;  %v573_v51 = vld [vmem:[#allocation7 + $0x688] sm:$0xff]  ;;  %v4902_v55 = vcombine.low %v581_v43, %v585_v44  ;;  %v480_v28 = vrot.slane %v478_v56, 1  ;;  %v543_v34 = vld [vmem:[#allocation7 + $0x598] sm:$0xff] }
  0x82   : > { %v4901_v47 = vcombine.high %v580_v41, %v584_v42  ;;  %v572_v49 = vld [vmem:[#allocation7 + $0x680] sm:$0xff]  ;;  %v577_v52 = vld [vmem:[#allocation7 + $0x6a8] sm:$0xff]  ;;  %v4900_v53 = vcombine.low %v580_v41, %v584_v42  ;;  %v534_v41 = vld [vmem:[#allocation7 + $0x550] sm:$0xff]  ;;  %v4866_v10 = vcombine.low %v543_v34, %v547_v35 }
  0x83   : > { %1273 = vmatpush1.bf16.msra.mxu0 %v4820_v61  ;;  %1316 = vmatpush1.bf16.msra.mxu1 %v4822_v0  ;;  %v576_v50 = vld [vmem:[#allocation7 + $0x6a0] sm:$0xff]  ;;  %v4895_v59 = vcombine.high %v573_v51, %v577_v52  ;;  %v4894_v7 = vcombine.low %v573_v51, %v577_v52  ;;  %v538_v42 = vld [vmem:[#allocation7 + $0x570] sm:$0xff]  ;;  %v535_v43 = vld [vmem:[#allocation7 + $0x558] sm:$0xff] }
  0x84   : > { %1274 = vmatprep.subr.bf16.mxu0 %v4813_v1  ;;  %1317 = vmatprep.subr.bf16.mxu1 %v4815_v3  ;;  %v6003_v54 = vld [vmem:[%s5951_s22] ss:$8 sps:$4 sm:$0xff]   ;;  %v4893_v58 = vcombine.high %v572_v49, %v576_v50  ;;  %v4892_v4 = vcombine.low %v572_v49, %v576_v50  ;;  %v4856_v52 = vcombine.low %v534_v41, %v538_v42 }
  0x85   : > { %v564_v61 = vld [vmem:[#allocation7 + $0x640] sm:$0xff]  ;;  %v565_v1 = vld [vmem:[#allocation7 + $0x648] sm:$0xff]  ;;  %v459_v5 = vshll.u32 %v6003_v54, 16  ;;  %v457_v16 = vshrl.u32 %v6003_v54, 16  ;;  %v539_v44 = vld [vmem:[#allocation7 + $0x578] sm:$0xff] }
  0x86   : > { %v568_v0 = vld [vmem:[#allocation7 + $0x660] sm:$0xff]  ;;  %v569_v3 = vld [vmem:[#allocation7 + $0x668] sm:$0xff]  ;;  %v527_v49 = vld [vmem:[#allocation7 + $0x518] sm:$0xff]  ;;  %v4859_v50 = vcombine.high %v535_v43, %v539_v44 }
  0x87   : > { %1275 = vmatpush1.bf16.msra.mxu0 %v4812_v11  ;;  %1318 = vmatpush1.bf16.msra.mxu1 %v4814_v13  ;;  %v4885_v8 = vcombine.high %v564_v61, %v568_v0  ;;  %v4887_v9 = vcombine.high %v565_v1, %v569_v3  ;;  %v556_v11 = vld [vmem:[#allocation7 + $0x600] sm:$0xff]  ;;  %v557_v13 = vld [vmem:[#allocation7 + $0x608] sm:$0xff]  ;;  %v461_v17 = vrot.slane %v459_v5, 1  ;;  %v4886_v19 = vcombine.low %v565_v1, %v569_v3  ;;  %v531_v51 = vld [vmem:[#allocation7 + $0x538] sm:$0xff] }
  0x88   : > { %1276 = vmatprep.subr.bf16.mxu0 %v4933_v14  ;;  %1319 = vmatprep.subr.bf16.mxu1 %v4935_v15  ;;  %v560_v12 = vld [vmem:[#allocation7 + $0x620] sm:$0xff]  ;;  %v561_v14 = vld [vmem:[#allocation7 + $0x628] sm:$0xff]  ;;  %v4884_v15 = vcombine.low %v564_v61, %v568_v0  ;;  %v519_v61 = vld [vmem:[#allocation7 + $0x4d8] sm:$0xff]  ;;  %v4851_v0 = vcombine.high %v527_v49, %v531_v51 }
  0x89   : > { %v4877_v20 = vcombine.high %v556_v11, %v560_v12  ;;  %v4876_v26 = vcombine.low %v556_v11, %v560_v12  ;;  %v462_v27 = vor.u32 %v461_v17, %v457_v16  ;;  %v523_v1 = vld [vmem:[#allocation7 + $0x4f8] sm:$0xff]  ;;  %v502_v17 = vld [vmem:[#allocation7 + $0x450] sm:$0xff] }
  0x8a   : > { %v4843_v11 = vcombine.high %v519_v61, %v523_v1  ;;  %v515_v12 = vld [vmem:[#allocation7 + $0x4b8] sm:$0xff] }
  0x8b   : > { %1277 = vmatpush2.bf16.msra.mxu0 %v4932_v21  ;;  %1320 = vmatpush2.bf16.msra.mxu1 %v4934_v22  ;;  %v4879_v21 = vcombine.high %v557_v13, %v561_v14  ;;  %v550_v22 = vld [vmem:[#allocation7 + $0x5d0] sm:$0xff]  ;;  %v6020_v36 = vsel %vm5990_vm2, %v462_v27, %v480_v28  ;;  %v495_v28 = vld [vmem:[#allocation7 + $0x418] sm:$0xff] }
  0x8c   : > { %1278 = vmatprep.subr.bf16.mxu0 %v4925_v23  ;;  %1321 = vmatprep.subr.bf16.mxu1 %v4927_v24  ;;  %v554_v23 = vld [vmem:[#allocation7 + $0x5f0] sm:$0xff]  ;;  %v551_v24 = vld [vmem:[#allocation7 + $0x5d8] sm:$0xff] }
  0x8d   : > { %v498_v27 = vld [vmem:[#allocation7 + $0x430] sm:$0xff] }
  0x8f   : > { %1279 = vmatpush2.bf16.msra.mxu0 %v4924_v29  ;;  %1322 = vmatpush2.bf16.msra.mxu1 %v4926_v30  ;;  %v4878_v29 = vcombine.low %v557_v13, %v561_v14  ;;  %v4873_v30 = vcombine.high %v550_v22, %v554_v23  ;;  %v4842_v14 = vcombine.low %v519_v61, %v523_v1  ;;  %v590_v1 = vld [vmem:[#allocation7 + $0x710] sm:$0xff] }
  0x90   : > { %1280 = vmatprep.subr.bf16.mxu0 %v4917_v31  ;;  %1323 = vmatprep.subr.bf16.mxu1 %v4919_v32  ;;  %v4875_v31 = vcombine.high %v551_v24, %v555_v25  ;;  %v542_v32 = vld [vmem:[#allocation7 + $0x590] sm:$0xff] }
  0x93   : > { %1281 = vmatpush2.bf16.msra.mxu0 %v4916_v37  ;;  %1324 = vmatpush2.bf16.msra.mxu1 %v4918_v38  ;;  %v4872_v37 = vcombine.low %v550_v22, %v554_v23  ;;  %v4874_v38 = vcombine.low %v551_v24, %v555_v25  ;;  %v507_v22 = vld [vmem:[#allocation7 + $0x478] sm:$0xff] }
  0x94   : > { %1282 = vmatprep.subr.bf16.mxu0 %v4909_v39  ;;  %1325 = vmatprep.subr.bf16.mxu1 %v4911_v40  ;;  %v4865_v39 = vcombine.high %v542_v32, %v546_v33  ;;  %v4867_v40 = vcombine.high %v543_v34, %v547_v35  ;;  %v614_v34 = vld [vmem:[#allocation7 + $0x7d0] sm:$0xff] }
  0x95   : > { %v618_v35 = vld [vmem:[#allocation7 + $0x7f0] sm:$0xff] }
  0x97   : > { %1283 = vmatpush2.bf16.msra.mxu0 %v4908_v45  ;;  %1326 = vmatpush2.bf16.msra.mxu1 %v4910_v46  ;;  %v4864_v45 = vcombine.low %v542_v32, %v546_v33  ;;  %v4857_v46 = vcombine.high %v534_v41, %v538_v42  ;;  %v4937_v42 = vcombine.high %v614_v34, %v618_v35 }
  0x98   : > { %1284 = vmatprep.subr.bf16.mxu0 %v4901_v47  ;;  %1327 = vmatprep.subr.bf16.mxu1 %v4903_v48  ;;  %v526_v47 = vld [vmem:[#allocation7 + $0x510] sm:$0xff] }
  0x99   : > { %v530_v48 = vld [vmem:[#allocation7 + $0x530] sm:$0xff] }
  0x9a   : > { %v4848_v3 = vcombine.low %v526_v47, %v530_v48 }
  0x9b   : > { %1285 = vmatpush2.bf16.msra.mxu0 %v4900_v53  ;;  %1328 = vmatpush2.bf16.msra.mxu1 %v4902_v55  ;;  %v4858_v53 = vcombine.low %v535_v43, %v539_v44  ;;  %v4849_v55 = vcombine.high %v526_v47, %v530_v48  ;;  %v606_v43 = vld [vmem:[#allocation7 + $0x790] sm:$0xff]  ;;  %v4936_v47 = vcombine.low %v614_v34, %v618_v35 }
  0x9c   : > { %1286 = vmatprep.subr.bf16.mxu0 %v4893_v58  ;;  %1329 = vmatprep.subr.bf16.mxu1 %v4895_v59  ;;  %v518_v58 = vld [vmem:[#allocation7 + $0x4d0] sm:$0xff] }
  0x9d   : > { %v522_v59 = vld [vmem:[#allocation7 + $0x4f0] sm:$0xff] }
  0x9e   : > { %v4840_v13 = vcombine.low %v518_v58, %v522_v59  ;;  %v610_v44 = vld [vmem:[#allocation7 + $0x7b0] sm:$0xff] }
  0x9f   : > { %1287 = vmatpush2.bf16.msra.mxu0 %v4892_v4  ;;  %1330 = vmatpush2.bf16.msra.mxu1 %v4894_v7  ;;  %v4850_v4 = vcombine.low %v527_v49, %v531_v51  ;;  %v4841_v7 = vcombine.high %v518_v58, %v522_v59  ;;  %v4929_v49 = vcombine.high %v606_v43, %v610_v44 }
  0xa0   : > { %1288 = vmatprep.subr.bf16.mxu0 %v4885_v8  ;;  %1331 = vmatprep.subr.bf16.mxu1 %v4887_v9  ;;  %v510_v8 = vld [vmem:[#allocation7 + $0x490] sm:$0xff]  ;;  %v511_v9 = vld [vmem:[#allocation7 + $0x498] sm:$0xff]  ;;  %v4928_v58 = vcombine.low %v606_v43, %v610_v44 }
  0xa1   : > { %v4834_v24 = vcombine.low %v511_v9, %v515_v12 }
  0xa3   : > { %1289 = vmatpush2.bf16.msra.mxu0 %v4884_v15  ;;  %1332 = vmatpush2.bf16.msra.mxu1 %v4886_v19  ;;  %v506_v19 = vld [vmem:[#allocation7 + $0x470] sm:$0xff] }
  0xa4   : > { %1290 = vmatprep.subr.bf16.mxu0 %v4877_v20  ;;  %1333 = vmatprep.subr.bf16.mxu1 %v4879_v21  ;;  %v503_v20 = vld [vmem:[#allocation7 + $0x458] sm:$0xff]  ;;  %v4835_v21 = vcombine.high %v511_v9, %v515_v12  ;;  %v4825_v25 = vcombine.high %v502_v17, %v506_v19  ;;  %v582_v12 = vld [vmem:[#allocation7 + $0x6d0] sm:$0xff] }
  0xa5   : > { %v4826_v32 = vcombine.low %v503_v20, %v507_v22 }
  0xa7   : > { %1291 = vmatpush2.bf16.msra.mxu0 %v4876_v26  ;;  %1334 = vmatpush2.bf16.msra.mxu1 %v4878_v29  ;;  %v494_v26 = vld [vmem:[#allocation7 + $0x410] sm:$0xff]  ;;  %v4827_v29 = vcombine.high %v503_v20, %v507_v22 }
  0xa8   : > { %1346 = vmatprep.subr.bf16.mxu0 %v4873_v30  ;;  %1389 = vmatprep.subr.bf16.mxu1 %v4875_v31  ;;  %v499_v30 = vld [vmem:[#allocation7 + $0x438] sm:$0xff]  ;;  %v4824_v31 = vcombine.low %v502_v17, %v506_v19  ;;  %v4817_v33 = vcombine.high %v494_v26, %v498_v27  ;;  %v574_v22 = vld [vmem:[#allocation7 + $0x690] sm:$0xff] }
  0xa9   : > { %v4818_v41 = vcombine.low %v495_v28, %v499_v30 }
  0xaa   : > { %1293 = vmatmul.mubr.bf16.vlgmr.msra.gmra.mxu0 %v6020_v36  ;;  %1336 = vmatmul.mubr.bf16.vlgmr.msra.gmra.mxu1 %v6020_v36 }
  0xab   : > { %1347 = vmatpush1.bf16.msra.mxu0 %v4872_v37  ;;  %1390 = vmatpush1.bf16.msra.mxu1 %v4874_v38  ;;  %v615_v37 = vld [vmem:[#allocation7 + $0x7d8] sm:$0xff]  ;;  %v4819_v38 = vcombine.high %v495_v28, %v499_v30  ;;  %v566_v30 = vld [vmem:[#allocation7 + $0x650] sm:$0xff] }
  0xac   : > { %1348 = vmatprep.subr.bf16.mxu0 %v4865_v39  ;;  %1391 = vmatprep.subr.bf16.mxu1 %v4867_v40  ;;  %v619_v39 = vld [vmem:[#allocation7 + $0x7f8] sm:$0xff]  ;;  %v4816_v40 = vcombine.low %v494_v26, %v498_v27 }
  0xad   : > { %1378 = vmatprep.mubr.bf16.mxu0 %v5998_v18  ;;  %1421 = vmatprep.mubr.bf16.mxu1 %v5998_v18  ;;  %v514_v18 = vld [vmem:[#allocation7 + $0x4b0] sm:$0xff]  ;;  %v4938_v48 = vcombine.low %v615_v37, %v619_v39 }
  0xae   : > { %v4833_v15 = vcombine.high %v510_v8, %v514_v18  ;;  %v4832_v23 = vcombine.low %v510_v8, %v514_v18 }
  0xaf   : > { %1349 = vmatpush1.bf16.msra.mxu0 %v4864_v45  ;;  %1392 = vmatpush1.bf16.msra.mxu1 %v4866_v10  ;;  %v607_v45 = vld [vmem:[#allocation7 + $0x798] sm:$0xff]  ;;  %v4939_v10 = vcombine.high %v615_v37, %v619_v39  ;;  %v558_v39 = vld [vmem:[#allocation7 + $0x610] sm:$0xff] }
  0xb0   : > { %1350 = vmatprep.subr.bf16.mxu0 %v4857_v46  ;;  %1393 = vmatprep.subr.bf16.mxu1 %v4859_v50  ;;  %v611_v46 = vld [vmem:[#allocation7 + $0x7b8] sm:$0xff]  ;;  %v598_v50 = vld [vmem:[#allocation7 + $0x750] sm:$0xff] }
  0xb1   : > { %v4931_v51 = vcombine.high %v607_v45, %v611_v46  ;;  %v4930_v59 = vcombine.low %v607_v45, %v611_v46  ;;  %v376_v46 = vld [vmem:[#allocation7 + $0x1c0] sm:$0xff] }
  0xb3   : > { %1351 = vmatpush1.bf16.msra.mxu0 %v4856_v52  ;;  %1394 = vmatpush1.bf16.msra.mxu1 %v4858_v53  ;;  %v602_v52 = vld [vmem:[#allocation7 + $0x770] sm:$0xff]  ;;  %v599_v53 = vld [vmem:[#allocation7 + $0x758] sm:$0xff] }
  0xb4   : > { %1352 = vmatprep.subr.bf16.mxu0 %v4849_v55  ;;  %1395 = vmatprep.subr.bf16.mxu1 %v4851_v0  ;;  %v603_v55 = vld [vmem:[#allocation7 + $0x778] sm:$0xff]  ;;  %v4921_v61 = vcombine.high %v598_v50, %v602_v52  ;;  %v4920_v8 = vcombine.low %v598_v50, %v602_v52 }
  0xb5   : > { %v4923_v0 = vcombine.high %v599_v53, %v603_v55  ;;  %v4922_v18 = vcombine.low %v599_v53, %v603_v55  ;;  %v368_v55 = vld [vmem:[#allocation7 + $0x180] sm:$0xff] }
  0xb7   : > { %1353 = vmatpush1.bf16.msra.mxu0 %v4848_v3  ;;  %1396 = vmatpush1.bf16.msra.mxu1 %v4850_v4  ;;  %v594_v3 = vld [vmem:[#allocation7 + $0x730] sm:$0xff]  ;;  %v591_v4 = vld [vmem:[#allocation7 + $0x718] sm:$0xff] }
  0xb8   : > { %1354 = vmatprep.subr.bf16.mxu0 %v4841_v7  ;;  %1397 = vmatprep.subr.bf16.mxu1 %v4843_v11  ;;  %v595_v7 = vld [vmem:[#allocation7 + $0x738] sm:$0xff]  ;;  %v4913_v9 = vcombine.high %v590_v1, %v594_v3  ;;  %v4912_v17 = vcombine.low %v590_v1, %v594_v3 }
  0xb9   : > { %v4915_v11 = vcombine.high %v591_v4, %v595_v7  ;;  %v4914_v19 = vcombine.low %v591_v4, %v595_v7  ;;  %v360_v7 = vld [vmem:[#allocation7 + $0x140] sm:$0xff] }
  0xbb   : > { %1355 = vmatpush1.bf16.msra.mxu0 %v4840_v13  ;;  %1398 = vmatpush1.bf16.msra.mxu1 %v4842_v14  ;;  %v586_v13 = vld [vmem:[#allocation7 + $0x6f0] sm:$0xff]  ;;  %v583_v14 = vld [vmem:[#allocation7 + $0x6d8] sm:$0xff] }
  0xbc   : > { %1356 = vmatprep.subr.bf16.mxu0 %v4833_v15  ;;  %1399 = vmatprep.subr.bf16.mxu1 %v4835_v21  ;;  %v587_v15 = vld [vmem:[#allocation7 + $0x6f8] sm:$0xff]  ;;  %v4905_v20 = vcombine.high %v582_v12, %v586_v13  ;;  %v4904_v26 = vcombine.low %v582_v12, %v586_v13 }
  0xbd   : > { %v4907_v21 = vcombine.high %v583_v14, %v587_v15  ;;  %v4906_v27 = vcombine.low %v583_v14, %v587_v15  ;;  %v352_v15 = vld [vmem:[#allocation7 + $0x100] sm:$0xff] }
  0xbf   : > { %1357 = vmatpush1.bf16.msra.mxu0 %v4832_v23  ;;  %1400 = vmatpush1.bf16.msra.mxu1 %v4834_v24  ;;  %v578_v23 = vld [vmem:[#allocation7 + $0x6b0] sm:$0xff]  ;;  %v575_v24 = vld [vmem:[#allocation7 + $0x698] sm:$0xff] }
  0xc0   : > { %1358 = vmatprep.subr.bf16.mxu0 %v4825_v25  ;;  %1401 = vmatprep.subr.bf16.mxu1 %v4827_v29  ;;  %v579_v25 = vld [vmem:[#allocation7 + $0x6b8] sm:$0xff]  ;;  %v4897_v28 = vcombine.high %v574_v22, %v578_v23  ;;  %v4896_v34 = vcombine.low %v574_v22, %v578_v23 }
  0xc1   : > { %v4899_v29 = vcombine.high %v575_v24, %v579_v25  ;;  %v4898_v35 = vcombine.low %v575_v24, %v579_v25  ;;  %v344_v24 = vld [vmem:[#allocation7 + $0xc0] sm:$0xff] }
  0xc2   : > { %v348_v25 = vld [vmem:[#allocation7 + $0xe0] sm:$0xff] }
  0xc3   : > { %1359 = vmatpush1.bf16.msra.mxu0 %v4824_v31  ;;  %1402 = vmatpush1.bf16.msra.mxu1 %v4826_v32  ;;  %v570_v31 = vld [vmem:[#allocation7 + $0x670] sm:$0xff]  ;;  %v567_v32 = vld [vmem:[#allocation7 + $0x658] sm:$0xff] }
  0xc4   : > { %1360 = vmatprep.subr.bf16.mxu0 %v4817_v33  ;;  %1403 = vmatprep.subr.bf16.mxu1 %v4819_v38  ;;  %v571_v33 = vld [vmem:[#allocation7 + $0x678] sm:$0xff]  ;;  %v4889_v37 = vcombine.high %v566_v30, %v570_v31  ;;  %v4888_v43 = vcombine.low %v566_v30, %v570_v31  ;;  %v4965_v30 = vcombine.high %v344_v24, %v348_v25 }
  0xc5   : > { %v4891_v38 = vcombine.high %v567_v32, %v571_v33  ;;  %v4890_v44 = vcombine.low %v567_v32, %v571_v33  ;;  %v336_v32 = vld [vmem:[#allocation7 + $0x80] sm:$0xff] }
  0xc6   : > { %v340_v33 = vld [vmem:[#allocation7 + $0xa0] sm:$0xff] }
  0xc7   : > { %1361 = vmatpush1.bf16.msra.mxu0 %v4816_v40  ;;  %1404 = vmatpush1.bf16.msra.mxu1 %v4818_v41  ;;  %v562_v40 = vld [vmem:[#allocation7 + $0x630] sm:$0xff]  ;;  %v559_v41 = vld [vmem:[#allocation7 + $0x618] sm:$0xff] }
  0xc8   : > { %1362 = vmatprep.subr.bf16.mxu0 %v4937_v42  ;;  %1405 = vmatprep.subr.bf16.mxu1 %v4939_v10  ;;  %v563_v42 = vld [vmem:[#allocation7 + $0x638] sm:$0xff]  ;;  %v4881_v45 = vcombine.high %v558_v39, %v562_v40  ;;  %v4880_v50 = vcombine.low %v558_v39, %v562_v40  ;;  %v4957_v39 = vcombine.high %v336_v32, %v340_v33 }
  0xc9   : > { %v4883_v10 = vcombine.high %v559_v41, %v563_v42 }
  0xcb   : > { %1363 = vmatpush2.bf16.msra.mxu0 %v4936_v47  ;;  %1406 = vmatpush2.bf16.msra.mxu1 %v4938_v48  ;;  %v380_v47 = vld [vmem:[#allocation7 + $0x1e0] sm:$0xff]  ;;  %v377_v48 = vld [vmem:[#allocation7 + $0x1c8] sm:$0xff] }
  0xcc   : > { %1364 = vmatprep.subr.bf16.mxu0 %v4929_v49  ;;  %1407 = vmatprep.subr.bf16.mxu1 %v4931_v51  ;;  %v381_v49 = vld [vmem:[#allocation7 + $0x1e8] sm:$0xff]  ;;  %v4882_v51 = vcombine.low %v559_v41, %v563_v42  ;;  %v4997_v52 = vcombine.high %v376_v46, %v380_v47  ;;  %v328_v41 = vld [vmem:[#allocation7 + $0x40] sm:$0xff] }
  0xcd   : > { %v4999_v53 = vcombine.high %v377_v48, %v381_v49  ;;  %v4998_v1 = vcombine.low %v377_v48, %v381_v49  ;;  %v332_v42 = vld [vmem:[#allocation7 + $0x60] sm:$0xff] }
  0xce   : > { %v320_v48 = vld [vmem:[#allocation7] sm:$0xff] }
  0xcf   : > { %1365 = vmatpush2.bf16.msra.mxu0 %v4928_v58  ;;  %1408 = vmatpush2.bf16.msra.mxu1 %v4930_v59  ;;  %v372_v58 = vld [vmem:[#allocation7 + $0x1a0] sm:$0xff]  ;;  %v369_v59 = vld [vmem:[#allocation7 + $0x188] sm:$0xff] }
  0xd0   : > { %1366 = vmatprep.subr.bf16.mxu0 %v4921_v61  ;;  %1409 = vmatprep.subr.bf16.mxu1 %v4923_v0  ;;  %v373_v61 = vld [vmem:[#allocation7 + $0x1a8] sm:$0xff]  ;;  %v4996_v0 = vcombine.low %v376_v46, %v380_v47  ;;  %v4989_v3 = vcombine.high %v368_v55, %v372_v58  ;;  %v4949_v46 = vcombine.high %v328_v41, %v332_v42  ;;  %v324_v49 = vld [vmem:[#allocation7 + $0x20] sm:$0xff] }
  0xd1   : > { %v4991_v4 = vcombine.high %v369_v59, %v373_v61  ;;  %v4990_v12 = vcombine.low %v369_v59, %v373_v61  ;;  %v440_v59 = vld [vmem:[#allocation7 + $0x3c0] sm:$0xff] }
  0xd2   : > { %v444_v61 = vld [vmem:[#allocation7 + $0x3e0] sm:$0xff] }
  0xd3   : > { %1367 = vmatpush2.bf16.msra.mxu0 %v4920_v8  ;;  %1410 = vmatpush2.bf16.msra.mxu1 %v4922_v18  ;;  %v364_v8 = vld [vmem:[#allocation7 + $0x160] sm:$0xff]  ;;  %v361_v18 = vld [vmem:[#allocation7 + $0x148] sm:$0xff] }
  0xd4   : > { %1368 = vmatprep.subr.bf16.mxu0 %v4913_v9  ;;  %1411 = vmatprep.subr.bf16.mxu1 %v4915_v11  ;;  %v365_v9 = vld [vmem:[#allocation7 + $0x168] sm:$0xff]  ;;  %v4988_v11 = vcombine.low %v368_v55, %v372_v58  ;;  %v4981_v13 = vcombine.high %v360_v7, %v364_v8  ;;  %v4941_v55 = vcombine.high %v320_v48, %v324_v49 }
  0xd5   : > { %v4983_v14 = vcombine.high %v361_v18, %v365_v9 }
  0xd7   : > { %1369 = vmatpush2.bf16.msra.mxu0 %v4912_v17  ;;  %1412 = vmatpush2.bf16.msra.mxu1 %v4914_v19  ;;  %v356_v17 = vld [vmem:[#allocation7 + $0x120] sm:$0xff]  ;;  %v353_v19 = vld [vmem:[#allocation7 + $0x108] sm:$0xff] }
  0xd8   : > { %1370 = vmatprep.subr.bf16.mxu0 %v4905_v20  ;;  %1413 = vmatprep.subr.bf16.mxu1 %v4907_v21  ;;  %v357_v20 = vld [vmem:[#allocation7 + $0x128] sm:$0xff]  ;;  %v4980_v21 = vcombine.low %v360_v7, %v364_v8  ;;  %v4973_v22 = vcombine.high %v352_v15, %v356_v17  ;;  %v5061_v7 = vcombine.high %v440_v59, %v444_v61 }
  0xd9   : > { %v4975_v23 = vcombine.high %v353_v19, %v357_v20 }
  0xdb   : > { %1371 = vmatpush2.bf16.msra.mxu0 %v4904_v26  ;;  %1414 = vmatpush2.bf16.msra.mxu1 %v4906_v27  ;;  %v345_v26 = vld [vmem:[#allocation7 + $0xc8] sm:$0xff] }
  0xdc   : > { %1372 = vmatprep.subr.bf16.mxu0 %v4897_v28  ;;  %1415 = vmatprep.subr.bf16.mxu1 %v4899_v29  ;;  %v349_v27 = vld [vmem:[#allocation7 + $0xe8] sm:$0xff]  ;;  %v4972_v28 = vcombine.low %v352_v15, %v356_v17  ;;  %v4974_v29 = vcombine.low %v353_v19, %v357_v20  ;;  %v424_v19 = vld [vmem:[#allocation7 + $0x340] sm:$0xff] }
  0xdd   : > { %v4967_v31 = vcombine.high %v345_v26, %v349_v27  ;;  %v428_v20 = vld [vmem:[#allocation7 + $0x360] sm:$0xff] }
  0xdf   : > { %1373 = vmatpush2.bf16.msra.mxu0 %v4896_v34  ;;  %1416 = vmatpush2.bf16.msra.mxu1 %v4898_v35  ;;  %v337_v34 = vld [vmem:[#allocation7 + $0x88] sm:$0xff] }
  0xe0   : > { %1374 = vmatprep.subr.bf16.mxu0 %v4889_v37  ;;  %1417 = vmatprep.subr.bf16.mxu1 %v4891_v38  ;;  %v341_v35 = vld [vmem:[#allocation7 + $0xa8] sm:$0xff]  ;;  %v4964_v37 = vcombine.low %v344_v24, %v348_v25  ;;  %v4966_v38 = vcombine.low %v345_v26, %v349_v27  ;;  %v5045_v24 = vcombine.high %v424_v19, %v428_v20  ;;  %v416_v26 = vld [vmem:[#allocation7 + $0x300] sm:$0xff] }
  0xe1   : > { %v4959_v40 = vcombine.high %v337_v34, %v341_v35  ;;  %v420_v27 = vld [vmem:[#allocation7 + $0x320] sm:$0xff] }
  0xe3   : > { %1375 = vmatpush2.bf16.msra.mxu0 %v4888_v43  ;;  %1418 = vmatpush2.bf16.msra.mxu1 %v4890_v44  ;;  %v329_v43 = vld [vmem:[#allocation7 + $0x48] sm:$0xff] }
  0xe4   : > { %1376 = vmatprep.subr.bf16.mxu0 %v4881_v45  ;;  %1419 = vmatprep.subr.bf16.mxu1 %v4883_v10  ;;  %v333_v44 = vld [vmem:[#allocation7 + $0x68] sm:$0xff]  ;;  %v4956_v45 = vcombine.low %v336_v32, %v340_v33  ;;  %v4958_v10 = vcombine.low %v337_v34, %v341_v35  ;;  %v5037_v32 = vcombine.high %v416_v26, %v420_v27  ;;  %v408_v34 = vld [vmem:[#allocation7 + $0x2c0] sm:$0xff] }
  0xe5   : > { %v4951_v47 = vcombine.high %v329_v43, %v333_v44  ;;  %v412_v35 = vld [vmem:[#allocation7 + $0x2e0] sm:$0xff] }
  0xe7   : > { %1377 = vmatpush2.bf16.msra.mxu0 %v4880_v50  ;;  %1420 = vmatpush2.bf16.msra.mxu1 %v4882_v51  ;;  %v321_v50 = vld [vmem:[#allocation7 + $0x8] sm:$0xff] }
  0xe8   : > { %2074 = vmatprep.subr.bf16.mxu0 %v4997_v52  ;;  %2117 = vmatprep.subr.bf16.mxu1 %v4999_v53  ;;  %v325_v51 = vld [vmem:[#allocation7 + $0x28] sm:$0xff]  ;;  %v4948_v52 = vcombine.low %v328_v41, %v332_v42  ;;  %v4950_v53 = vcombine.low %v329_v43, %v333_v44  ;;  %v5029_v41 = vcombine.high %v408_v34, %v412_v35  ;;  %v400_v43 = vld [vmem:[#allocation7 + $0x280] sm:$0xff] }
  0xe9   : > { %v4943_v58 = vcombine.high %v321_v50, %v325_v51  ;;  %v404_v44 = vld [vmem:[#allocation7 + $0x2a0] sm:$0xff] }
  0xea   : > { %1379 = vmatmul.mubr.bf16.vlgmr.msra.gmra.mxu0 %v6020_v36  ;;  %1422 = vmatmul.mubr.bf16.vlgmr.msra.gmra.mxu1 %v6020_v36  ;;  %v4982_v36 = vcombine.low %v361_v18, %v365_v9  ;;  %v432_v18 = vld [vmem:[#allocation7 + $0x380] sm:$0xff] }
  0xeb   : > { %2075 = vmatpush1.bf16.msra.mxu0 %v4996_v0  ;;  %2118 = vmatpush1.bf16.msra.mxu1 %v4998_v1  ;;  %v441_v0 = vld [vmem:[#allocation7 + $0x3c8] sm:$0xff]  ;;  %v436_v9 = vld [vmem:[#allocation7 + $0x3a0] sm:$0xff] }
  0xec   : > { %2076 = vmatprep.subr.bf16.mxu0 %v4989_v3  ;;  %2119 = vmatprep.subr.bf16.mxu1 %v4991_v4  ;;  %v445_v1 = vld [vmem:[#allocation7 + $0x3e8] sm:$0xff]  ;;  %v4940_v3 = vcombine.low %v320_v48, %v324_v49  ;;  %v4942_v4 = vcombine.low %v321_v50, %v325_v51  ;;  %v5053_v15 = vcombine.high %v432_v18, %v436_v9  ;;  %v392_v50 = vld [vmem:[#allocation7 + $0x240] sm:$0xff] }
  0xed   : > { %2106 = vmatprep.mubr.bf16.mxu0 %v5976_v57  ;;  %2149 = vmatprep.mubr.bf16.mxu1 %v5976_v57  ;;  %v5063_v8 = vcombine.high %v441_v0, %v445_v1  ;;  %v5021_v48 = vcombine.high %v400_v43, %v404_v44  ;;  %v396_v51 = vld [vmem:[#allocation7 + $0x260] sm:$0xff] }
  0xef   : > { %2077 = vmatpush1.bf16.msra.mxu0 %v4988_v11  ;;  %2120 = vmatpush1.bf16.msra.mxu1 %v4990_v12  ;;  %v433_v11 = vld [vmem:[#allocation7 + $0x388] sm:$0xff] }
  0xf0   : > { %2078 = vmatprep.subr.bf16.mxu0 %v4981_v13  ;;  %2121 = vmatprep.subr.bf16.mxu1 %v4983_v14  ;;  %v437_v12 = vld [vmem:[#allocation7 + $0x3a8] sm:$0xff]  ;;  %v5060_v13 = vcombine.low %v440_v59, %v444_v61  ;;  %v5062_v14 = vcombine.low %v441_v0, %v445_v1  ;;  %v5013_v59 = vcombine.high %v392_v50, %v396_v51  ;;  %v384_v0 = vld [vmem:[#allocation7 + $0x200] sm:$0xff] }
  0xf1   : > { %v5055_v17 = vcombine.high %v433_v11, %v437_v12  ;;  %v388_v1 = vld [vmem:[#allocation7 + $0x220] sm:$0xff] }
  0xf3   : > { %2079 = vmatpush1.bf16.msra.mxu0 %v4980_v21  ;;  %2122 = vmatpush1.bf16.msra.mxu1 %v4982_v36  ;;  %v425_v21 = vld [vmem:[#allocation7 + $0x348] sm:$0xff] }
  0xf4   : > { %2080 = vmatprep.subr.bf16.mxu0 %v4973_v22  ;;  %2123 = vmatprep.subr.bf16.mxu1 %v4975_v23  ;;  %v429_v36 = vld [vmem:[#allocation7 + $0x368] sm:$0xff]  ;;  %v5052_v22 = vcombine.low %v432_v18, %v436_v9  ;;  %v5054_v23 = vcombine.low %v433_v11, %v437_v12  ;;  %v5005_v18 = vcombine.high %v384_v0, %v388_v1  ;;  %v378_v11 = vld [vmem:[#allocation7 + $0x1d0] sm:$0xff] }
  0xf5   : > { %v5047_v25 = vcombine.high %v425_v21, %v429_v36  ;;  %v382_v12 = vld [vmem:[#allocation7 + $0x1f0] sm:$0xff] }
  0xf7   : > { %2081 = vmatpush1.bf16.msra.mxu0 %v4972_v28  ;;  %2124 = vmatpush1.bf16.msra.mxu1 %v4974_v29  ;;  %v417_v28 = vld [vmem:[#allocation7 + $0x308] sm:$0xff] }
  0xf8   : > { %2082 = vmatprep.subr.bf16.mxu0 %v4965_v30  ;;  %2125 = vmatprep.subr.bf16.mxu1 %v4967_v31  ;;  %v421_v29 = vld [vmem:[#allocation7 + $0x328] sm:$0xff]  ;;  %v5044_v30 = vcombine.low %v424_v19, %v428_v20  ;;  %v5046_v31 = vcombine.low %v425_v21, %v429_v36  ;;  %v5001_v19 = vcombine.high %v378_v11, %v382_v12  ;;  %v370_v21 = vld [vmem:[#allocation7 + $0x190] sm:$0xff] }
  0xf9   : > { %v5039_v33 = vcombine.high %v417_v28, %v421_v29  ;;  %v374_v36 = vld [vmem:[#allocation7 + $0x1b0] sm:$0xff] }
  0xfb   : > { %2083 = vmatpush1.bf16.msra.mxu0 %v4964_v37  ;;  %2126 = vmatpush1.bf16.msra.mxu1 %v4966_v38  ;;  %v409_v37 = vld [vmem:[#allocation7 + $0x2c8] sm:$0xff] }
  0xfc   : > { %2084 = vmatprep.subr.bf16.mxu0 %v4957_v39  ;;  %2127 = vmatprep.subr.bf16.mxu1 %v4959_v40  ;;  %v413_v38 = vld [vmem:[#allocation7 + $0x2e8] sm:$0xff]  ;;  %v5036_v39 = vcombine.low %v416_v26, %v420_v27  ;;  %v5038_v40 = vcombine.low %v417_v28, %v421_v29  ;;  %v4993_v26 = vcombine.high %v370_v21, %v374_v36  ;;  %v362_v28 = vld [vmem:[#allocation7 + $0x150] sm:$0xff] }
  0xfd   : > { %v5031_v42 = vcombine.high %v409_v37, %v413_v38  ;;  %v366_v29 = vld [vmem:[#allocation7 + $0x170] sm:$0xff] }
  0xff   : > { %2085 = vmatpush1.bf16.msra.mxu0 %v4956_v45  ;;  %2128 = vmatpush1.bf16.msra.mxu1 %v4958_v10  ;;  %v401_v45 = vld [vmem:[#allocation7 + $0x288] sm:$0xff] }
 0x100   : > { %2086 = vmatprep.subr.bf16.mxu0 %v4949_v46  ;;  %2129 = vmatprep.subr.bf16.mxu1 %v4951_v47  ;;  %v405_v10 = vld [vmem:[#allocation7 + $0x2a8] sm:$0xff]  ;;  %v5028_v46 = vcombine.low %v408_v34, %v412_v35  ;;  %v5030_v47 = vcombine.low %v409_v37, %v413_v38  ;;  %v4985_v35 = vcombine.high %v362_v28, %v366_v29  ;;  %v354_v38 = vld [vmem:[#allocation7 + $0x110] sm:$0xff] }
 0x101   : > { %v5023_v49 = vcombine.high %v401_v45, %v405_v10 }
 0x103   : > { %2087 = vmatpush1.bf16.msra.mxu0 %v4948_v52  ;;  %2130 = vmatpush1.bf16.msra.mxu1 %v4950_v53  ;;  %v393_v52 = vld [vmem:[#allocation7 + $0x248] sm:$0xff] }
 0x104   : > { %2088 = vmatprep.subr.bf16.mxu0 %v4941_v55  ;;  %2131 = vmatprep.subr.bf16.mxu1 %v4943_v58  ;;  %v397_v53 = vld [vmem:[#allocation7 + $0x268] sm:$0xff]  ;;  %v5020_v55 = vcombine.low %v400_v43, %v404_v44  ;;  %v5022_v58 = vcombine.low %v401_v45, %v405_v10  ;;  %v4984_v43 = vcombine.low %v362_v28, %v366_v29 }
 0x105   : > { %v5015_v61 = vcombine.high %v393_v52, %v397_v53 }
 0x107   : > { %2089 = vmatpush1.bf16.msra.mxu0 %v4940_v3  ;;  %2132 = vmatpush1.bf16.msra.mxu1 %v4942_v4  ;;  %v385_v3 = vld [vmem:[#allocation7 + $0x208] sm:$0xff] }
 0x108   : > { %2090 = vmatprep.subr.bf16.mxu0 %v5061_v7  ;;  %2133 = vmatprep.subr.bf16.mxu1 %v5063_v8  ;;  %v389_v4 = vld [vmem:[#allocation7 + $0x228] sm:$0xff]  ;;  %v5012_v7 = vcombine.low %v392_v50, %v396_v51  ;;  %v5014_v8 = vcombine.low %v393_v52, %v397_v53 }
 0x109   : > { %v5007_v9 = vcombine.high %v385_v3, %v389_v4 }
 0x10b   : > { %2091 = vmatpush2.bf16.msra.mxu0 %v5060_v13  ;;  %2134 = vmatpush2.bf16.msra.mxu1 %v5062_v14  ;;  %v379_v13 = vld [vmem:[#allocation7 + $0x1d8] sm:$0xff] }
 0x10c   : > { %2092 = vmatprep.subr.bf16.mxu0 %v5053_v15  ;;  %2135 = vmatprep.subr.bf16.mxu1 %v5055_v17  ;;  %v383_v14 = vld [vmem:[#allocation7 + $0x1f8] sm:$0xff]  ;;  %v5004_v15 = vcombine.low %v384_v0, %v388_v1  ;;  %v5006_v17 = vcombine.low %v385_v3, %v389_v4 }
 0x10d   : > { %v5003_v20 = vcombine.high %v379_v13, %v383_v14 }
 0x10f   : > { %2093 = vmatpush2.bf16.msra.mxu0 %v5052_v22  ;;  %2136 = vmatpush2.bf16.msra.mxu1 %v5054_v23  ;;  %v371_v22 = vld [vmem:[#allocation7 + $0x198] sm:$0xff] }
 0x110   : > { %2094 = vmatprep.subr.bf16.mxu0 %v5045_v24  ;;  %2137 = vmatprep.subr.bf16.mxu1 %v5047_v25  ;;  %v375_v23 = vld [vmem:[#allocation7 + $0x1b8] sm:$0xff]  ;;  %v5000_v24 = vcombine.low %v378_v11, %v382_v12  ;;  %v5002_v25 = vcombine.low %v379_v13, %v383_v14 }
 0x111   : > { %v4995_v27 = vcombine.high %v371_v22, %v375_v23  ;;  %v4994_v34 = vcombine.low %v371_v22, %v375_v23 }
 0x113   : > { %2095 = vmatpush2.bf16.msra.mxu0 %v5044_v30  ;;  %2138 = vmatpush2.bf16.msra.mxu1 %v5046_v31  ;;  %v6031_v30 = vld [vmem:[%s5951_s22] ss:$8 sps:$4 sm:$0xff]  }
 0x114   : > { %2096 = vmatprep.subr.bf16.mxu0 %v5037_v32  ;;  %2139 = vmatprep.subr.bf16.mxu1 %v5039_v33  ;;  %v363_v31 = vld [vmem:[#allocation7 + $0x158] sm:$0xff]  ;;  %v4992_v33 = vcombine.low %v370_v21, %v374_v36 }
 0x115   : > { %v367_v32 = vld [vmem:[#allocation7 + $0x178] sm:$0xff] }
 0x116   : > { %v4987_v37 = vcombine.high %v363_v31, %v367_v32  ;;  %v4986_v44 = vcombine.low %v363_v31, %v367_v32 }
 0x117   : > { %2097 = vmatpush2.bf16.msra.mxu0 %v5036_v39  ;;  %2140 = vmatpush2.bf16.msra.mxu1 %v5038_v40  ;;  %v358_v39 = vld [vmem:[#allocation7 + $0x130] sm:$0xff] }
 0x118   : > { %2098 = vmatprep.subr.bf16.mxu0 %v5029_v41  ;;  %2141 = vmatprep.subr.bf16.mxu1 %v5031_v42  ;;  %v6036_v40 = vld [vmem:[%s5951_s22 + $0x4] ss:$8 sps:$4 sm:$0xff]   ;;  %v4977_v45 = vcombine.high %v354_v38, %v358_v39  ;;  %v4976_v50 = vcombine.low %v354_v38, %v358_v39 }
 0x119   : > { %v355_v41 = vld [vmem:[#allocation7 + $0x118] sm:$0xff] }
 0x11a   : > { %v359_v42 = vld [vmem:[#allocation7 + $0x138] sm:$0xff] }
 0x11b   : > { %2099 = vmatpush2.bf16.msra.mxu0 %v5028_v46  ;;  %2142 = vmatpush2.bf16.msra.mxu1 %v5030_v47  ;;  %v4979_v10 = vcombine.high %v355_v41, %v359_v42  ;;  %v346_v46 = vld [vmem:[#allocation7 + $0xd0] sm:$0xff]  ;;  %v4978_v51 = vcombine.low %v355_v41, %v359_v42 }
 0x11c   : > { %2100 = vmatprep.subr.bf16.mxu0 %v5021_v48  ;;  %2143 = vmatprep.subr.bf16.mxu1 %v5023_v49  ;;  %v350_v47 = vld [vmem:[#allocation7 + $0xf0] sm:$0xff]  ;;  %v347_v48 = vld [vmem:[#allocation7 + $0xd8] sm:$0xff] }
 0x11d   : > { %v351_v49 = vld [vmem:[#allocation7 + $0xf8] sm:$0xff]  ;;  %v4969_v52 = vcombine.high %v346_v46, %v350_v47  ;;  %v4968_v0 = vcombine.low %v346_v46, %v350_v47 }
 0x11e   : > { %v4971_v53 = vcombine.high %v347_v48, %v351_v49  ;;  %v4970_v1 = vcombine.low %v347_v48, %v351_v49 }
 0x11f   : > { %2101 = vmatpush2.bf16.msra.mxu0 %v5020_v55  ;;  %2144 = vmatpush2.bf16.msra.mxu1 %v5022_v58  ;;  %v338_v55 = vld [vmem:[#allocation7 + $0x90] sm:$0xff] }
 0x120   : > { %2102 = vmatprep.subr.bf16.mxu0 %v5013_v59  ;;  %2145 = vmatprep.subr.bf16.mxu1 %v5015_v61  ;;  %v342_v58 = vld [vmem:[#allocation7 + $0xb0] sm:$0xff]  ;;  %v339_v59 = vld [vmem:[#allocation7 + $0x98] sm:$0xff] }
 0x121   : > { %v343_v61 = vld [vmem:[#allocation7 + $0xb8] sm:$0xff]  ;;  %v4961_v3 = vcombine.high %v338_v55, %v342_v58  ;;  %v4960_v11 = vcombine.low %v338_v55, %v342_v58 }
 0x122   : > { %v4963_v4 = vcombine.high %v339_v59, %v343_v61  ;;  %v4962_v12 = vcombine.low %v339_v59, %v343_v61 }
 0x123   : > { %2103 = vmatpush2.bf16.msra.mxu0 %v5012_v7  ;;  %2146 = vmatpush2.bf16.msra.mxu1 %v5014_v8  ;;  %v330_v7 = vld [vmem:[#allocation7 + $0x50] sm:$0xff] }
 0x124   : > { %2104 = vmatprep.subr.bf16.mxu0 %v5005_v18  ;;  %2147 = vmatprep.subr.bf16.mxu1 %v5007_v9  ;;  %v334_v8 = vld [vmem:[#allocation7 + $0x70] sm:$0xff]  ;;  %v331_v18 = vld [vmem:[#allocation7 + $0x58] sm:$0xff] }
 0x125   : > { %v335_v9 = vld [vmem:[#allocation7 + $0x78] sm:$0xff]  ;;  %v4953_v13 = vcombine.high %v330_v7, %v334_v8  ;;  %v4952_v21 = vcombine.low %v330_v7, %v334_v8 }
 0x126   : > { %v4955_v14 = vcombine.high %v331_v18, %v335_v9  ;;  %v4954_v36 = vcombine.low %v331_v18, %v335_v9 }
 0x127   : > { %2105 = vmatpush2.bf16.msra.mxu0 %v5004_v15  ;;  %2148 = vmatpush2.bf16.msra.mxu1 %v5006_v17  ;;  %v322_v15 = vld [vmem:[#allocation7 + $0x10] sm:$0xff] }
 0x128   : > { %2160 = vmatprep.subr.bf16.mxu0 %v5001_v19  ;;  %2203 = vmatprep.subr.bf16.mxu1 %v5003_v20  ;;  %v326_v17 = vld [vmem:[#allocation7 + $0x30] sm:$0xff]  ;;  %v323_v19 = vld [vmem:[#allocation7 + $0x18] sm:$0xff] }
 0x129   : > { %v327_v20 = vld [vmem:[#allocation7 + $0x38] sm:$0xff]  ;;  %v4945_v22 = vcombine.high %v322_v15, %v326_v17  ;;  %v4944_v28 = vcombine.low %v322_v15, %v326_v17 }
 0x12a   : > { %2107 = vmatmul.mubr.bf16.vlgmr.msra.gmra.mxu0 %v6031_v30  ;;  %2150 = vmatmul.mubr.bf16.vlgmr.msra.gmra.mxu1 %v6031_v30  ;;  %v4947_v23 = vcombine.high %v323_v19, %v327_v20  ;;  %v4946_v29 = vcombine.low %v323_v19, %v327_v20 }
 0x12b   : > { %2161 = vmatpush1.bf16.msra.mxu0 %v5000_v24  ;;  %2204 = vmatpush1.bf16.msra.mxu1 %v5002_v25  ;;  %v442_v24 = vld [vmem:[#allocation7 + $0x3d0] sm:$0xff] }
 0x12c   : > { %2162 = vmatprep.subr.bf16.mxu0 %v4993_v26  ;;  %2205 = vmatprep.subr.bf16.mxu1 %v4995_v27  ;;  %v446_v25 = vld [vmem:[#allocation7 + $0x3f0] sm:$0xff]  ;;  %v443_v26 = vld [vmem:[#allocation7 + $0x3d8] sm:$0xff] }
 0x12d   : > { %2192 = vmatprep.mubr.bf16.mxu0 %v6036_v40  ;;  %2235 = vmatprep.mubr.bf16.mxu1 %v6036_v40  ;;  %v447_v27 = vld [vmem:[#allocation7 + $0x3f8] sm:$0xff]  ;;  %v5065_v31 = vcombine.high %v442_v24, %v446_v25  ;;  %v5064_v38 = vcombine.low %v442_v24, %v446_v25 }
 0x12e   : > { %v5067_v32 = vcombine.high %v443_v26, %v447_v27  ;;  %v5066_v39 = vcombine.low %v443_v26, %v447_v27 }
 0x12f   : > { %2163 = vmatpush1.bf16.msra.mxu0 %v4992_v33  ;;  %2206 = vmatpush1.bf16.msra.mxu1 %v4994_v34  ;;  %v434_v33 = vld [vmem:[#allocation7 + $0x390] sm:$0xff] }
 0x130   : > { %2164 = vmatprep.subr.bf16.mxu0 %v4985_v35  ;;  %2207 = vmatprep.subr.bf16.mxu1 %v4987_v37  ;;  %v438_v34 = vld [vmem:[#allocation7 + $0x3b0] sm:$0xff]  ;;  %v435_v35 = vld [vmem:[#allocation7 + $0x398] sm:$0xff] }
 0x131   : > { %v439_v37 = vld [vmem:[#allocation7 + $0x3b8] sm:$0xff]  ;;  %v5057_v41 = vcombine.high %v434_v33, %v438_v34  ;;  %v5056_v46 = vcombine.low %v434_v33, %v438_v34 }
 0x132   : > { %v5059_v42 = vcombine.high %v435_v35, %v439_v37  ;;  %v5058_v47 = vcombine.low %v435_v35, %v439_v37 }
 0x133   : > { %2165 = vmatpush1.bf16.msra.mxu0 %v4984_v43  ;;  %2208 = vmatpush1.bf16.msra.mxu1 %v4986_v44  ;;  %v426_v43 = vld [vmem:[#allocation7 + $0x350] sm:$0xff] }
 0x134   : > { %2166 = vmatprep.subr.bf16.mxu0 %v4977_v45  ;;  %2209 = vmatprep.subr.bf16.mxu1 %v4979_v10  ;;  %v430_v44 = vld [vmem:[#allocation7 + $0x370] sm:$0xff]  ;;  %v427_v45 = vld [vmem:[#allocation7 + $0x358] sm:$0xff] }
 0x135   : > { %v431_v10 = vld [vmem:[#allocation7 + $0x378] sm:$0xff]  ;;  %v5049_v48 = vcombine.high %v426_v43, %v430_v44  ;;  %v5048_v55 = vcombine.low %v426_v43, %v430_v44 }
 0x136   : > { %v5051_v49 = vcombine.high %v427_v45, %v431_v10  ;;  %v5050_v58 = vcombine.low %v427_v45, %v431_v10 }
 0x137   : > { %2167 = vmatpush1.bf16.msra.mxu0 %v4976_v50  ;;  %2210 = vmatpush1.bf16.msra.mxu1 %v4978_v51  ;;  %v418_v50 = vld [vmem:[#allocation7 + $0x310] sm:$0xff] }
 0x138   : > { %2168 = vmatprep.subr.bf16.mxu0 %v4969_v52  ;;  %2211 = vmatprep.subr.bf16.mxu1 %v4971_v53  ;;  %v422_v51 = vld [vmem:[#allocation7 + $0x330] sm:$0xff]  ;;  %v419_v52 = vld [vmem:[#allocation7 + $0x318] sm:$0xff] }
 0x139   : > { %v423_v53 = vld [vmem:[#allocation7 + $0x338] sm:$0xff]  ;;  %v5041_v59 = vcombine.high %v418_v50, %v422_v51  ;;  %v5040_v7 = vcombine.low %v418_v50, %v422_v51  ;;  %v2247_v50 = vrot.slane %v6036_v40, 1  ;;  %v2249_v51 = vrot.slane %v5980_v60, 1 }
 0x13a   : > { %v5043_v61 = vcombine.high %v419_v52, %v423_v53  ;;  %v5042_v8 = vcombine.low %v419_v52, %v423_v53 }
 0x13b   : > { %2169 = vmatpush1.bf16.msra.mxu0 %v4968_v0  ;;  %2212 = vmatpush1.bf16.msra.mxu1 %v4970_v1  ;;  %v410_v0 = vld [vmem:[#allocation7 + $0x2d0] sm:$0xff] }
 0x13c   : > { %2170 = vmatprep.subr.bf16.mxu0 %v4961_v3  ;;  %2213 = vmatprep.subr.bf16.mxu1 %v4963_v4  ;;  %v414_v1 = vld [vmem:[#allocation7 + $0x2f0] sm:$0xff]  ;;  %v411_v3 = vld [vmem:[#allocation7 + $0x2d8] sm:$0xff] }
 0x13d   : > { %v415_v4 = vld [vmem:[#allocation7 + $0x2f8] sm:$0xff]  ;;  %v5033_v18 = vcombine.high %v410_v0, %v414_v1  ;;  %v5032_v15 = vcombine.low %v410_v0, %v414_v1  ;;  %v2300_v0 = vld [vmem:[#allocation7 + $0x948] sm:$0xff] }
 0x13e   : > { %v5035_v9 = vcombine.high %v411_v3, %v415_v4  ;;  %v5034_v17 = vcombine.low %v411_v3, %v415_v4  ;;  %v2304_v1 = vld [vmem:[#allocation7 + $0x968] sm:$0xff]  ;;  %v6044_v3 = vsel %vm2250_vm3, %v2247_v50, %v2249_v51 }
 0x13f   : > { %2171 = vmatpush1.bf16.msra.mxu0 %v4960_v11  ;;  %2214 = vmatpush1.bf16.msra.mxu1 %v4962_v12  ;;  %v402_v11 = vld [vmem:[#allocation7 + $0x290] sm:$0xff] }
 0x140   : > { %2172 = vmatprep.subr.bf16.mxu0 %v4953_v13  ;;  %2215 = vmatprep.subr.bf16.mxu1 %v4955_v14  ;;  %v406_v12 = vld [vmem:[#allocation7 + $0x2b0] sm:$0xff]  ;;  %v403_v13 = vld [vmem:[#allocation7 + $0x298] sm:$0xff] }
 0x141   : > { %v407_v14 = vld [vmem:[#allocation7 + $0x2b8] sm:$0xff]  ;;  %v5025_v19 = vcombine.high %v402_v11, %v406_v12  ;;  %v5024_v24 = vcombine.low %v402_v11, %v406_v12  ;;  %v2292_v11 = vld [vmem:[#allocation7 + $0x908] sm:$0xff] }
 0x142   : > { %v5027_v20 = vcombine.high %v403_v13, %v407_v14  ;;  %v5026_v25 = vcombine.low %v403_v13, %v407_v14  ;;  %v2296_v12 = vld [vmem:[#allocation7 + $0x928] sm:$0xff]  ;;  %v5110_v14 = vcombine.low %v2300_v0, %v2304_v1 }
 0x143   : > { %2173 = vmatpush1.bf16.msra.mxu0 %v4952_v21  ;;  %2216 = vmatpush1.bf16.msra.mxu1 %v4954_v36  ;;  %v394_v21 = vld [vmem:[#allocation7 + $0x250] sm:$0xff] }
 0x144   : > { %2174 = vmatprep.subr.bf16.mxu0 %v4945_v22  ;;  %2217 = vmatprep.subr.bf16.mxu1 %v4947_v23  ;;  %v398_v36 = vld [vmem:[#allocation7 + $0x270] sm:$0xff]  ;;  %v395_v22 = vld [vmem:[#allocation7 + $0x258] sm:$0xff] }
 0x145   : > { %v399_v23 = vld [vmem:[#allocation7 + $0x278] sm:$0xff]  ;;  %v5017_v26 = vcombine.high %v394_v21, %v398_v36  ;;  %v5016_v33 = vcombine.low %v394_v21, %v398_v36  ;;  %v2284_v21 = vld [vmem:[#allocation7 + $0x8c8] sm:$0xff] }
 0x146   : > { %v5019_v27 = vcombine.high %v395_v22, %v399_v23  ;;  %v5018_v34 = vcombine.low %v395_v22, %v399_v23  ;;  %v2288_v36 = vld [vmem:[#allocation7 + $0x8e8] sm:$0xff]  ;;  %v5102_v23 = vcombine.low %v2292_v11, %v2296_v12 }
 0x147   : > { %2175 = vmatpush1.bf16.msra.mxu0 %v4944_v28  ;;  %2218 = vmatpush1.bf16.msra.mxu1 %v4946_v29  ;;  %v386_v28 = vld [vmem:[#allocation7 + $0x210] sm:$0xff] }
 0x148   : > { %2176 = vmatprep.subr.bf16.mxu0 %v5065_v31  ;;  %2219 = vmatprep.subr.bf16.mxu1 %v5067_v32  ;;  %v390_v29 = vld [vmem:[#allocation7 + $0x230] sm:$0xff]  ;;  %v387_v31 = vld [vmem:[#allocation7 + $0x218] sm:$0xff] }
 0x149   : > { %v391_v32 = vld [vmem:[#allocation7 + $0x238] sm:$0xff]  ;;  %v5009_v35 = vcombine.high %v386_v28, %v390_v29  ;;  %v5008_v43 = vcombine.low %v386_v28, %v390_v29  ;;  %v2276_v28 = vld [vmem:[#allocation7 + $0x888] sm:$0xff] }
 0x14a   : > { %v5011_v37 = vcombine.high %v387_v31, %v391_v32  ;;  %v5010_v44 = vcombine.low %v387_v31, %v391_v32  ;;  %v2280_v29 = vld [vmem:[#allocation7 + $0x8a8] sm:$0xff]  ;;  %v5094_v32 = vcombine.low %v2284_v21, %v2288_v36 }
 0x14b   : > { %2177 = vmatpush2.bf16.msra.mxu0 %v5064_v38  ;;  %2220 = vmatpush2.bf16.msra.mxu1 %v5066_v39  ;;  %v2315_v38 = vld [vmem:[#allocation7 + $0x9c0] sm:$0xff] }
 0x14c   : > { %2178 = vmatprep.subr.bf16.mxu0 %v5057_v41  ;;  %2221 = vmatprep.subr.bf16.mxu1 %v5059_v42  ;;  %v2319_v39 = vld [vmem:[#allocation7 + $0x9e0] sm:$0xff]  ;;  %v2316_v41 = vld [vmem:[#allocation7 + $0x9c8] sm:$0xff] }
 0x14d   : > { %v2320_v42 = vld [vmem:[#allocation7 + $0x9e8] sm:$0xff]  ;;  %v5125_v45 = vcombine.high %v2315_v38, %v2319_v39  ;;  %v5124_v52 = vcombine.low %v2315_v38, %v2319_v39 }
 0x14e   : > { %v5127_v10 = vcombine.high %v2316_v41, %v2320_v42  ;;  %v5126_v53 = vcombine.low %v2316_v41, %v2320_v42  ;;  %v2268_v38 = vld [vmem:[#allocation7 + $0x848] sm:$0xff]  ;;  %v5086_v42 = vcombine.low %v2276_v28, %v2280_v29 }
 0x14f   : > { %2179 = vmatpush2.bf16.msra.mxu0 %v5056_v46  ;;  %2222 = vmatpush2.bf16.msra.mxu1 %v5058_v47  ;;  %v2307_v46 = vld [vmem:[#allocation7 + $0x980] sm:$0xff]  ;;  %v2272_v39 = vld [vmem:[#allocation7 + $0x868] sm:$0xff] }
 0x150   : > { %2180 = vmatprep.subr.bf16.mxu0 %v5049_v48  ;;  %2223 = vmatprep.subr.bf16.mxu1 %v5051_v49  ;;  %v2311_v47 = vld [vmem:[#allocation7 + $0x9a0] sm:$0xff]  ;;  %v2308_v48 = vld [vmem:[#allocation7 + $0x988] sm:$0xff] }
 0x151   : > { %v2312_v49 = vld [vmem:[#allocation7 + $0x9a8] sm:$0xff]  ;;  %v5116_v40 = vcombine.low %v2307_v46, %v2311_v47 }
 0x152   : > { %v5118_v4 = vcombine.low %v2308_v48, %v2312_v49 }
 0x153   : > { %2181 = vmatpush2.bf16.msra.mxu0 %v5048_v55  ;;  %2224 = vmatpush2.bf16.msra.mxu1 %v5050_v58  ;;  %v5117_v55 = vcombine.high %v2307_v46, %v2311_v47  ;;  %v5119_v58 = vcombine.high %v2308_v48, %v2312_v49  ;;  %v2260_v46 = vld [vmem:[#allocation7 + $0x808] sm:$0xff]  ;;  %v5078_v49 = vcombine.low %v2268_v38, %v2272_v39 }
 0x154   : > { %2182 = vmatprep.subr.bf16.mxu0 %v5041_v59  ;;  %2225 = vmatprep.subr.bf16.mxu1 %v5043_v61  ;;  %v2299_v59 = vld [vmem:[#allocation7 + $0x940] sm:$0xff]  ;;  %v2264_v47 = vld [vmem:[#allocation7 + $0x828] sm:$0xff] }
 0x155   : > { %v2303_v61 = vld [vmem:[#allocation7 + $0x960] sm:$0xff]  ;;  %v5071_v51 = vcombine.high %v2260_v46, %v2264_v47 }
 0x156   : > { %v5108_v13 = vcombine.low %v2299_v59, %v2303_v61 }
 0x157   : > { %2183 = vmatpush2.bf16.msra.mxu0 %v5040_v7  ;;  %2226 = vmatpush2.bf16.msra.mxu1 %v5042_v8  ;;  %v5109_v7 = vcombine.high %v2299_v59, %v2303_v61  ;;  %v5111_v8 = vcombine.high %v2300_v0, %v2304_v1  ;;  %v5070_v61 = vcombine.low %v2260_v46, %v2264_v47 }
 0x158   : > { %2184 = vmatprep.subr.bf16.mxu0 %v5033_v18  ;;  %2227 = vmatprep.subr.bf16.mxu1 %v5035_v9  ;;  %v2291_v18 = vld [vmem:[#allocation7 + $0x900] sm:$0xff] }
 0x159   : > { %v2295_v9 = vld [vmem:[#allocation7 + $0x920] sm:$0xff] }
 0x15a   : > { %v5100_v22 = vcombine.low %v2291_v18, %v2295_v9 }
 0x15b   : > { %2185 = vmatpush2.bf16.msra.mxu0 %v5032_v15  ;;  %2228 = vmatpush2.bf16.msra.mxu1 %v5034_v17  ;;  %v5101_v15 = vcombine.high %v2291_v18, %v2295_v9  ;;  %v5103_v17 = vcombine.high %v2292_v11, %v2296_v12 }
 0x15c   : > { %2186 = vmatprep.subr.bf16.mxu0 %v5025_v19  ;;  %2229 = vmatprep.subr.bf16.mxu1 %v5027_v20  ;;  %v2283_v19 = vld [vmem:[#allocation7 + $0x8c0] sm:$0xff] }
 0x15d   : > { %v2287_v20 = vld [vmem:[#allocation7 + $0x8e0] sm:$0xff] }
 0x15e   : > { %v5092_v31 = vcombine.low %v2283_v19, %v2287_v20 }
 0x15f   : > { %2187 = vmatpush2.bf16.msra.mxu0 %v5024_v24  ;;  %2230 = vmatpush2.bf16.msra.mxu1 %v5026_v25  ;;  %v5093_v24 = vcombine.high %v2283_v19, %v2287_v20  ;;  %v5095_v25 = vcombine.high %v2284_v21, %v2288_v36 }
 0x160   : > { %2188 = vmatprep.subr.bf16.mxu0 %v5017_v26  ;;  %2231 = vmatprep.subr.bf16.mxu1 %v5019_v27  ;;  %v2275_v26 = vld [vmem:[#allocation7 + $0x880] sm:$0xff] }
 0x161   : > { %v2279_v27 = vld [vmem:[#allocation7 + $0x8a0] sm:$0xff] }
 0x162   : > { %v5084_v41 = vcombine.low %v2275_v26, %v2279_v27 }
 0x163   : > { %2189 = vmatpush2.bf16.msra.mxu0 %v5016_v33  ;;  %2232 = vmatpush2.bf16.msra.mxu1 %v5018_v34  ;;  %v5085_v33 = vcombine.high %v2275_v26, %v2279_v27  ;;  %v5087_v34 = vcombine.high %v2276_v28, %v2280_v29 }
 0x164   : > { %2190 = vmatprep.subr.bf16.mxu0 %v5009_v35  ;;  %2233 = vmatprep.subr.bf16.mxu1 %v5011_v37  ;;  %v2267_v35 = vld [vmem:[#allocation7 + $0x840] sm:$0xff] }
 0x165   : > { %v2271_v37 = vld [vmem:[#allocation7 + $0x860] sm:$0xff] }
 0x166   : > { %v5076_v48 = vcombine.low %v2267_v35, %v2271_v37 }
 0x167   : > { %2191 = vmatpush2.bf16.msra.mxu0 %v5008_v43  ;;  %2234 = vmatpush2.bf16.msra.mxu1 %v5010_v44  ;;  %v5077_v43 = vcombine.high %v2267_v35, %v2271_v37  ;;  %v5079_v44 = vcombine.high %v2268_v38, %v2272_v39 }
 0x168   : > { %3027 = vmatprep.subr.bf16.mxu0 %v5125_v45  ;;  %3070 = vmatprep.subr.bf16.mxu1 %v5127_v10  ;;  %v2259_v45 = vld [vmem:[#allocation7 + $0x800] sm:$0xff] }
 0x169   : > { %v2263_v10 = vld [vmem:[#allocation7 + $0x820] sm:$0xff] }
 0x16a   : > { %2193 = vmatmul.mubr.bf16.vlgmr.msra.gmra.mxu0 %v6031_v30  ;;  %2236 = vmatmul.mubr.bf16.vlgmr.msra.gmra.mxu1 %v6031_v30  ;;  %v5069_v50 = vcombine.high %v2259_v45, %v2263_v10  ;;  %v5068_v59 = vcombine.low %v2259_v45, %v2263_v10 }
 0x16b   : > { %3028 = vmatpush1.bf16.msra.mxu0 %v5124_v52  ;;  %3071 = vmatpush1.bf16.msra.mxu1 %v5126_v53  ;;  %v2379_v52 = vld [vmem:[#allocation7 + $0xbc0] sm:$0xff] }
 0x16c   : > { %3029 = vmatprep.subr.bf16.mxu0 %v5117_v55  ;;  %3072 = vmatprep.subr.bf16.mxu1 %v5119_v58  ;;  %v2383_v53 = vld [vmem:[#allocation7 + $0xbe0] sm:$0xff]  ;;  %v2380_v55 = vld [vmem:[#allocation7 + $0xbc8] sm:$0xff] }
 0x16d   : > { %3059 = vmatprep.mubr.bf16.mxu0 %v6044_v3  ;;  %3102 = vmatprep.mubr.bf16.mxu1 %v6044_v3  ;;  %v2384_v58 = vld [vmem:[#allocation7 + $0xbe8] sm:$0xff]  ;;  %v5189_v0 = vcombine.high %v2379_v52, %v2383_v53  ;;  %v5188_v18 = vcombine.low %v2379_v52, %v2383_v53 }
 0x16e   : > { %v5191_v1 = vcombine.high %v2380_v55, %v2384_v58  ;;  %v5190_v9 = vcombine.low %v2380_v55, %v2384_v58 }
 0x16f   : > { %3030 = vmatpush1.bf16.msra.mxu0 %v5116_v40  ;;  %3073 = vmatpush1.bf16.msra.mxu1 %v5118_v4  ;;  %v2371_v40 = vld [vmem:[#allocation7 + $0xb80] sm:$0xff] }
 0x170   : > { %3031 = vmatprep.subr.bf16.mxu0 %v5109_v7  ;;  %3074 = vmatprep.subr.bf16.mxu1 %v5111_v8  ;;  %v2375_v4 = vld [vmem:[#allocation7 + $0xba0] sm:$0xff]  ;;  %v2372_v7 = vld [vmem:[#allocation7 + $0xb88] sm:$0xff] }
 0x171   : > { %v2376_v8 = vld [vmem:[#allocation7 + $0xba8] sm:$0xff]  ;;  %v5181_v11 = vcombine.high %v2371_v40, %v2375_v4  ;;  %v5180_v19 = vcombine.low %v2371_v40, %v2375_v4 }
 0x172   : > { %v5183_v12 = vcombine.high %v2372_v7, %v2376_v8  ;;  %v5182_v20 = vcombine.low %v2372_v7, %v2376_v8 }
 0x173   : > { %3032 = vmatpush1.bf16.msra.mxu0 %v5108_v13  ;;  %3075 = vmatpush1.bf16.msra.mxu1 %v5110_v14  ;;  %v2363_v13 = vld [vmem:[#allocation7 + $0xb40] sm:$0xff] }
 0x174   : > { %3033 = vmatprep.subr.bf16.mxu0 %v5101_v15  ;;  %3076 = vmatprep.subr.bf16.mxu1 %v5103_v17  ;;  %v2367_v14 = vld [vmem:[#allocation7 + $0xb60] sm:$0xff]  ;;  %v2364_v15 = vld [vmem:[#allocation7 + $0xb48] sm:$0xff] }
 0x175   : > { %v2368_v17 = vld [vmem:[#allocation7 + $0xb68] sm:$0xff]  ;;  %v5173_v21 = vcombine.high %v2363_v13, %v2367_v14  ;;  %v5172_v26 = vcombine.low %v2363_v13, %v2367_v14  ;;  %v2246_v14 = vrot.slane %v6031_v30, 1 }
 0x176   : > { %v5175_v36 = vcombine.high %v2364_v15, %v2368_v17  ;;  %v5174_v27 = vcombine.low %v2364_v15, %v2368_v17  ;;  %v2248_v15 = vrot.slane %v6008_v6, 1 }
 0x177   : > { %3034 = vmatpush1.bf16.msra.mxu0 %v5100_v22  ;;  %3077 = vmatpush1.bf16.msra.mxu1 %v5102_v23  ;;  %v2355_v22 = vld [vmem:[#allocation7 + $0xb00] sm:$0xff] }
 0x178   : > { %3035 = vmatprep.subr.bf16.mxu0 %v5093_v24  ;;  %3078 = vmatprep.subr.bf16.mxu1 %v5095_v25  ;;  %v2359_v23 = vld [vmem:[#allocation7 + $0xb20] sm:$0xff]  ;;  %v2356_v24 = vld [vmem:[#allocation7 + $0xb08] sm:$0xff] }
 0x179   : > { %v2360_v25 = vld [vmem:[#allocation7 + $0xb28] sm:$0xff]  ;;  %v5165_v28 = vcombine.high %v2355_v22, %v2359_v23  ;;  %v5164_v35 = vcombine.low %v2355_v22, %v2359_v23  ;;  %v2310_v22 = vld [vmem:[#allocation7 + $0x998] sm:$0xff] }
 0x17a   : > { %v5167_v29 = vcombine.high %v2356_v24, %v2360_v25  ;;  %v5166_v37 = vcombine.low %v2356_v24, %v2360_v25  ;;  %v2314_v23 = vld [vmem:[#allocation7 + $0x9b8] sm:$0xff]  ;;  %v6052_v24 = vsel %vm2250_vm3, %v2246_v14, %v2248_v15  ;;  %v2261_v14 = vld [vmem:[#allocation7 + $0x810] sm:$0xff] }
 0x17b   : > { %3036 = vmatpush1.bf16.msra.mxu0 %v5092_v31  ;;  %3079 = vmatpush1.bf16.msra.mxu1 %v5094_v32  ;;  %v2347_v31 = vld [vmem:[#allocation7 + $0xac0] sm:$0xff]  ;;  %v2265_v15 = vld [vmem:[#allocation7 + $0x830] sm:$0xff] }
 0x17c   : > { %3037 = vmatprep.subr.bf16.mxu0 %v5085_v33  ;;  %3080 = vmatprep.subr.bf16.mxu1 %v5087_v34  ;;  %v2351_v32 = vld [vmem:[#allocation7 + $0xae0] sm:$0xff]  ;;  %v2348_v33 = vld [vmem:[#allocation7 + $0xac8] sm:$0xff] }
 0x17d   : > { %v2352_v34 = vld [vmem:[#allocation7 + $0xae8] sm:$0xff]  ;;  %v5157_v38 = vcombine.high %v2347_v31, %v2351_v32  ;;  %v5156_v45 = vcombine.low %v2347_v31, %v2351_v32  ;;  %v2302_v31 = vld [vmem:[#allocation7 + $0x958] sm:$0xff] }
 0x17e   : > { %v5159_v39 = vcombine.high %v2348_v33, %v2352_v34  ;;  %v5158_v10 = vcombine.low %v2348_v33, %v2352_v34  ;;  %v2306_v32 = vld [vmem:[#allocation7 + $0x978] sm:$0xff]  ;;  %v5122_v34 = vcombine.low %v2310_v22, %v2314_v23 }
 0x17f   : > { %3038 = vmatpush1.bf16.msra.mxu0 %v5084_v41  ;;  %3081 = vmatpush1.bf16.msra.mxu1 %v5086_v42  ;;  %v2339_v41 = vld [vmem:[#allocation7 + $0xa80] sm:$0xff] }
 0x180   : > { %3039 = vmatprep.subr.bf16.mxu0 %v5077_v43  ;;  %3082 = vmatprep.subr.bf16.mxu1 %v5079_v44  ;;  %v2343_v42 = vld [vmem:[#allocation7 + $0xaa0] sm:$0xff]  ;;  %v2340_v43 = vld [vmem:[#allocation7 + $0xa88] sm:$0xff] }
 0x181   : > { %v2344_v44 = vld [vmem:[#allocation7 + $0xaa8] sm:$0xff]  ;;  %v5149_v46 = vcombine.high %v2339_v41, %v2343_v42  ;;  %v5148_v52 = vcombine.low %v2339_v41, %v2343_v42  ;;  %v2294_v41 = vld [vmem:[#allocation7 + $0x918] sm:$0xff] }
 0x182   : > { %v5151_v47 = vcombine.high %v2340_v43, %v2344_v44  ;;  %v5150_v53 = vcombine.low %v2340_v43, %v2344_v44  ;;  %v2298_v42 = vld [vmem:[#allocation7 + $0x938] sm:$0xff]  ;;  %v5114_v44 = vcombine.low %v2302_v31, %v2306_v32 }
 0x183   : > { %3040 = vmatpush1.bf16.msra.mxu0 %v5076_v48  ;;  %3083 = vmatpush1.bf16.msra.mxu1 %v5078_v49  ;;  %v2331_v48 = vld [vmem:[#allocation7 + $0xa40] sm:$0xff] }
 0x184   : > { %3041 = vmatprep.subr.bf16.mxu0 %v5069_v50  ;;  %3084 = vmatprep.subr.bf16.mxu1 %v5071_v51  ;;  %v2335_v49 = vld [vmem:[#allocation7 + $0xa60] sm:$0xff]  ;;  %v2332_v50 = vld [vmem:[#allocation7 + $0xa48] sm:$0xff] }
 0x185   : > { %v2336_v51 = vld [vmem:[#allocation7 + $0xa68] sm:$0xff]  ;;  %v5141_v55 = vcombine.high %v2331_v48, %v2335_v49  ;;  %v5140_v40 = vcombine.low %v2331_v48, %v2335_v49  ;;  %v2286_v48 = vld [vmem:[#allocation7 + $0x8d8] sm:$0xff] }
 0x186   : > { %v5143_v58 = vcombine.high %v2332_v50, %v2336_v51  ;;  %v5142_v4 = vcombine.low %v2332_v50, %v2336_v51  ;;  %v2290_v49 = vld [vmem:[#allocation7 + $0x8f8] sm:$0xff]  ;;  %v5106_v51 = vcombine.low %v2294_v41, %v2298_v42 }
 0x187   : > { %3042 = vmatpush1.bf16.msra.mxu0 %v5068_v59  ;;  %3085 = vmatpush1.bf16.msra.mxu1 %v5070_v61  ;;  %v2323_v59 = vld [vmem:[#allocation7 + $0xa00] sm:$0xff] }
 0x188   : > { %3043 = vmatprep.subr.bf16.mxu0 %v5189_v0  ;;  %3086 = vmatprep.subr.bf16.mxu1 %v5191_v1  ;;  %v2327_v61 = vld [vmem:[#allocation7 + $0xa20] sm:$0xff]  ;;  %v2324_v0 = vld [vmem:[#allocation7 + $0xa08] sm:$0xff] }
 0x189   : > { %v2328_v1 = vld [vmem:[#allocation7 + $0xa28] sm:$0xff]  ;;  %v5133_v7 = vcombine.high %v2323_v59, %v2327_v61  ;;  %v5132_v13 = vcombine.low %v2323_v59, %v2327_v61  ;;  %v2282_v59 = vld [vmem:[#allocation7 + $0x8b8] sm:$0xff] }
 0x18a   : > { %v5135_v8 = vcombine.high %v2324_v0, %v2328_v1  ;;  %v5134_v17 = vcombine.low %v2324_v0, %v2328_v1  ;;  %v5098_v0 = vcombine.low %v2286_v48, %v2290_v49 }
 0x18b   : > { %3044 = vmatpush2.bf16.msra.mxu0 %v5188_v18  ;;  %3087 = vmatpush2.bf16.msra.mxu1 %v5190_v9  ;;  %v2317_v18 = vld [vmem:[#allocation7 + $0x9d0] sm:$0xff] }
 0x18c   : > { %3045 = vmatprep.subr.bf16.mxu0 %v5181_v11  ;;  %3088 = vmatprep.subr.bf16.mxu1 %v5183_v12  ;;  %v2321_v9 = vld [vmem:[#allocation7 + $0x9f0] sm:$0xff]  ;;  %v2318_v11 = vld [vmem:[#allocation7 + $0x9d8] sm:$0xff] }
 0x18d   : > { %v2322_v12 = vld [vmem:[#allocation7 + $0x9f8] sm:$0xff]  ;;  %v5128_v25 = vcombine.low %v2317_v18, %v2321_v9 }
 0x18e   : > { %v5130_v30 = vcombine.low %v2318_v11, %v2322_v12 }
 0x18f   : > { %3046 = vmatpush2.bf16.msra.mxu0 %v5180_v19  ;;  %3089 = vmatpush2.bf16.msra.mxu1 %v5182_v20  ;;  %v5129_v19 = vcombine.high %v2317_v18, %v2321_v9  ;;  %v5131_v20 = vcombine.high %v2318_v11, %v2322_v12  ;;  %v2274_v18 = vld [vmem:[#allocation7 + $0x878] sm:$0xff] }
 0x190   : > { %3047 = vmatprep.subr.bf16.mxu0 %v5173_v21  ;;  %3090 = vmatprep.subr.bf16.mxu1 %v5175_v36  ;;  %v2309_v21 = vld [vmem:[#allocation7 + $0x990] sm:$0xff] }
 0x191   : > { %v2313_v36 = vld [vmem:[#allocation7 + $0x9b0] sm:$0xff] }
 0x192   : > { %v5120_v33 = vcombine.low %v2309_v21, %v2313_v36 }
 0x193   : > { %3048 = vmatpush2.bf16.msra.mxu0 %v5172_v26  ;;  %3091 = vmatpush2.bf16.msra.mxu1 %v5174_v27  ;;  %v5121_v26 = vcombine.high %v2309_v21, %v2313_v36  ;;  %v5123_v27 = vcombine.high %v2310_v22, %v2314_v23  ;;  %v5073_v36 = vcombine.high %v2261_v14, %v2265_v15  ;;  %v2381_v23 = vld [vmem:[#allocation7 + $0xbd0] sm:$0xff] }
 0x194   : > { %3049 = vmatprep.subr.bf16.mxu0 %v5165_v28  ;;  %3092 = vmatprep.subr.bf16.mxu1 %v5167_v29  ;;  %v2301_v28 = vld [vmem:[#allocation7 + $0x950] sm:$0xff] }
 0x195   : > { %v2305_v29 = vld [vmem:[#allocation7 + $0x970] sm:$0xff] }
 0x196   : > { %v5112_v43 = vcombine.low %v2301_v28, %v2305_v29 }
 0x197   : > { %3050 = vmatpush2.bf16.msra.mxu0 %v5164_v35  ;;  %3093 = vmatpush2.bf16.msra.mxu1 %v5166_v37  ;;  %v5113_v35 = vcombine.high %v2301_v28, %v2305_v29  ;;  %v5115_v37 = vcombine.high %v2302_v31, %v2306_v32  ;;  %v2373_v32 = vld [vmem:[#allocation7 + $0xb90] sm:$0xff] }
 0x198   : > { %3051 = vmatprep.subr.bf16.mxu0 %v5157_v38  ;;  %3094 = vmatprep.subr.bf16.mxu1 %v5159_v39  ;;  %v2293_v38 = vld [vmem:[#allocation7 + $0x910] sm:$0xff] }
 0x199   : > { %v2297_v39 = vld [vmem:[#allocation7 + $0x930] sm:$0xff] }
 0x19a   : > { %v5104_v50 = vcombine.low %v2293_v38, %v2297_v39 }
 0x19b   : > { %3052 = vmatpush2.bf16.msra.mxu0 %v5156_v45  ;;  %3095 = vmatpush2.bf16.msra.mxu1 %v5158_v10  ;;  %v5105_v45 = vcombine.high %v2293_v38, %v2297_v39  ;;  %v5107_v10 = vcombine.high %v2294_v41, %v2298_v42  ;;  %v2365_v42 = vld [vmem:[#allocation7 + $0xb50] sm:$0xff] }
 0x19c   : > { %3053 = vmatprep.subr.bf16.mxu0 %v5149_v46  ;;  %3096 = vmatprep.subr.bf16.mxu1 %v5151_v47  ;;  %v2285_v46 = vld [vmem:[#allocation7 + $0x8d0] sm:$0xff] }
 0x19d   : > { %v2289_v47 = vld [vmem:[#allocation7 + $0x8f0] sm:$0xff] }
 0x19e   : > { %v5096_v61 = vcombine.low %v2285_v46, %v2289_v47 }
 0x19f   : > { %3054 = vmatpush2.bf16.msra.mxu0 %v5148_v52  ;;  %3097 = vmatpush2.bf16.msra.mxu1 %v5150_v53  ;;  %v5097_v52 = vcombine.high %v2285_v46, %v2289_v47  ;;  %v2277_v53 = vld [vmem:[#allocation7 + $0x890] sm:$0xff] }
 0x1a0   : > { %3055 = vmatprep.subr.bf16.mxu0 %v5141_v55  ;;  %3098 = vmatprep.subr.bf16.mxu1 %v5143_v58  ;;  %v2281_v55 = vld [vmem:[#allocation7 + $0x8b0] sm:$0xff]  ;;  %v2278_v58 = vld [vmem:[#allocation7 + $0x898] sm:$0xff] }
 0x1a1   : > { %v5089_v1 = vcombine.high %v2277_v53, %v2281_v55  ;;  %v5088_v9 = vcombine.low %v2277_v53, %v2281_v55  ;;  %v5090_v11 = vcombine.low %v2278_v58, %v2282_v59 }
 0x1a3   : > { %3056 = vmatpush2.bf16.msra.mxu0 %v5140_v40  ;;  %3099 = vmatpush2.bf16.msra.mxu1 %v5142_v4  ;;  %v5091_v40 = vcombine.high %v2278_v58, %v2282_v59  ;;  %v2269_v4 = vld [vmem:[#allocation7 + $0x850] sm:$0xff] }
 0x1a4   : > { %3057 = vmatprep.subr.bf16.mxu0 %v5133_v7  ;;  %3100 = vmatprep.subr.bf16.mxu1 %v5135_v8  ;;  %v2273_v7 = vld [vmem:[#allocation7 + $0x870] sm:$0xff]  ;;  %v2270_v8 = vld [vmem:[#allocation7 + $0x858] sm:$0xff] }
 0x1a5   : > { %v5081_v12 = vcombine.high %v2269_v4, %v2273_v7  ;;  %v5082_v21 = vcombine.low %v2270_v8, %v2274_v18  ;;  %v2349_v59 = vld [vmem:[#allocation7 + $0xad0] sm:$0xff] }
 0x1a7   : > { %3058 = vmatpush2.bf16.msra.mxu0 %v5132_v13  ;;  %3101 = vmatpush2.bf16.msra.mxu1 %v5134_v17  ;;  %v5083_v13 = vcombine.high %v2270_v8, %v2274_v18  ;;  %v2262_v17 = vld [vmem:[#allocation7 + $0x818] sm:$0xff]  ;;  %v2341_v18 = vld [vmem:[#allocation7 + $0xa90] sm:$0xff] }
 0x1a8   : > { %3113 = vmatprep.subr.bf16.mxu0 %v5129_v19  ;;  %3156 = vmatprep.subr.bf16.mxu1 %v5131_v20  ;;  %v2266_v19 = vld [vmem:[#allocation7 + $0x838] sm:$0xff]  ;;  %v5080_v20 = vcombine.low %v2269_v4, %v2273_v7 }
 0x1a9   : > { %v5075_v22 = vcombine.high %v2262_v17, %v2266_v19  ;;  %v5074_v28 = vcombine.low %v2262_v17, %v2266_v19  ;;  %v2333_v19 = vld [vmem:[#allocation7 + $0xa50] sm:$0xff] }
 0x1aa   : > { %3060 = vmatmul.mubr.bf16.vlgmr.msra.gmra.mxu0 %v6052_v24  ;;  %3103 = vmatmul.mubr.bf16.vlgmr.msra.gmra.mxu1 %v6052_v24 }
 0x1ab   : > { %3114 = vmatpush1.bf16.msra.mxu0 %v5128_v25  ;;  %3157 = vmatpush1.bf16.msra.mxu1 %v5130_v30  ;;  %v2385_v25 = vld [vmem:[#allocation7 + $0xbf0] sm:$0xff]  ;;  %v2382_v30 = vld [vmem:[#allocation7 + $0xbd8] sm:$0xff] }
 0x1ac   : > { %3115 = vmatprep.subr.bf16.mxu0 %v5121_v26  ;;  %3158 = vmatprep.subr.bf16.mxu1 %v5123_v27  ;;  %v2386_v26 = vld [vmem:[#allocation7 + $0xbf8] sm:$0xff]  ;;  %v5072_v27 = vcombine.low %v2261_v14, %v2265_v15  ;;  %v5193_v29 = vcombine.high %v2381_v23, %v2385_v25 }
 0x1ad   : > { %3145 = vmatprep.mubr.bf16.mxu0 %v6044_v3  ;;  %3188 = vmatprep.mubr.bf16.mxu1 %v6044_v3  ;;  %v5099_v3 = vcombine.high %v2286_v48, %v2290_v49  ;;  %v5195_v31 = vcombine.high %v2382_v30, %v2386_v26  ;;  %v5194_v38 = vcombine.low %v2382_v30, %v2386_v26  ;;  %v2357_v49 = vld [vmem:[#allocation7 + $0xb10] sm:$0xff] }
 0x1ae   : > { %v2325_v26 = vld [vmem:[#allocation7 + $0xa10] sm:$0xff] }
 0x1af   : > { %3116 = vmatpush1.bf16.msra.mxu0 %v5120_v33  ;;  %3159 = vmatpush1.bf16.msra.mxu1 %v5122_v34  ;;  %v2377_v33 = vld [vmem:[#allocation7 + $0xbb0] sm:$0xff]  ;;  %v2374_v34 = vld [vmem:[#allocation7 + $0xb98] sm:$0xff] }
 0x1b0   : > { %3117 = vmatprep.subr.bf16.mxu0 %v5113_v35  ;;  %3160 = vmatprep.subr.bf16.mxu1 %v5115_v37  ;;  %v2378_v35 = vld [vmem:[#allocation7 + $0xbb8] sm:$0xff]  ;;  %v5192_v37 = vcombine.low %v2381_v23, %v2385_v25  ;;  %v5185_v39 = vcombine.high %v2373_v32, %v2377_v33 }
 0x1b1   : > { %v5187_v41 = vcombine.high %v2374_v34, %v2378_v35  ;;  %v5186_v46 = vcombine.low %v2374_v34, %v2378_v35 }
 0x1b3   : > { %3118 = vmatpush1.bf16.msra.mxu0 %v5112_v43  ;;  %3161 = vmatpush1.bf16.msra.mxu1 %v5114_v44  ;;  %v2369_v43 = vld [vmem:[#allocation7 + $0xb70] sm:$0xff]  ;;  %v2366_v44 = vld [vmem:[#allocation7 + $0xb58] sm:$0xff] }
 0x1b4   : > { %3119 = vmatprep.subr.bf16.mxu0 %v5105_v45  ;;  %3162 = vmatprep.subr.bf16.mxu1 %v5107_v10  ;;  %v2370_v45 = vld [vmem:[#allocation7 + $0xb78] sm:$0xff]  ;;  %v5184_v10 = vcombine.low %v2373_v32, %v2377_v33  ;;  %v5177_v47 = vcombine.high %v2365_v42, %v2369_v43 }
 0x1b5   : > { %v5179_v48 = vcombine.high %v2366_v44, %v2370_v45  ;;  %v5178_v53 = vcombine.low %v2366_v44, %v2370_v45  ;;  %v3231_v45 = vrot.slane %v482_v2, 2 }
 0x1b7   : > { %3120 = vmatpush1.bf16.msra.mxu0 %v5104_v50  ;;  %3163 = vmatpush1.bf16.msra.mxu1 %v5106_v51  ;;  %v2361_v50 = vld [vmem:[#allocation7 + $0xb30] sm:$0xff]  ;;  %v2358_v51 = vld [vmem:[#allocation7 + $0xb18] sm:$0xff] }
 0x1b8   : > { %3121 = vmatprep.subr.bf16.mxu0 %v5097_v52  ;;  %3164 = vmatprep.subr.bf16.mxu1 %v5099_v3  ;;  %v2362_v52 = vld [vmem:[#allocation7 + $0xb38] sm:$0xff]  ;;  %v5176_v3 = vcombine.low %v2365_v42, %v2369_v43  ;;  %v5169_v55 = vcombine.high %v2357_v49, %v2361_v50  ;;  %v3218_v42 = vrot.slane %v464_v62, 1  ;;  %v3219_v43 = vrot.slane %v466_v63, 2  ;;  %v3293_v62 = vld [vmem:[#allocation7 + $0xda8] sm:$0xff] }
 0x1b9   : > { %v5171_v58 = vcombine.high %v2358_v51, %v2362_v52  ;;  %v5170_v4 = vcombine.low %v2358_v51, %v2362_v52  ;;  %v3289_v51 = vld [vmem:[#allocation7 + $0xd88] sm:$0xff] }
 0x1ba   : > { %v3220_v52 = vor.u32 %v3219_v43, %v3218_v42  ;;  %v3240_v43 = vld [vmem:[#allocation7 + $0xc00] sm:$0xff] }
 0x1bb   : > { %3122 = vmatpush1.bf16.msra.mxu0 %v5096_v61  ;;  %3165 = vmatpush1.bf16.msra.mxu1 %v5098_v0  ;;  %v2353_v61 = vld [vmem:[#allocation7 + $0xaf0] sm:$0xff]  ;;  %v2350_v0 = vld [vmem:[#allocation7 + $0xad8] sm:$0xff] }
 0x1bc   : > { %3123 = vmatprep.subr.bf16.mxu0 %v5089_v1  ;;  %3166 = vmatprep.subr.bf16.mxu1 %v5091_v40  ;;  %v2354_v1 = vld [vmem:[#allocation7 + $0xaf8] sm:$0xff]  ;;  %v5168_v40 = vcombine.low %v2357_v49, %v2361_v50  ;;  %v5161_v7 = vcombine.high %v2349_v59, %v2353_v61  ;;  %v3288_v49 = vld [vmem:[#allocation7 + $0xd80] sm:$0xff] }
 0x1bd   : > { %v5163_v8 = vcombine.high %v2350_v0, %v2354_v1  ;;  %v5162_v14 = vcombine.low %v2350_v0, %v2354_v1  ;;  %v3292_v50 = vld [vmem:[#allocation7 + $0xda0] sm:$0xff] }
 0x1be   : > { %v5244_v1 = vcombine.low %v3288_v49, %v3292_v50 }
 0x1bf   : > { %3124 = vmatpush1.bf16.msra.mxu0 %v5088_v9  ;;  %3167 = vmatpush1.bf16.msra.mxu1 %v5090_v11  ;;  %v2345_v9 = vld [vmem:[#allocation7 + $0xab0] sm:$0xff]  ;;  %v2342_v11 = vld [vmem:[#allocation7 + $0xa98] sm:$0xff] }
 0x1c0   : > { %3125 = vmatprep.subr.bf16.mxu0 %v5081_v12  ;;  %3168 = vmatprep.subr.bf16.mxu1 %v5083_v13  ;;  %v2346_v12 = vld [vmem:[#allocation7 + $0xab8] sm:$0xff]  ;;  %v5160_v13 = vcombine.low %v2349_v59, %v2353_v61  ;;  %v5153_v15 = vcombine.high %v2341_v18, %v2345_v9  ;;  %v3281_v59 = vld [vmem:[#allocation7 + $0xd48] sm:$0xff] }
 0x1c1   : > { %v5155_v17 = vcombine.high %v2342_v11, %v2346_v12  ;;  %v5154_v23 = vcombine.low %v2342_v11, %v2346_v12  ;;  %v3285_v61 = vld [vmem:[#allocation7 + $0xd68] sm:$0xff] }
 0x1c2   : > { %v3277_v11 = vld [vmem:[#allocation7 + $0xd28] sm:$0xff] }
 0x1c3   : > { %3126 = vmatpush1.bf16.msra.mxu0 %v5080_v20  ;;  %3169 = vmatpush1.bf16.msra.mxu1 %v5082_v21  ;;  %v2337_v20 = vld [vmem:[#allocation7 + $0xa70] sm:$0xff]  ;;  %v2334_v21 = vld [vmem:[#allocation7 + $0xa58] sm:$0xff] }
 0x1c4   : > { %3127 = vmatprep.subr.bf16.mxu0 %v5073_v36  ;;  %3170 = vmatprep.subr.bf16.mxu1 %v5075_v22  ;;  %v2338_v36 = vld [vmem:[#allocation7 + $0xa78] sm:$0xff]  ;;  %v5152_v22 = vcombine.low %v2341_v18, %v2345_v9  ;;  %v5145_v25 = vcombine.high %v2333_v19, %v2337_v20  ;;  %v5144_v32 = vcombine.low %v2333_v19, %v2337_v20  ;;  %v3276_v18 = vld [vmem:[#allocation7 + $0xd20] sm:$0xff]  ;;  %v3273_v9 = vld [vmem:[#allocation7 + $0xd08] sm:$0xff] }
 0x1c5   : > { %v5147_v30 = vcombine.high %v2334_v21, %v2338_v36  ;;  %v5146_v33 = vcombine.low %v2334_v21, %v2338_v36  ;;  %v3265_v19 = vld [vmem:[#allocation7 + $0xcc8] sm:$0xff]  ;;  %v5230_v36 = vcombine.low %v3273_v9, %v3277_v11 }
 0x1c6   : > { %v3269_v20 = vld [vmem:[#allocation7 + $0xce8] sm:$0xff] }
 0x1c7   : > { %3128 = vmatpush1.bf16.msra.mxu0 %v5072_v27  ;;  %3171 = vmatpush1.bf16.msra.mxu1 %v5074_v28  ;;  %v2329_v27 = vld [vmem:[#allocation7 + $0xa30] sm:$0xff]  ;;  %v2326_v28 = vld [vmem:[#allocation7 + $0xa18] sm:$0xff] }
 0x1c8   : > { %3129 = vmatprep.subr.bf16.mxu0 %v5193_v29  ;;  %3172 = vmatprep.subr.bf16.mxu1 %v5195_v31  ;;  %v2330_v29 = vld [vmem:[#allocation7 + $0xa38] sm:$0xff]  ;;  %v3228_v31 = vshrl.u32 %v5980_v60, 16  ;;  %v5137_v34 = vcombine.high %v2325_v26, %v2329_v27 }
 0x1c9   : > { %v5139_v35 = vcombine.high %v2326_v28, %v2330_v29 }
 0x1ca   : > { %v3230_v44 = vrot.slane %v3228_v31, 1 }
 0x1cb   : > { %3130 = vmatpush2.bf16.msra.mxu0 %v5192_v37  ;;  %3173 = vmatpush2.bf16.msra.mxu1 %v5194_v38  ;;  %v3296_v37 = vld [vmem:[#allocation7 + $0xdc0] sm:$0xff] }
 0x1cc   : > { %3131 = vmatprep.subr.bf16.mxu0 %v5185_v39  ;;  %3174 = vmatprep.subr.bf16.mxu1 %v5187_v41  ;;  %v3300_v38 = vld [vmem:[#allocation7 + $0xde0] sm:$0xff]  ;;  %v3297_v39 = vld [vmem:[#allocation7 + $0xdc8] sm:$0xff]  ;;  %v3232_v57 = vor.u32 %v3231_v45, %v3230_v44 }
 0x1cd   : > { %v3301_v41 = vld [vmem:[#allocation7 + $0xde8] sm:$0xff]  ;;  %v5252_v63 = vcombine.low %v3296_v37, %v3300_v38  ;;  %v3244_v44 = vld [vmem:[#allocation7 + $0xc20] sm:$0xff] }
 0x1ce   : > { %v5254_v2 = vcombine.low %v3297_v39, %v3301_v41  ;;  %v6073_v0 = vsel %vm6066_vm5, %v3220_v52, %v3232_v57  ;;  %v3241_v45 = vld [vmem:[#allocation7 + $0xc08] sm:$0xff]  ;;  %v5196_v57 = vcombine.low %v3240_v43, %v3244_v44 }
 0x1cf   : > { %3132 = vmatpush2.bf16.msra.mxu0 %v5184_v10  ;;  %3175 = vmatpush2.bf16.msra.mxu1 %v5186_v46  ;;  %v5136_v10 = vcombine.low %v2325_v26, %v2329_v27  ;;  %v5138_v46 = vcombine.low %v2326_v28, %v2330_v29  ;;  %v3257_v26 = vld [vmem:[#allocation7 + $0xc88] sm:$0xff]  ;;  %v5222_v29 = vcombine.low %v3265_v19, %v3269_v20 }
 0x1d0   : > { %3133 = vmatprep.subr.bf16.mxu0 %v5177_v47  ;;  %3176 = vmatprep.subr.bf16.mxu1 %v5179_v48  ;;  %v5253_v47 = vcombine.high %v3296_v37, %v3300_v38  ;;  %v5255_v48 = vcombine.high %v3297_v39, %v3301_v41  ;;  %v3261_v27 = vld [vmem:[#allocation7 + $0xca8] sm:$0xff] }
 0x1d1   : > { %v3253_v37 = vld [vmem:[#allocation7 + $0xc68] sm:$0xff]  ;;  %v5214_v39 = vcombine.low %v3257_v26, %v3261_v27 }
 0x1d2   : > { %v3365_v52 = vld [vmem:[#allocation7 + $0xfe8] sm:$0xff] }
 0x1d3   : > { %3134 = vmatpush2.bf16.msra.mxu0 %v5176_v3  ;;  %3177 = vmatpush2.bf16.msra.mxu1 %v5178_v53  ;;  %v5245_v3 = vcombine.high %v3288_v49, %v3292_v50  ;;  %v5247_v53 = vcombine.high %v3289_v51, %v3293_v62  ;;  %v3360_v50 = vld [vmem:[#allocation7 + $0xfc0] sm:$0xff] }
 0x1d4   : > { %3135 = vmatprep.subr.bf16.mxu0 %v5169_v55  ;;  %3178 = vmatprep.subr.bf16.mxu1 %v5171_v58  ;;  %v3280_v55 = vld [vmem:[#allocation7 + $0xd40] sm:$0xff] }
 0x1d5   : > { %v3284_v58 = vld [vmem:[#allocation7 + $0xd60] sm:$0xff] }
 0x1d6   : > { %v5236_v12 = vcombine.low %v3280_v55, %v3284_v58 }
 0x1d7   : > { %3136 = vmatpush2.bf16.msra.mxu0 %v5168_v40  ;;  %3179 = vmatpush2.bf16.msra.mxu1 %v5170_v4  ;;  %v5246_v40 = vcombine.low %v3289_v51, %v3293_v62  ;;  %v5237_v4 = vcombine.high %v3280_v55, %v3284_v58  ;;  %v3364_v51 = vld [vmem:[#allocation7 + $0xfe0] sm:$0xff]  ;;  %v3361_v62 = vld [vmem:[#allocation7 + $0xfc8] sm:$0xff] }
 0x1d8   : > { %3137 = vmatprep.subr.bf16.mxu0 %v5161_v7  ;;  %3180 = vmatprep.subr.bf16.mxu1 %v5163_v8  ;;  %v5239_v7 = vcombine.high %v3281_v59, %v3285_v61  ;;  %v3272_v8 = vld [vmem:[#allocation7 + $0xd00] sm:$0xff]  ;;  %v3353_v58 = vld [vmem:[#allocation7 + $0xf88] sm:$0xff] }
 0x1d9   : > { %v5228_v21 = vcombine.low %v3272_v8, %v3276_v18  ;;  %v3356_v55 = vld [vmem:[#allocation7 + $0xfa0] sm:$0xff] }
 0x1db   : > { %3138 = vmatpush2.bf16.msra.mxu0 %v5160_v13  ;;  %3181 = vmatpush2.bf16.msra.mxu1 %v5162_v14  ;;  %v5229_v13 = vcombine.high %v3272_v8, %v3276_v18  ;;  %v5231_v14 = vcombine.high %v3273_v9, %v3277_v11  ;;  %v3348_v8 = vld [vmem:[#allocation7 + $0xf60] sm:$0xff]  ;;  %v3345_v18 = vld [vmem:[#allocation7 + $0xf48] sm:$0xff] }
 0x1dc   : > { %3139 = vmatprep.subr.bf16.mxu0 %v5153_v15  ;;  %3182 = vmatprep.subr.bf16.mxu1 %v5155_v17  ;;  %v3264_v15 = vld [vmem:[#allocation7 + $0xcc0] sm:$0xff]  ;;  %v3349_v9 = vld [vmem:[#allocation7 + $0xf68] sm:$0xff] }
 0x1dd   : > { %v3268_v17 = vld [vmem:[#allocation7 + $0xce0] sm:$0xff] }
 0x1de   : > { %v5220_v28 = vcombine.low %v3264_v15, %v3268_v17 }
 0x1df   : > { %3140 = vmatpush2.bf16.msra.mxu0 %v5152_v22  ;;  %3183 = vmatpush2.bf16.msra.mxu1 %v5154_v23  ;;  %v5221_v22 = vcombine.high %v3264_v15, %v3268_v17  ;;  %v5223_v23 = vcombine.high %v3265_v19, %v3269_v20  ;;  %v3340_v15 = vld [vmem:[#allocation7 + $0xf20] sm:$0xff]  ;;  %v3337_v17 = vld [vmem:[#allocation7 + $0xf08] sm:$0xff] }
 0x1e0   : > { %3141 = vmatprep.subr.bf16.mxu0 %v5145_v25  ;;  %3184 = vmatprep.subr.bf16.mxu1 %v5147_v30  ;;  %v3256_v25 = vld [vmem:[#allocation7 + $0xc80] sm:$0xff]  ;;  %v3341_v19 = vld [vmem:[#allocation7 + $0xf28] sm:$0xff] }
 0x1e1   : > { %v3260_v30 = vld [vmem:[#allocation7 + $0xca0] sm:$0xff] }
 0x1e2   : > { %v5213_v31 = vcombine.high %v3256_v25, %v3260_v30  ;;  %v5212_v38 = vcombine.low %v3256_v25, %v3260_v30  ;;  %v3332_v25 = vld [vmem:[#allocation7 + $0xee0] sm:$0xff]  ;;  %v3329_v30 = vld [vmem:[#allocation7 + $0xec8] sm:$0xff] }
 0x1e3   : > { %3142 = vmatpush2.bf16.msra.mxu0 %v5144_v32  ;;  %3185 = vmatpush2.bf16.msra.mxu1 %v5146_v33  ;;  %v5215_v32 = vcombine.high %v3257_v26, %v3261_v27  ;;  %v3248_v33 = vld [vmem:[#allocation7 + $0xc40] sm:$0xff]  ;;  %v3333_v26 = vld [vmem:[#allocation7 + $0xee8] sm:$0xff] }
 0x1e4   : > { %3143 = vmatprep.subr.bf16.mxu0 %v5137_v34  ;;  %3186 = vmatprep.subr.bf16.mxu1 %v5139_v35  ;;  %v3252_v34 = vld [vmem:[#allocation7 + $0xc60] sm:$0xff]  ;;  %v3249_v35 = vld [vmem:[#allocation7 + $0xc48] sm:$0xff] }
 0x1e5   : > { %v5205_v41 = vcombine.high %v3248_v33, %v3252_v34  ;;  %v5207_v42 = vcombine.high %v3249_v35, %v3253_v37 }
 0x1e7   : > { %3144 = vmatpush2.bf16.msra.mxu0 %v5136_v10  ;;  %3187 = vmatpush2.bf16.msra.mxu1 %v5138_v46  ;;  %v3245_v10 = vld [vmem:[#allocation7 + $0xc28] sm:$0xff]  ;;  %v5204_v46 = vcombine.low %v3248_v33, %v3252_v34  ;;  %v3324_v33 = vld [vmem:[#allocation7 + $0xea0] sm:$0xff] }
 0x1e8   : > { %4008 = vmatprep.subr.bf16.mxu0 %v5253_v47  ;;  %4051 = vmatprep.subr.bf16.mxu1 %v5255_v48  ;;  %v5206_v47 = vcombine.low %v3249_v35, %v3253_v37  ;;  %v5197_v48 = vcombine.high %v3240_v43, %v3244_v44  ;;  %v5199_v49 = vcombine.high %v3241_v45, %v3245_v10  ;;  %v3321_v34 = vld [vmem:[#allocation7 + $0xe88] sm:$0xff]  ;;  %v3316_v43 = vld [vmem:[#allocation7 + $0xe60] sm:$0xff] }
 0x1e9   : > { %v3325_v35 = vld [vmem:[#allocation7 + $0xea8] sm:$0xff] }
 0x1ea   : > { %3146 = vmatmul.mubr.bf16.vlgmr.msra.gmra.mxu0 %v6052_v24  ;;  %3189 = vmatmul.mubr.bf16.vlgmr.msra.gmra.mxu1 %v6052_v24  ;;  %v5238_v24 = vcombine.low %v3281_v59, %v3285_v61  ;;  %v3357_v59 = vld [vmem:[#allocation7 + $0xfa8] sm:$0xff]  ;;  %v5316_v61 = vcombine.low %v3360_v50, %v3364_v51 }
 0x1eb   : > { %4009 = vmatpush1.bf16.msra.mxu0 %v5252_v63  ;;  %4052 = vmatpush1.bf16.msra.mxu1 %v5254_v2  ;;  %v5198_v63 = vcombine.low %v3241_v45, %v3245_v10  ;;  %v5317_v2 = vcombine.high %v3360_v50, %v3364_v51  ;;  %v3313_v44 = vld [vmem:[#allocation7 + $0xe48] sm:$0xff]  ;;  %v3304_v50 = vld [vmem:[#allocation7 + $0xe00] sm:$0xff] }
 0x1ec   : > { %4010 = vmatprep.subr.bf16.mxu0 %v5245_v3  ;;  %4053 = vmatprep.subr.bf16.mxu1 %v5247_v53  ;;  %v5319_v3 = vcombine.high %v3361_v62, %v3365_v52  ;;  %v3352_v53 = vld [vmem:[#allocation7 + $0xf80] sm:$0xff]  ;;  %v3317_v45 = vld [vmem:[#allocation7 + $0xe68] sm:$0xff] }
 0x1ed   : > { %4040 = vmatprep.mubr.bf16.mxu0 %v6073_v0  ;;  %4083 = vmatprep.mubr.bf16.mxu1 %v6073_v0  ;;  %v5308_v11 = vcombine.low %v3352_v53, %v3356_v55  ;;  %v3308_v51 = vld [vmem:[#allocation7 + $0xe20] sm:$0xff] }
 0x1ef   : > { %4011 = vmatpush1.bf16.msra.mxu0 %v5244_v1  ;;  %4054 = vmatpush1.bf16.msra.mxu1 %v5246_v40  ;;  %v5318_v1 = vcombine.low %v3361_v62, %v3365_v52  ;;  %v5309_v40 = vcombine.high %v3352_v53, %v3356_v55  ;;  %v3305_v52 = vld [vmem:[#allocation7 + $0xe08] sm:$0xff]  ;;  %v3226_v53 = vrot.slane %v478_v56, 2  ;;  %v5270_v55 = vcombine.low %v3313_v44, %v3317_v45  ;;  %v3290_v56 = vld [vmem:[#allocation7 + $0xd90] sm:$0xff] }
 0x1f0   : > { %4012 = vmatprep.subr.bf16.mxu0 %v5237_v4  ;;  %4055 = vmatprep.subr.bf16.mxu1 %v5239_v7  ;;  %v5311_v4 = vcombine.high %v3353_v58, %v3357_v59  ;;  %v3344_v7 = vld [vmem:[#allocation7 + $0xf40] sm:$0xff] }
 0x1f1   : > { %v5300_v20 = vcombine.low %v3344_v7, %v3348_v8 }
 0x1f3   : > { %4013 = vmatpush1.bf16.msra.mxu0 %v5236_v12  ;;  %4056 = vmatpush1.bf16.msra.mxu1 %v5238_v24  ;;  %v5310_v12 = vcombine.low %v3353_v58, %v3357_v59  ;;  %v5301_v24 = vcombine.high %v3344_v7, %v3348_v8  ;;  %v5261_v58 = vcombine.high %v3304_v50, %v3308_v51 }
 0x1f4   : > { %4014 = vmatprep.subr.bf16.mxu0 %v5229_v13  ;;  %4057 = vmatprep.subr.bf16.mxu1 %v5231_v14  ;;  %v5303_v13 = vcombine.high %v3345_v18, %v3349_v9  ;;  %v3336_v14 = vld [vmem:[#allocation7 + $0xf00] sm:$0xff]  ;;  %v5260_v7 = vcombine.low %v3304_v50, %v3308_v51  ;;  %v3254_v50 = vld [vmem:[#allocation7 + $0xc70] sm:$0xff]  ;;  %v3251_v51 = vld [vmem:[#allocation7 + $0xc58] sm:$0xff] }
 0x1f5   : > { %v5292_v27 = vcombine.low %v3336_v14, %v3340_v15 }
 0x1f7   : > { %4015 = vmatpush1.bf16.msra.mxu0 %v5228_v21  ;;  %4058 = vmatpush1.bf16.msra.mxu1 %v5230_v36  ;;  %v5302_v21 = vcombine.low %v3345_v18, %v3349_v9  ;;  %v5293_v36 = vcombine.high %v3336_v14, %v3340_v15  ;;  %v3294_v18 = vld [vmem:[#allocation7 + $0xdb0] sm:$0xff]  ;;  %v3291_v9 = vld [vmem:[#allocation7 + $0xd98] sm:$0xff] }
 0x1f8   : > { %4016 = vmatprep.subr.bf16.mxu0 %v5221_v22  ;;  %4059 = vmatprep.subr.bf16.mxu1 %v5223_v23  ;;  %v5295_v22 = vcombine.high %v3337_v17, %v3341_v19  ;;  %v3328_v23 = vld [vmem:[#allocation7 + $0xec0] sm:$0xff]  ;;  %v5249_v14 = vcombine.high %v3290_v56, %v3294_v18 }
 0x1f9   : > { %v5284_v37 = vcombine.low %v3328_v23, %v3332_v25 }
 0x1fb   : > { %4017 = vmatpush1.bf16.msra.mxu0 %v5220_v28  ;;  %4060 = vmatpush1.bf16.msra.mxu1 %v5222_v29  ;;  %v5294_v28 = vcombine.low %v3337_v17, %v3341_v19  ;;  %v5285_v29 = vcombine.high %v3328_v23, %v3332_v25  ;;  %v3282_v17 = vld [vmem:[#allocation7 + $0xd50] sm:$0xff] }
 0x1fc   : > { %4018 = vmatprep.subr.bf16.mxu0 %v5213_v31  ;;  %4061 = vmatprep.subr.bf16.mxu1 %v5215_v32  ;;  %v5287_v31 = vcombine.high %v3329_v30, %v3333_v26  ;;  %v3320_v32 = vld [vmem:[#allocation7 + $0xe80] sm:$0xff]  ;;  %v3286_v19 = vld [vmem:[#allocation7 + $0xd70] sm:$0xff] }
 0x1fd   : > { %v5276_v10 = vcombine.low %v3320_v32, %v3324_v33  ;;  %v3274_v25 = vld [vmem:[#allocation7 + $0xd10] sm:$0xff] }
 0x1ff   : > { %4019 = vmatpush1.bf16.msra.mxu0 %v5212_v38  ;;  %4062 = vmatpush1.bf16.msra.mxu1 %v5214_v39  ;;  %v5286_v38 = vcombine.low %v3329_v30, %v3333_v26  ;;  %v5277_v39 = vcombine.high %v3320_v32, %v3324_v33  ;;  %v3278_v30 = vld [vmem:[#allocation7 + $0xd30] sm:$0xff]  ;;  %v3275_v26 = vld [vmem:[#allocation7 + $0xd18] sm:$0xff] }
 0x200   : > { %4020 = vmatprep.subr.bf16.mxu0 %v5205_v41  ;;  %4063 = vmatprep.subr.bf16.mxu1 %v5207_v42  ;;  %v5279_v41 = vcombine.high %v3321_v34, %v3325_v35  ;;  %v3312_v42 = vld [vmem:[#allocation7 + $0xe40] sm:$0xff]  ;;  %v3266_v33 = vld [vmem:[#allocation7 + $0xcd0] sm:$0xff] }
 0x201   : > { %v5268_v62 = vcombine.low %v3312_v42, %v3316_v43 }
 0x203   : > { %4021 = vmatpush1.bf16.msra.mxu0 %v5204_v46  ;;  %4064 = vmatpush1.bf16.msra.mxu1 %v5206_v47  ;;  %v3223_v46 = vshrl.u32 %v6008_v6, 16  ;;  %v5278_v47 = vcombine.low %v3321_v34, %v3325_v35  ;;  %v3270_v34 = vld [vmem:[#allocation7 + $0xcf0] sm:$0xff]  ;;  %v3267_v35 = vld [vmem:[#allocation7 + $0xcd8] sm:$0xff] }
 0x204   : > { %4022 = vmatprep.subr.bf16.mxu0 %v5197_v48  ;;  %4065 = vmatprep.subr.bf16.mxu1 %v5199_v49  ;;  %v5269_v48 = vcombine.high %v3312_v42, %v3316_v43  ;;  %v5271_v49 = vcombine.high %v3313_v44, %v3317_v45  ;;  %v3258_v42 = vld [vmem:[#allocation7 + $0xc90] sm:$0xff]  ;;  %v3259_v44 = vld [vmem:[#allocation7 + $0xc98] sm:$0xff] }
 0x205   : > { %v3262_v43 = vld [vmem:[#allocation7 + $0xcb0] sm:$0xff]  ;;  %v3263_v45 = vld [vmem:[#allocation7 + $0xcb8] sm:$0xff] }
 0x207   : > { %4023 = vmatpush1.bf16.msra.mxu0 %v5196_v57  ;;  %4066 = vmatpush1.bf16.msra.mxu1 %v5198_v63  ;;  %v3309_v57 = vld [vmem:[#allocation7 + $0xe28] sm:$0xff]  ;;  %v3215_v63 = vrot.slane %v457_v16, 1 }
 0x208   : > { %4024 = vmatprep.subr.bf16.mxu0 %v5317_v2  ;;  %4067 = vmatprep.subr.bf16.mxu1 %v5319_v3  ;;  %v3216_v2 = vrot.slane %v459_v5, 2  ;;  %v3225_v3 = vrot.slane %v3223_v46, 1  ;;  %v5263_v59 = vcombine.high %v3305_v52, %v3309_v57  ;;  %v5262_v54 = vcombine.low %v3305_v52, %v3309_v57 }
 0x209   : > { %v5216_v52 = vcombine.low %v3258_v42, %v3262_v43  ;;  %v5218_v57 = vcombine.low %v3259_v44, %v3263_v45 }
 0x20a   : > { %v3217_v16 = vor.u32 %v3216_v2, %v3215_v63  ;;  %v3227_v8 = vor.u32 %v3226_v53, %v3225_v3  ;;  %v3242_v3 = vld [vmem:[#allocation7 + $0xc10] sm:$0xff] }
 0x20b   : > { %4025 = vmatpush2.bf16.msra.mxu0 %v5316_v61  ;;  %4068 = vmatpush2.bf16.msra.mxu1 %v5318_v1  ;;  %v3298_v61 = vld [vmem:[#allocation7 + $0xdd0] sm:$0xff] }
 0x20c   : > { %4026 = vmatprep.subr.bf16.mxu0 %v5309_v40  ;;  %4069 = vmatprep.subr.bf16.mxu1 %v5311_v4  ;;  %v3302_v1 = vld [vmem:[#allocation7 + $0xdf0] sm:$0xff]  ;;  %v3299_v40 = vld [vmem:[#allocation7 + $0xdd8] sm:$0xff] }
 0x20d   : > { %v3303_v4 = vld [vmem:[#allocation7 + $0xdf8] sm:$0xff]  ;;  %v5257_v5 = vcombine.high %v3298_v61, %v3302_v1  ;;  %v3246_v53 = vld [vmem:[#allocation7 + $0xc30] sm:$0xff] }
 0x20e   : > { %v5259_v6 = vcombine.high %v3299_v40, %v3303_v4 }
 0x20f   : > { %4027 = vmatpush2.bf16.msra.mxu0 %v5308_v11  ;;  %4070 = vmatpush2.bf16.msra.mxu1 %v5310_v12  ;;  %v3295_v11 = vld [vmem:[#allocation7 + $0xdb8] sm:$0xff]  ;;  %v6087_v12 = vsel %vm6066_vm5, %v3217_v16, %v3227_v8 }
 0x210   : > { %4028 = vmatprep.subr.bf16.mxu0 %v5301_v24  ;;  %4071 = vmatprep.subr.bf16.mxu1 %v5303_v13  ;;  %v5256_v24 = vcombine.low %v3298_v61, %v3302_v1  ;;  %v5258_v13 = vcombine.low %v3299_v40, %v3303_v4  ;;  %v5251_v15 = vcombine.high %v3291_v9, %v3295_v11  ;;  %v3362_v4 = vld [vmem:[#allocation7 + $0xfd0] sm:$0xff]  ;;  %v3363_v16 = vld [vmem:[#allocation7 + $0xfd8] sm:$0xff] }
 0x211   : > { %v5250_v60 = vcombine.low %v3291_v9, %v3295_v11  ;;  %v5201_v1 = vcombine.high %v3242_v3, %v3246_v53  ;;  %v3367_v8 = vld [vmem:[#allocation7 + $0xff8] sm:$0xff]  ;;  %v3358_v9 = vld [vmem:[#allocation7 + $0xfb0] sm:$0xff] }
 0x212   : > { %v3355_v11 = vld [vmem:[#allocation7 + $0xf98] sm:$0xff] }
 0x213   : > { %4029 = vmatpush2.bf16.msra.mxu0 %v5300_v20  ;;  %4072 = vmatpush2.bf16.msra.mxu1 %v5302_v21  ;;  %v3283_v20 = vld [vmem:[#allocation7 + $0xd58] sm:$0xff] }
 0x214   : > { %4030 = vmatprep.subr.bf16.mxu0 %v5293_v36  ;;  %4073 = vmatprep.subr.bf16.mxu1 %v5295_v22  ;;  %v3287_v21 = vld [vmem:[#allocation7 + $0xd78] sm:$0xff]  ;;  %v5248_v36 = vcombine.low %v3290_v56, %v3294_v18  ;;  %v5241_v22 = vcombine.high %v3282_v17, %v3286_v19  ;;  %v5323_v56 = vcombine.high %v3363_v16, %v3367_v8  ;;  %v3354_v18 = vld [vmem:[#allocation7 + $0xf90] sm:$0xff] }
 0x215   : > { %v5243_v23 = vcombine.high %v3283_v20, %v3287_v21 }
 0x217   : > { %4031 = vmatpush2.bf16.msra.mxu0 %v5292_v27  ;;  %4074 = vmatpush2.bf16.msra.mxu1 %v5294_v28  ;;  %v3279_v27 = vld [vmem:[#allocation7 + $0xd38] sm:$0xff]  ;;  %v5240_v28 = vcombine.low %v3282_v17, %v3286_v19  ;;  %v3346_v19 = vld [vmem:[#allocation7 + $0xf50] sm:$0xff] }
 0x218   : > { %4032 = vmatprep.subr.bf16.mxu0 %v5285_v29  ;;  %4075 = vmatprep.subr.bf16.mxu1 %v5287_v31  ;;  %v5242_v29 = vcombine.low %v3283_v20, %v3287_v21  ;;  %v5233_v31 = vcombine.high %v3274_v25, %v3278_v30  ;;  %v5235_v32 = vcombine.high %v3275_v26, %v3279_v27  ;;  %v3350_v20 = vld [vmem:[#allocation7 + $0xf70] sm:$0xff]  ;;  %v3347_v21 = vld [vmem:[#allocation7 + $0xf58] sm:$0xff] }
 0x21b   : > { %4033 = vmatpush2.bf16.msra.mxu0 %v5284_v37  ;;  %4076 = vmatpush2.bf16.msra.mxu1 %v5286_v38  ;;  %v3271_v37 = vld [vmem:[#allocation7 + $0xcf8] sm:$0xff]  ;;  %v5232_v38 = vcombine.low %v3274_v25, %v3278_v30  ;;  %v3338_v30 = vld [vmem:[#allocation7 + $0xf10] sm:$0xff] }
 0x21c   : > { %4034 = vmatprep.subr.bf16.mxu0 %v5277_v39  ;;  %4077 = vmatprep.subr.bf16.mxu1 %v5279_v41  ;;  %v5234_v39 = vcombine.low %v3275_v26, %v3279_v27  ;;  %v5225_v41 = vcombine.high %v3266_v33, %v3270_v34  ;;  %v5226_v46 = vcombine.low %v3267_v35, %v3271_v37  ;;  %v3342_v26 = vld [vmem:[#allocation7 + $0xf30] sm:$0xff]  ;;  %v3339_v27 = vld [vmem:[#allocation7 + $0xf18] sm:$0xff] }
 0x21f   : > { %4035 = vmatpush2.bf16.msra.mxu0 %v5276_v10  ;;  %4078 = vmatpush2.bf16.msra.mxu1 %v5278_v47  ;;  %v5224_v10 = vcombine.low %v3266_v33, %v3270_v34  ;;  %v5217_v47 = vcombine.high %v3258_v42, %v3262_v43  ;;  %v3330_v34 = vld [vmem:[#allocation7 + $0xed0] sm:$0xff] }
 0x220   : > { %4036 = vmatprep.subr.bf16.mxu0 %v5269_v48  ;;  %4079 = vmatprep.subr.bf16.mxu1 %v5271_v49  ;;  %v5219_v48 = vcombine.high %v3259_v44, %v3263_v45  ;;  %v3250_v49 = vld [vmem:[#allocation7 + $0xc50] sm:$0xff]  ;;  %v3323_v45 = vld [vmem:[#allocation7 + $0xe98] sm:$0xff] }
 0x221   : > { %v5209_v63 = vcombine.high %v3250_v49, %v3254_v50  ;;  %v3322_v43 = vld [vmem:[#allocation7 + $0xe90] sm:$0xff] }
 0x222   : > { %v3326_v44 = vld [vmem:[#allocation7 + $0xeb0] sm:$0xff] }
 0x223   : > { %4037 = vmatpush2.bf16.msra.mxu0 %v5268_v62  ;;  %4080 = vmatpush2.bf16.msra.mxu1 %v5270_v55  ;;  %v3255_v62 = vld [vmem:[#allocation7 + $0xc78] sm:$0xff] }
 0x224   : > { %4038 = vmatprep.subr.bf16.mxu0 %v5261_v58  ;;  %4081 = vmatprep.subr.bf16.mxu1 %v5263_v59  ;;  %v5211_v2 = vcombine.high %v3251_v51, %v3255_v62  ;;  %v3243_v55 = vld [vmem:[#allocation7 + $0xc18] sm:$0xff]  ;;  %v5208_v59 = vcombine.low %v3250_v49, %v3254_v50  ;;  %v5210_v61 = vcombine.low %v3251_v51, %v3255_v62  ;;  %v3314_v50 = vld [vmem:[#allocation7 + $0xe50] sm:$0xff] }
 0x225   : > { %v3247_v58 = vld [vmem:[#allocation7 + $0xc38] sm:$0xff]  ;;  %v3318_v51 = vld [vmem:[#allocation7 + $0xe70] sm:$0xff] }
 0x226   : > { %v5203_v40 = vcombine.high %v3243_v55, %v3247_v58  ;;  %v3315_v62 = vld [vmem:[#allocation7 + $0xe58] sm:$0xff] }
 0x227   : > { %4039 = vmatpush2.bf16.msra.mxu0 %v5260_v7  ;;  %4082 = vmatpush2.bf16.msra.mxu1 %v5262_v54  ;;  %v3366_v7 = vld [vmem:[#allocation7 + $0xff0] sm:$0xff]  ;;  %v5200_v54 = vcombine.low %v3242_v3, %v3246_v53 }
 0x228   : > { %4094 = vmatprep.subr.bf16.mxu0 %v5257_v5  ;;  %4137 = vmatprep.subr.bf16.mxu1 %v5259_v6  ;;  %v5202_v5 = vcombine.low %v3243_v55, %v3247_v58  ;;  %v5321_v6 = vcombine.high %v3362_v4, %v3366_v7  ;;  %v3306_v53 = vld [vmem:[#allocation7 + $0xe10] sm:$0xff]  ;;  %v3307_v58 = vld [vmem:[#allocation7 + $0xe18] sm:$0xff] }
 0x229   : > { %v3310_v55 = vld [vmem:[#allocation7 + $0xe30] sm:$0xff] }
 0x22a   : > { %4041 = vmatmul.mubr.bf16.vlgmr.msra.gmra.mxu0 %v6087_v12  ;;  %4084 = vmatmul.mubr.bf16.vlgmr.msra.gmra.mxu1 %v6087_v12 }
 0x22b   : > { %4095 = vmatpush1.bf16.msra.mxu0 %v5256_v24  ;;  %4138 = vmatpush1.bf16.msra.mxu1 %v5258_v13  ;;  %v3359_v24 = vld [vmem:[#allocation7 + $0xfb8] sm:$0xff]  ;;  %v5320_v13 = vcombine.low %v3362_v4, %v3366_v7  ;;  %v5264_v7 = vcombine.low %v3306_v53, %v3310_v55 }
 0x22c   : > { %4096 = vmatprep.subr.bf16.mxu0 %v5249_v14  ;;  %4139 = vmatprep.subr.bf16.mxu1 %v5251_v15  ;;  %v5322_v14 = vcombine.low %v3363_v16, %v3367_v8  ;;  %v5313_v15 = vcombine.high %v3354_v18, %v3358_v9  ;;  %v5315_v17 = vcombine.high %v3355_v11, %v3359_v24  ;;  %v5511_v8 = vld [vmem:[#allocation8 + $0x78] sm:$0xff]  }
 0x22d   : > { %4126 = vmatprep.mubr.bf16.mxu0 %v6073_v0  ;;  %4169 = vmatprep.mubr.bf16.mxu1 %v6073_v0  ;;  %v5227_v0 = vcombine.high %v3267_v35, %v3271_v37  ;;  %v3334_v35 = vld [vmem:[#allocation7 + $0xef0] sm:$0xff]  ;;  %v3331_v37 = vld [vmem:[#allocation7 + $0xed8] sm:$0xff] }
 0x22f   : > { %4097 = vmatpush1.bf16.msra.mxu0 %v5248_v36  ;;  %4140 = vmatpush1.bf16.msra.mxu1 %v5250_v60  ;;  %v3351_v36 = vld [vmem:[#allocation7 + $0xf78] sm:$0xff]  ;;  %v5312_v60 = vcombine.low %v3354_v18, %v3358_v9  ;;  %v5516_v18 = vld [vmem:[#allocation8 + $0xf0] sm:$0xff]  }
 0x230   : > { %4098 = vmatprep.subr.bf16.mxu0 %v5241_v22  ;;  %4141 = vmatprep.subr.bf16.mxu1 %v5243_v23  ;;  %v5314_v22 = vcombine.low %v3355_v11, %v3359_v24  ;;  %v5305_v23 = vcombine.high %v3346_v19, %v3350_v20  ;;  %v5307_v25 = vcombine.high %v3347_v21, %v3351_v36  ;;  %v5517_v9 = vld [vmem:[#allocation8 + $0x30] sm:$0xff]   ;;  %v5519_v24 = vld [vmem:[#allocation8 + $0x68] sm:$0xff]  }
 0x231   : > { %v5518_v11 = vld [vmem:[#allocation8 + $0xb0] sm:$0xff]  }
 0x233   : > { %4099 = vmatpush1.bf16.msra.mxu0 %v5240_v28  ;;  %4142 = vmatpush1.bf16.msra.mxu1 %v5242_v29  ;;  %v3343_v28 = vld [vmem:[#allocation7 + $0xf38] sm:$0xff]  ;;  %v5304_v29 = vcombine.low %v3346_v19, %v3350_v20  ;;  %v5525_v19 = vld [vmem:[#allocation8 + $0x20] sm:$0xff]  }
 0x234   : > { %4100 = vmatprep.subr.bf16.mxu0 %v5233_v31  ;;  %4143 = vmatprep.subr.bf16.mxu1 %v5235_v32  ;;  %v5306_v31 = vcombine.low %v3347_v21, %v3351_v36  ;;  %v5297_v32 = vcombine.high %v3338_v30, %v3342_v26  ;;  %v5299_v33 = vcombine.high %v3339_v27, %v3343_v28  ;;  %v5526_v20 = vld [vmem:[#allocation8 + $0xa0] sm:$0xff]   ;;  %v5527_v21 = vld [vmem:[#allocation8 + $0x58] sm:$0xff]  }
 0x235   : > { %v5528_v36 = vld [vmem:[#allocation8 + $0xd8] sm:$0xff]  }
 0x237   : > { %4101 = vmatpush1.bf16.msra.mxu0 %v5232_v38  ;;  %4144 = vmatpush1.bf16.msra.mxu1 %v5234_v39  ;;  %v3335_v38 = vld [vmem:[#allocation7 + $0xef8] sm:$0xff]  ;;  %v5296_v39 = vcombine.low %v3338_v30, %v3342_v26  ;;  %v5533_v30 = vld [vmem:[#allocation8 + $0x10] sm:$0xff]  }
 0x238   : > { %4102 = vmatprep.subr.bf16.mxu0 %v5225_v41  ;;  %4145 = vmatprep.subr.bf16.mxu1 %v5227_v0  ;;  %v5298_v41 = vcombine.low %v3339_v27, %v3343_v28  ;;  %v5289_v0 = vcombine.high %v3330_v34, %v3334_v35  ;;  %v5291_v42 = vcombine.high %v3331_v37, %v3335_v38  ;;  %v5534_v26 = vld [vmem:[#allocation8 + $0x90] sm:$0xff]   ;;  %v5535_v27 = vld [vmem:[#allocation8 + $0x48] sm:$0xff]  }
 0x239   : > { %v5536_v28 = vld [vmem:[#allocation8 + $0xc8] sm:$0xff]  }
 0x23b   : > { %4103 = vmatpush1.bf16.msra.mxu0 %v5224_v10  ;;  %4146 = vmatpush1.bf16.msra.mxu1 %v5226_v46  ;;  %v3327_v10 = vld [vmem:[#allocation7 + $0xeb8] sm:$0xff]  ;;  %v5288_v46 = vcombine.low %v3330_v34, %v3334_v35  ;;  %v5541_v34 = vld [vmem:[#allocation8] sm:$0xff]  }
 0x23c   : > { %4104 = vmatprep.subr.bf16.mxu0 %v5217_v47  ;;  %4147 = vmatprep.subr.bf16.mxu1 %v5219_v48  ;;  %v5290_v47 = vcombine.low %v3331_v37, %v3335_v38  ;;  %v5281_v48 = vcombine.high %v3322_v43, %v3326_v44  ;;  %v5283_v49 = vcombine.high %v3323_v45, %v3327_v10  ;;  %v5542_v35 = vld [vmem:[#allocation8 + $0x80] sm:$0xff]   ;;  %v1294_v37 = vpop.f32.mrf.mxu0  ;;  %v1337_v38 = vpop.f32.mrf.mxu1 }
 0x23f   : > { %4105 = vmatpush1.bf16.msra.mxu0 %v5216_v52  ;;  %4148 = vmatpush1.bf16.msra.mxu1 %v5218_v57  ;;  %v3319_v52 = vld [vmem:[#allocation7 + $0xe78] sm:$0xff]  ;;  %v5280_v57 = vcombine.low %v3322_v43, %v3326_v44 }
 0x240   : > { %4106 = vmatprep.subr.bf16.mxu0 %v5209_v63  ;;  %4149 = vmatprep.subr.bf16.mxu1 %v5211_v2  ;;  %v5282_v63 = vcombine.low %v3323_v45, %v3327_v10  ;;  %v5273_v2 = vcombine.high %v3314_v50, %v3318_v51  ;;  %v5275_v3 = vcombine.high %v3315_v62, %v3319_v52 }
 0x243   : > { %4107 = vmatpush1.bf16.msra.mxu0 %v5208_v59  ;;  %4150 = vmatpush1.bf16.msra.mxu1 %v5210_v61  ;;  %v3311_v59 = vld [vmem:[#allocation7 + $0xe38] sm:$0xff]  ;;  %v5272_v61 = vcombine.low %v3314_v50, %v3318_v51 }
 0x244   : > { %4108 = vmatprep.subr.bf16.mxu0 %v5201_v1  ;;  %4151 = vmatprep.subr.bf16.mxu1 %v5203_v40  ;;  %v5274_v1 = vcombine.low %v3315_v62, %v3319_v52  ;;  %v5265_v40 = vcombine.high %v3306_v53, %v3310_v55  ;;  %v5267_v4 = vcombine.high %v3307_v58, %v3311_v59 }
 0x245   : > { %v5266_v16 = vcombine.low %v3307_v58, %v3311_v59 }
 0x247   : > { %4109 = vmatpush1.bf16.msra.mxu0 %v5200_v54  ;;  %4152 = vmatpush1.bf16.msra.mxu1 %v5202_v5  ;;  %v5512_v54 = vld [vmem:[#allocation8 + $0xf8] sm:$0xff]  }
 0x248   : > { %4110 = vmatprep.subr.bf16.mxu0 %v5321_v6  ;;  %4153 = vmatprep.subr.bf16.mxu1 %v5323_v56  ;;  %v5513_v5 = vld [vmem:[#allocation8 + $0x38] sm:$0xff]   ;;  %v5515_v56 = vld [vmem:[#allocation8 + $0x70] sm:$0xff]  }
 0x249   : > { %v5514_v6 = vld [vmem:[#allocation8 + $0xb8] sm:$0xff]  }
 0x24b   : > { %4111 = vmatpush2.bf16.msra.mxu0 %v5320_v13  ;;  %4154 = vmatpush2.bf16.msra.mxu1 %v5322_v14  ;;  %v5520_v13 = vld [vmem:[#allocation8 + $0xe8] sm:$0xff]  }
 0x24c   : > { %4112 = vmatprep.subr.bf16.mxu0 %v5313_v15  ;;  %4155 = vmatprep.subr.bf16.mxu1 %v5315_v17  ;;  %v5521_v14 = vld [vmem:[#allocation8 + $0x28] sm:$0xff]   ;;  %v5523_v15 = vld [vmem:[#allocation8 + $0x60] sm:$0xff]  }
 0x24d   : > { %v5524_v17 = vld [vmem:[#allocation8 + $0xe0] sm:$0xff]  }
 0x24f   : > { %4113 = vmatpush2.bf16.msra.mxu0 %v5312_v60  ;;  %4156 = vmatpush2.bf16.msra.mxu1 %v5314_v22  ;;  %v5529_v60 = vld [vmem:[#allocation8 + $0x18] sm:$0xff]  }
 0x250   : > { %4114 = vmatprep.subr.bf16.mxu0 %v5305_v23  ;;  %4157 = vmatprep.subr.bf16.mxu1 %v5307_v25  ;;  %v5530_v22 = vld [vmem:[#allocation8 + $0x98] sm:$0xff]   ;;  %v5531_v23 = vld [vmem:[#allocation8 + $0x50] sm:$0xff]  }
 0x251   : > { %v5532_v25 = vld [vmem:[#allocation8 + $0xd0] sm:$0xff]  }
 0x253   : > { %4115 = vmatpush2.bf16.msra.mxu0 %v5304_v29  ;;  %4158 = vmatpush2.bf16.msra.mxu1 %v5306_v31  ;;  %v5537_v29 = vld [vmem:[#allocation8 + $0x8] sm:$0xff]  }
 0x254   : > { %4116 = vmatprep.subr.bf16.mxu0 %v5297_v32  ;;  %4159 = vmatprep.subr.bf16.mxu1 %v5299_v33  ;;  %v5538_v31 = vld [vmem:[#allocation8 + $0x88] sm:$0xff]   ;;  %v5539_v32 = vld [vmem:[#allocation8 + $0x40] sm:$0xff]  }
 0x255   : > { %v5540_v33 = vld [vmem:[#allocation8 + $0xc0] sm:$0xff]  }
 0x257   : > { %4117 = vmatpush2.bf16.msra.mxu0 %v5296_v39  ;;  %4160 = vmatpush2.bf16.msra.mxu1 %v5298_v41  ;;  %v1296_v39 = vpop.f32.mrf.mxu0  ;;  %v1339_v41 = vpop.f32.mrf.mxu1 }
 0x258   : > { %4118 = vmatprep.subr.bf16.mxu0 %v5289_v0  ;;  %4161 = vmatprep.subr.bf16.mxu1 %v5291_v42 }
 0x259   : > { %v1298_v0 = vpop.f32.mrf.mxu0  ;;  %v1341_v42 = vpop.f32.mrf.mxu1 }
 0x25b   : > { %4119 = vmatpush2.bf16.msra.mxu0 %v5288_v46  ;;  %4162 = vmatpush2.bf16.msra.mxu1 %v5290_v47  ;;  %v1300_v43 = vpop.f32.mrf.mxu0  ;;  %v1343_v44 = vpop.f32.mrf.mxu1 }
 0x25c   : > { %4120 = vmatprep.subr.bf16.mxu0 %v5281_v48  ;;  %4163 = vmatprep.subr.bf16.mxu1 %v5283_v49 }
 0x25d   : > { %v1380_v45 = vpop.f32.mrf.mxu0  ;;  %v1423_v10 = vpop.f32.mrf.mxu1 }
 0x25f   : > { %4121 = vmatpush2.bf16.msra.mxu0 %v5280_v57  ;;  %4164 = vmatpush2.bf16.msra.mxu1 %v5282_v63  ;;  %v1382_v46 = vpop.f32.mrf.mxu0  ;;  %v1425_v47 = vpop.f32.mrf.mxu1 }
 0x260   : > { %4122 = vmatprep.subr.bf16.mxu0 %v5273_v2  ;;  %4165 = vmatprep.subr.bf16.mxu1 %v5275_v3 }
 0x261   : > { %v1384_v48 = vpop.f32.mrf.mxu0  ;;  %v1427_v49 = vpop.f32.mrf.mxu1 }
 0x263   : > { %4123 = vmatpush2.bf16.msra.mxu0 %v5272_v61  ;;  %4166 = vmatpush2.bf16.msra.mxu1 %v5274_v1  ;;  %v1386_v50 = vpop.f32.mrf.mxu0  ;;  %v1429_v51 = vpop.f32.mrf.mxu1 }
 0x264   : > { %4124 = vmatprep.subr.bf16.mxu0 %v5265_v40  ;;  %4167 = vmatprep.subr.bf16.mxu1 %v5267_v4 }
 0x265   : > { %v2108_v62 = vpop.f32.mrf.mxu0  ;;  %v2151_v52 = vpop.f32.mrf.mxu1 }
 0x267   : > { %4125 = vmatpush2.bf16.msra.mxu0 %v5264_v7  ;;  %4168 = vmatpush2.bf16.msra.mxu1 %v5266_v16  ;;  %v2110_v57 = vpop.f32.mrf.mxu0  ;;  %v2153_v63 = vpop.f32.mrf.mxu1 }
 0x268   : > { %5366 = vmatprep.subr.bf16.mxu0 %v5511_v8  ;;  %5388 = vmatprep.subr.bf16.mxu1 %v5512_v54 }
 0x269   : > { %v2112_v2 = vpop.f32.mrf.mxu0  ;;  %v2155_v3 = vpop.f32.mrf.mxu1 }
 0x26a   : > { %4127 = vmatmul.mubr.bf16.vlgmr.msra.gmra.mxu0 %v6087_v12  ;;  %4170 = vmatmul.mubr.bf16.vlgmr.msra.gmra.mxu1 %v6087_v12  ;;  %v5522_v12 = vld [vmem:[#allocation8 + $0xa8] sm:$0xff]  }
 0x26b   : > { %5367 = vmatpush3.bf16.msra.mxu0 %v5513_v5  ;;  %5389 = vmatpush3.bf16.msra.mxu1 %v5514_v6  ;;  %v2114_v53 = vpop.f32.mrf.mxu0  ;;  %v2157_v55 = vpop.f32.mrf.mxu1 }
 0x26c   : > { %5368 = vmatprep.subr.bf16.mxu0 %v5515_v56  ;;  %5390 = vmatprep.subr.bf16.mxu1 %v5516_v18 }
 0x26d   : > { %v2194_v58 = vpop.f32.mrf.mxu0  ;;  %v2237_v59 = vpop.f32.mrf.mxu1 }
 0x26f   : > { %5369 = vmatpush3.bf16.msra.mxu0 %v5517_v9  ;;  %5391 = vmatpush3.bf16.msra.mxu1 %v5518_v11  ;;  %v2196_v61 = vpop.f32.mrf.mxu0  ;;  %v2239_v1 = vpop.f32.mrf.mxu1 }
 0x270   : > { %5370 = vmatprep.subr.bf16.mxu0 %v5519_v24  ;;  %5392 = vmatprep.subr.bf16.mxu1 %v5520_v13 }
 0x271   : > { %v2198_v40 = vpop.f32.mrf.mxu0  ;;  %v2241_v4 = vpop.f32.mrf.mxu1 }
 0x273   : > { %5371 = vmatpush3.bf16.msra.mxu0 %v5521_v14  ;;  %5393 = vmatpush3.bf16.msra.mxu1 %v5522_v12  ;;  %v2200_v7 = vpop.f32.mrf.mxu0  ;;  %v2243_v16 = vpop.f32.mrf.mxu1 }
 0x274   : > { %5372 = vmatprep.subr.bf16.mxu0 %v5523_v15  ;;  %5394 = vmatprep.subr.bf16.mxu1 %v5524_v17 }
 0x275   : > { %v3061_v8 = vpop.f32.mrf.mxu0  ;;  %v3104_v54 = vpop.f32.mrf.mxu1 }
 0x277   : > { %5373 = vmatpush3.bf16.msra.mxu0 %v5525_v19  ;;  %5395 = vmatpush3.bf16.msra.mxu1 %v5526_v20  ;;  %v3063_v5 = vpop.f32.mrf.mxu0  ;;  %v3106_v6 = vpop.f32.mrf.mxu1 }
 0x278   : > { %5374 = vmatprep.subr.bf16.mxu0 %v5527_v21  ;;  %5396 = vmatprep.subr.bf16.mxu1 %v5528_v36 }
 0x279   : > { %v3065_v56 = vpop.f32.mrf.mxu0  ;;  %v3108_v18 = vpop.f32.mrf.mxu1 }
 0x27b   : > { %5375 = vmatpush3.bf16.msra.mxu0 %v5529_v60  ;;  %5397 = vmatpush3.bf16.msra.mxu1 %v5530_v22  ;;  %v3067_v9 = vpop.f32.mrf.mxu0  ;;  %v3110_v11 = vpop.f32.mrf.mxu1 }
 0x27c   : > { %5376 = vmatprep.subr.bf16.mxu0 %v5531_v23  ;;  %5398 = vmatprep.subr.bf16.mxu1 %v5532_v25  ;;  %v2109_v23 = vadd.f32 %v2108_v62, %v1294_v37  ;;  %v2152_v25 = vadd.f32 %v2151_v52, %v1337_v38  ;;  %v2240_v37 = vadd.f32 %v2239_v1, %v1425_v47 }
 0x27d   : > { %v2199_v62 = vadd.f32 %v2198_v40, %v1384_v48  ;;  %v2242_v38 = vadd.f32 %v2241_v4, %v1427_v49 }
 0x27f   : > { %5377 = vmatpush3.bf16.msra.mxu0 %v5533_v30  ;;  %5399 = vmatpush3.bf16.msra.mxu1 %v5534_v26  ;;  %v2111_v30 = vadd.f32 %v2110_v57, %v1296_v39  ;;  %v2154_v26 = vadd.f32 %v2153_v63, %v1339_v41  ;;  %v2201_v39 = vadd.f32 %v2200_v7, %v1386_v50 }
 0x280   : > { %5378 = vmatprep.subr.bf16.mxu0 %v5535_v27  ;;  %5400 = vmatprep.subr.bf16.mxu1 %v5536_v28  ;;  %v2113_v27 = vadd.f32 %v2112_v2, %v1298_v0  ;;  %v2156_v28 = vadd.f32 %v2155_v3, %v1341_v42  ;;  %v2244_v57 = vadd.f32 %v2243_v16, %v1429_v51 }
 0x281   : > { %v3199_v41 = vadd.f32 %v3061_v8, %v2109_v23  ;;  %v3201_v63 = vadd.f32 %v3104_v54, %v2152_v25  ;;  %v3200_v0 = vadd.f32 %v3063_v5, %v2111_v30  ;;  %v3202_v2 = vadd.f32 %v3106_v6, %v2154_v26 }
 0x282   : > { %v3207_v3 = vadd.f32 %v3065_v56, %v2113_v27  ;;  %v3209_v42 = vadd.f32 %v3108_v18, %v2156_v28 }
 0x283   : > { %5379 = vmatpush3.bf16.msra.mxu0 %v5537_v29  ;;  %5401 = vmatpush3.bf16.msra.mxu1 %v5538_v31  ;;  %v2115_v29 = vadd.f32 %v2114_v53, %v1300_v43  ;;  %v2158_v31 = vadd.f32 %v2157_v55, %v1343_v44 }
 0x284   : > { %5380 = vmatprep.subr.bf16.mxu0 %v5539_v32  ;;  %5402 = vmatprep.subr.bf16.mxu1 %v5540_v33  ;;  %v2195_v32 = vadd.f32 %v2194_v58, %v1380_v45  ;;  %v2238_v33 = vadd.f32 %v2237_v59, %v1423_v10 }
 0x285   : > { %v3208_v43 = vadd.f32 %v3067_v9, %v2115_v29  ;;  %v3210_v53 = vadd.f32 %v3110_v11, %v2158_v31 }
 0x287   : > { %5381 = vmatpush3.bf16.msra.mxu0 %v5541_v34  ;;  %5403 = vmatpush3.bf16.msra.mxu1 %v5542_v35  ;;  %v2197_v35 = vadd.f32 %v2196_v61, %v1382_v46 }
 0x2aa   : > { %v3147_v24 = vpop.f32.mrf.mxu0  ;;  %v3190_v13 = vpop.f32.mrf.mxu1 }
 0x2ab   : > { %v3203_v10 = vadd.f32 %v3147_v24, %v2195_v32  ;;  %v3205_v58 = vadd.f32 %v3190_v13, %v2238_v33 }
 0x2ac   : > { %v3149_v14 = vpop.f32.mrf.mxu0  ;;  %v3192_v12 = vpop.f32.mrf.mxu1 }
 0x2ad   : > { %v3204_v49 = vadd.f32 %v3149_v14, %v2197_v35  ;;  %v3206_v59 = vadd.f32 %v3192_v12, %v2240_v37 }
 0x2ae   : > { %v3151_v15 = vpop.f32.mrf.mxu0  ;;  %v3194_v17 = vpop.f32.mrf.mxu1 }
 0x2af   : > { %v3211_v50 = vadd.f32 %v3151_v15, %v2199_v62  ;;  %v3213_v1 = vadd.f32 %v3194_v17, %v2242_v38 }
 0x2b0   : > { %v3153_v19 = vpop.f32.mrf.mxu0  ;;  %v3196_v20 = vpop.f32.mrf.mxu1 }
 0x2b1   : > { %v3212_v40 = vadd.f32 %v3153_v19, %v2201_v39  ;;  %v3214_v8 = vadd.f32 %v3196_v20, %v2244_v57 }
 0x2ea   : > { %v4042_v21 = vpop.f32.mrf.mxu0  ;;  %v4085_v36 = vpop.f32.mrf.mxu1 }
 0x2eb   : > { %v4180_v44 = vadd.f32 %v4042_v21, %v3199_v41  ;;  %v4182_v55 = vadd.f32 %v4085_v36, %v3201_v63 }
 0x2ec   : > { %v4044_v60 = vpop.f32.mrf.mxu0  ;;  %v4087_v22 = vpop.f32.mrf.mxu1 }
 0x2ed   : > { %v4181_v46 = vadd.f32 %v4044_v60, %v3200_v0  ;;  %v4183_v47 = vadd.f32 %v4087_v22, %v3202_v2  ;;  %v4196_v54 = vmul.f32 %v4180_v44, %v4180_v44  ;;  %v4198_v5 = vmul.f32 %v4182_v55, %v4182_v55 }
 0x2ee   : > { %v4046_v34 = vpop.f32.mrf.mxu0  ;;  %v4089_v52 = vpop.f32.mrf.mxu1 }
 0x2ef   : > { %v4188_v51 = vadd.f32 %v4046_v34, %v3207_v3  ;;  %v4190_v4 = vadd.f32 %v4089_v52, %v3209_v42  ;;  %v4197_v18 = vmul.f32 %v4181_v46, %v4181_v46  ;;  %v4199_v9 = vmul.f32 %v4183_v47, %v4183_v47 }
 0x2f0   : > { %v4048_v45 = vpop.f32.mrf.mxu0  ;;  %v4091_v48 = vpop.f32.mrf.mxu1 }
 0x2f1   : > { %v4200_v14 = vmul.f32 %v4188_v51, %v4188_v51  ;;  %v4189_v12 = vadd.f32 %v4048_v45, %v3208_v43  ;;  %v4202_v17 = vmul.f32 %v4190_v4, %v4190_v4  ;;  %v4191_v23 = vadd.f32 %v4091_v48, %v3210_v53 }
 0x2f3   : > { %v4201_v37 = vmul.f32 %v4189_v12, %v4189_v12  ;;  %v4203_v52 = vmul.f32 %v4191_v23, %v4191_v23 }
 0x32a   : > { %v4128_v61 = vpop.f32.mrf.mxu0  ;;  %v4171_v16 = vpop.f32.mrf.mxu1 }
 0x32b   : > { %v4184_v7 = vadd.f32 %v4128_v61, %v3203_v10  ;;  %v4186_v6 = vadd.f32 %v4171_v16, %v3205_v58 }
 0x32c   : > { %v4130_v56 = vpop.f32.mrf.mxu0  ;;  %v4173_v13 = vpop.f32.mrf.mxu1 }
 0x32d   : > { %v4204_v11 = vmul.f32 %v4184_v7, %v4184_v7  ;;  %v4185_v24 = vadd.f32 %v4130_v56, %v3204_v49  ;;  %v4206_v15 = vmul.f32 %v4186_v6, %v4186_v6  ;;  %v4187_v21 = vadd.f32 %v4173_v13, %v3206_v59 }
 0x32e   : > { %v4132_v36 = vpop.f32.mrf.mxu0  ;;  %v4175_v20 = vpop.f32.mrf.mxu1 }
 0x32f   : > { %v6095_v19 = vadd.f32 %v4204_v11, %v4196_v54  ;;  %v4205_v60 = vmul.f32 %v4185_v24, %v4185_v24  ;;  %v4192_v22 = vadd.f32 %v4132_v36, %v3211_v50  ;;  %v6097_v25 = vadd.f32 %v4206_v15, %v4198_v5 }
 0x330   : > { %v4207_v30 = vmul.f32 %v4187_v21, %v4187_v21  ;;  %v4194_v26 = vadd.f32 %v4175_v20, %v3213_v1  ;;  %v4134_v27 = vpop.f32.mrf.mxu0  ;;  %v4177_v32 = vpop.f32.mrf.mxu1 }
 0x331   : > { %5543 = vrsqrt.f32 %v6095_v19  ;;  %v6100_v28 = vadd.f32 %v4205_v60, %v4197_v18  ;;  %v4208_v29 = vmul.f32 %v4192_v22, %v4192_v22  ;;  %v4193_v31 = vadd.f32 %v4134_v27, %v3212_v40 }
 0x332   : > { %5545 = vrsqrt.f32 %v6097_v25  ;;  %v6103_v33 = vadd.f32 %v4207_v30, %v4199_v9  ;;  %v4210_v34 = vmul.f32 %v4194_v26, %v4194_v26  ;;  %v4195_v35 = vadd.f32 %v4177_v32, %v3214_v8 }
 0x333   : > { %5547 = vrsqrt.f32 %v6100_v28  ;;  %v4216_v62 = vadd.f32 %v4208_v29, %v4200_v14  ;;  %v4209_v38 = vmul.f32 %v4193_v31, %v4193_v31  ;;  %vm4229_vm6 = vcmp.eq.f32.partialorder %v6100_v28, inf }
 0x334   : > { %5549 = vrsqrt.f32 %v6103_v33  ;;  %v4218_v39 = vadd.f32 %v4210_v34, %v4202_v17  ;;  %v4211_v57 = vmul.f32 %v4195_v35, %v4195_v35  ;;  %v4232_v2 = vand.u32 2147483648, %v6100_v28 }
 0x335   : > { %5551 = vrsqrt.f32 %v4216_v62  ;;  %v4217_v41 = vadd.f32 %v4209_v38, %v4201_v37  ;;  %vm4231_vm7 = vcmp.eq.f32.partialorder %v6100_v28, 0.0  ;;  %vm4243_vm10 = vcmp.eq.f32.partialorder %v6103_v33, inf }
 0x336   : > { %5553 = vrsqrt.f32 %v4218_v39  ;;  %v4219_v63 = vadd.f32 %v4211_v57, %v4203_v52  ;;  %v4246_v42 = vand.u32 2147483648, %v6103_v33  ;;  %vm4245_vm11 = vcmp.eq.f32.partialorder %v6103_v33, 0.0 }
 0x337   : > { %5555 = vrsqrt.f32 %v4217_v41  ;;  %vm4257_vm8 = vcmp.eq.f32.partialorder %v4217_v41, inf  ;;  %vm4259_vm9 = vcmp.eq.f32.partialorder %v4217_v41, 0.0  ;;  %v4260_v53 = vand.u32 2147483648, %v4217_v41 }
 0x338   : > { %5557 = vrsqrt.f32 %v4219_v63  ;;  %vm4271_vm12 = vcmp.eq.f32.partialorder %v4219_v63, inf  ;;  %vm4273_vm13 = vcmp.eq.f32.partialorder %v4219_v63, 0.0  ;;  %v4274_v44 = vand.u32 2147483648, %v4219_v63 }
 0x339   : > { %vm4222_vm14 = vcmp.eq.f32.partialorder %v6095_v19, inf  ;;  %vm4224_vm15 = vcmp.eq.f32.partialorder %v6095_v19, 0.0  ;;  %v4225_v10 = vand.u32 2147483648, %v6095_v19  ;;  %vm4250_vm0 = vcmp.eq.f32.partialorder %v4216_v62, inf }
 0x33a   : > { %vm4252_vm1 = vcmp.eq.f32.partialorder %v4216_v62, 0.0  ;;  %v4253_v59 = vand.u32 2147483648, %v4216_v62  ;;  %vm4236_vm2 = vcmp.eq.f32.partialorder %v6097_v25, inf  ;;  %vm4238_vm3 = vcmp.eq.f32.partialorder %v6097_v25, 0.0 }
 0x33b   : > { %v4239_v61 = vand.u32 2147483648, %v6097_v25  ;;  %vm4264_vm4 = vcmp.eq.f32.partialorder %v4218_v39, inf  ;;  %v4267_v8 = vand.u32 2147483648, %v4218_v39  ;;  %vm4266_vm5 = vcmp.eq.f32.partialorder %v4218_v39, 0.0 }
 0x33e   : > { %v5544_v0 = vpop.eup %5543 }
 0x33f   : > { %v5546_v3 = vpop.eup %5545  ;;  %v4221_v47 = vmul.f32 %v5544_v0, %v6095_v19 }
 0x340   : > { %v5548_v43 = vpop.eup %5547  ;;  %v4235_v50 = vmul.f32 %v5546_v3, %v6097_v25 }
 0x341   : > { %v5550_v55 = vpop.eup %5549  ;;  %v4228_v45 = vmul.f32 %v5548_v43, %v6100_v28  ;;  %v4223_v6 = vsel %vm4222_vm14, %v6095_v19, %v4221_v47 }
 0x342   : > { %v5552_v58 = vpop.eup %5551  ;;  %v4242_v46 = vmul.f32 %v5550_v55, %v6103_v33  ;;  %v4237_v11 = vsel %vm4236_vm2, %v6097_v25, %v4235_v50  ;;  %v4226_v17 = vsel %vm4224_vm15, %v4225_v10, %v4223_v6 }
 0x343   : > { %v5554_v48 = vpop.eup %5553  ;;  %v4249_v49 = vmul.f32 %v5552_v58, %v4216_v62  ;;  %v4230_v4 = vsel %vm4229_vm6, %v6100_v28, %v4228_v45  ;;  %v4240_v20 = vsel %vm4238_vm3, %v4239_v61, %v4237_v11 }
 0x344   : > { %v5556_v51 = vpop.eup %5555  ;;  %v4263_v1 = vmul.f32 %v5554_v48, %v4218_v39  ;;  %v4244_v54 = vsel %vm4243_vm10, %v6103_v33, %v4242_v46  ;;  %v4233_v24 = vsel %vm4231_vm7, %v4232_v2, %v4230_v4 }
 0x345   : > { %v5558_v40 = vpop.eup %5557  ;;  %v4256_v7 = vmul.f32 %v5556_v51, %v4217_v41  ;;  %v4251_v16 = vsel %vm4250_vm0, %v4216_v62, %v4249_v49  ;;  %v4247_v21 = vsel %vm4245_vm11, %v4246_v42, %v4244_v54 }
 0x346   : > { %v4270_v5 = vmul.f32 %v5558_v40, %v4219_v63  ;;  %v4265_v56 = vsel %vm4264_vm4, %v4218_v39, %v4263_v1  ;;  %v4254_v9 = vsel %vm4252_vm1, %v4253_v59, %v4251_v16 }
 0x347   : > { %v4258_v18 = vsel %vm4257_vm8, %v4217_v41, %v4256_v7  ;;  %v4268_v12 = vsel %vm4266_vm5, %v4267_v8, %v4265_v56  ;;  %v4276_v22 = vpack.c.bf16 %v4254_v9, %v4226_v17 }
 0x348   : > { %v4261_v13 = vsel %vm4259_vm9, %v4260_v53, %v4258_v18  ;;  %v4272_v14 = vsel %vm4271_vm12, %v4219_v63, %v4270_v5  ;;  %v4278_v23 = vpack.c.bf16 %v4268_v12, %v4240_v20 }
 0x349   : > { %v4277_v15 = vpack.c.bf16 %v4261_v13, %v4233_v24  ;;  %v4275_v36 = vsel %vm4273_vm13, %v4274_v44, %v4272_v14 }
 0x34a   : > { %v4279_v60 = vpack.c.bf16 %v4275_v36, %v4247_v21 }
 0x34b   : > { %4568 = vmatprep.mubr.bf16.mxu0 %v4277_v15 }
 0x34c   : > { %4609 = vmatprep.mubr.bf16.mxu1 %v4279_v60  ;;  %4569 = vmatmul.mubr.bf16.vlgmr.msra.gmra.mxu0 %v4276_v22 }
 0x34d   : > { %4610 = vmatmul.mubr.bf16.vlgmr.msra.gmra.mxu1 %v4278_v23 }
 0x40c   : > { %v5382_v30 = vpop.f32.mrf.mxu0 }
 0x40d   : > { %v5404_v26 = vpop.f32.mrf.mxu1 }
 0x40e   : > { %v5383_v27 = vpop.f32.mrf.mxu0 }
 0x40f   : > { %v5384_v28 = vadd.f32 %v5383_v27, %v5382_v30  ;;  %v5405_v29 = vpop.f32.mrf.mxu1 }
 0x410   : > { %v5406_v31 = vadd.f32 %v5405_v29, %v5404_v26  ;;  %v5385_v32 = vpop.f32.mrf.mxu0 }
 0x411   : > { %v5407_v33 = vpop.f32.mrf.mxu1 }
 0x412   : > { %v4612_v19 = vadd.f32 %v5406_v31, %v5384_v28  ;;  %v5386_v34 = vpop.f32.mrf.mxu0 }
 0x413   : > { %v5387_v35 = vadd.f32 %v5386_v34, %v5385_v32  ;;  %v5408_v37 = vpop.f32.mrf.mxu1 }
 0x414   : > { %v4618_v62 = vmax.f32 %v4612_v19, 1e-05  ;;  %v5409_v25 = vadd.f32 %v5408_v37, %v5407_v33 }
 0x416   : > { %5559 = vlog2.f32 %v4618_v62  ;;  %v4615_v38 = vadd.f32 %v5409_v25, %v5387_v35 }
 0x418   : > { %v4619_v52 = vmax.f32 %v4615_v38, 1e-05 }
 0x41a   : > { %5561 = vlog2.f32 %v4619_v52 }
 0x423   : > { %v5560_v39 = vpop.eup %5559 }
 0x424   : > { %v4621_v57 = vmul.f32 0.6931472, %v5560_v39 }
 0x426   : > { %v4624_v41 = vmul.f32 0.4342945, %v4621_v57 }
 0x427   : > { %v5562_v63 = vpop.eup %5561 }
 0x428   : > { %v4626_v0 = vmul.f32 20.0, %v4624_v41  ;;  %v4623_v2 = vmul.f32 0.6931472, %v5562_v63 }
 0x42a   : > { %v5356_v3 = vadd.f32 -16.0, %v4626_v0  ;;  %v4625_v42 = vmul.f32 0.4342945, %v4623_v2 }
 0x42c   : > { %v4630_v43 = vadd.f32 100.0, %v5356_v3  ;;  %v4627_v53 = vmul.f32 20.0, %v4625_v42 }
 0x42e   : > { %v4633_v44 = vmul.f32 0.01, %v4630_v43  ;;  %v5357_v55 = vadd.f32 -16.0, %v4627_v53 }
 0x430   : > { %v4635_v45 = vmax.f32 %v4633_v44, 0.0  ;;  %v4631_v10 = vadd.f32 100.0, %v5357_v55 }
 0x432   : > { %v4637_v58 = vmin.f32 %v4635_v45, 1.0  ;;  %v4634_v46 = vmul.f32 0.01, %v4631_v10 }
 0x434   : > { %4639 = vst [vmem:[%s311_s23] sm:$0xff] %v4637_v58  ;;  %v4636_v47 = vmax.f32 %v4634_v46, 0.0 }
 0x436   : > { %v4638_v48 = vmin.f32 %v4636_v47, 1.0 }
 0x438   : > { %4640 = vst [vmem:[%s311_s23 + $0x8] sm:$0xff] %v4638_v48 }
 0x439   : > { %5687 = shalt.err (!%p5684_p1)
}
 0x43a   : > { %s5688_s26 = scalar_lea.hbm %s6153_s12, 256  ;;  %s5692_s7 = scalar_lea.hbm %s6207_s4, 512 }
 0x43b   : > { %p5689_p2 = scmp.ne.s32.totalorder %s6153_s12, %s5688_s26  ;;  %p5693_p13 = scmp.lt.s32.totalorder %s6153_s12, %s6207_s4 }
 0x43c   : > { %p5694_p0 = scmp.lt.s32.totalorder %s5692_s7, %s5688_s26 }
 0x43d   : > { %p5690_p6 = pnand %p5689_p2, %p5897_p9 }
 0x43e   : > { %p5695_p12 = por %p5694_p0, %p5693_p13 }
 0x43f   : > { %p5691_p8 = pneg %p5690_p6 }
 0x441   : > { %p5696_p4 = pnand %p5695_p12, %p5691_p8 }
 0x443   : > { %5699 = shalt.err (!%p5696_p4)
}
 0x444   : > { %s5779_s17 = smov 128   ;;  %s5780_s22 = smov 8  }
 0x445   : > { %5422 = dma.vmem_to_hbm [thread:$0]  (%p5897_p9), %s6155_s5, 256, %s6153_s12, %s4642_s13, %s5779_s17, %s5779_s17, %s5780_s22  }
 0x446 PF: > { %s4672_s2 = sand.u32 1, %s5746_s15   ;;  %p6235_p3 = scmp.ne.s32.totalorder %s6216_s24, 0 }
 0x447   : > { %p6236_p7 = scmp.ge.s32.totalorder %s5766_s20, 2  ;;  %s4673_s3 = scalar_lea.sflag [#allocation4], %s4672_s2 }
 0x449   : > { %p5439_p11 = pnand %p6236_p7, %p6235_p3 }
 0x44b   : > { %p5440_p5 = pneg %p5439_p11 }
 0x44d   : > { %5741 = dma.done.wait (%p5440_p5), %s4673_s3, 256  }
 0x44e   : > { %5743 = vsyncadd (%p5440_p5), %s4673_s3, 4294967040  ;;  %s24_s20 = sadd.s32 1, %s5766_s20   ;;  %s6237_s25 = sld [smem:[#allocation16_spill]] }
 0x44f   : > { %p21_p10 = scmp.ge.s32.totalorder %s24_s20, 4   ;;  %s6238_s17 = sld [smem:[#allocation18_spill]] }
 0x450   : > { %s6239_s27 = sld [smem:[#allocation17_spill]]  ;;  %s6240_s15 = smov %s5750_s16 }
 0x451   : > { %s6242_s18 = smov %s5762_s19 }
 0x452   :  { %23 = sbr.rel (!%p21_p10) target bundleno = 13 (0xd), region = 102 }
 0x454   : > { %s6241_s16 = smov %s6237_s25 }
 0x456   : > { %s6243_s19 = smov %s6239_s27 }
 0x457   :  { %4678 = vsyncpa [#allocation3], 1 }
 0x458   :  { %4680 = vsyncpa [#allocation3 + $0x1], 1 }
 0x459   :  { %4681 = vsyncpa [#allocation6], 1 }
 0x45a   :  { %4683 = vsyncpa [#allocation6 + $0x1], 1 }
 0x45b   :  { %4684 = vsyncpa [#allocation9], 1 }
 0x45c   :  { %4685 = vsyncpa [#allocation4], 1 }
 0x45d   :  { %4687 = vsyncpa [#allocation4 + $0x1], 1 }

</bundles_post_ra>
